<compile_context>
chip_gen: v5e
topology: v5e:2x2
jax: 0.10.0
libtpu: 0.0.40
codegen_flags: <defaults>
</compile_context>

<pallas_src>
import functools

import jax
import jax.numpy as jnp
from jax.experimental import pallas as pl
from jax.experimental.pallas import tpu as pltpu


def _round_up(n, m):
    return ((n + m - 1) // m) * m


def _mlp_kernel(xt_ref, w1_ref, b1_ref, w2_ref, b2_ref, w3_ref, b3_ref,
                w4_ref, b4_ref, o_ref):
    # Layer 1: xt already holds [x, t/T, zero-pad] -> single K=8 f32 matmul.
    h = jnp.dot(xt_ref[...], w1_ref[...], preferred_element_type=jnp.float32)
    h = jnp.maximum(h + b1_ref[...], 0.0)
    # Layers 2/3/4: bf16 operands, f32 accumulation (MXU-native path).
    h = jnp.dot(h.astype(jnp.bfloat16), w2_ref[...],
                preferred_element_type=jnp.float32)
    h = jnp.maximum(h + b2_ref[...], 0.0)
    h = jnp.dot(h.astype(jnp.bfloat16), w3_ref[...],
                preferred_element_type=jnp.float32)
    h = jnp.maximum(h + b3_ref[...], 0.0)
    out = jnp.dot(h.astype(jnp.bfloat16), w4_ref[...],
                  preferred_element_type=jnp.float32)
    o_ref[...] = (out + b4_ref[...]).astype(o_ref.dtype)


def prepare_params(params, *, hidden_pad=512, lane=128):
    """Pad / cast parameters once, off the hot path.

    * fc1 weight padded to (round_up(dim+1, 8), hidden_pad), kept f32, so the
      fused [x, t/T] input is one clean K=8 MXU pass.
    * fc2/fc3/fc4 weights stored bf16 (MXU-native operands, half the DMA
      bytes); biases stay f32 and are added after the f32 accumulation.
    * Zero padding is exact: padded hidden columns remain 0 through bias+ReLU
      and padded w4 rows/cols only feed the (sliced-off) output lanes.
    """
    dim_p1, hidden = params["w1"].shape
    out_dim = params["w4"].shape[1]
    k1 = _round_up(dim_p1, 8)
    out_pad = _round_up(out_dim, lane)

    def pad2(a, rows, cols, dtype=jnp.float32):
        a = jnp.pad(a, ((0, rows - a.shape[0]), (0, cols - a.shape[1])))
        return a.astype(dtype)

    return dict(
        w1=pad2(params["w1"], k1, hidden_pad),
        b1=pad2(params["b1"], 1, hidden_pad),
        w2=pad2(params["w2"], hidden_pad, hidden_pad, jnp.bfloat16),
        b2=pad2(params["b2"], 1, hidden_pad),
        w3=pad2(params["w3"], hidden_pad, hidden_pad, jnp.bfloat16),
        b3=pad2(params["b3"], 1, hidden_pad),
        w4=pad2(params["w4"], hidden_pad, out_pad, jnp.bfloat16),
        b4=pad2(params["b4"], 1, out_pad),
    )


def mlp_forward(xt, p, *, out_dim, block_b=512, slice_output=True):
    """xt: (B, k1) f32 holding [x, t/T, zero pad]."""
    B, k1 = xt.shape
    hidden_pad = p["w2"].shape[0]
    out_pad = p["w4"].shape[1]

    # MXU-sized batch tile; force >=2 grid steps whenever there is enough
    # (padded) work so the "parallel" batch axis shards over both v7x cores.
    b_full = _round_up(B, 128)
    block_b = min(block_b, b_full)
    if b_full >= 256 and b_full // block_b < 2:
        block_b = _round_up(b_full // 2, 128)
    B_pad = _round_up(B, block_b)
    if B_pad != B:
        xt = jnp.pad(xt, ((0, B_pad - B), (0, 0)))

    # Weight / bias blocks: constant index maps -> fetched once, VMEM-resident.
    const = lambda shape: pl.BlockSpec(shape, lambda i: (0, 0))

    out = pl.pallas_call(
        _mlp_kernel,
        out_shape=jax.ShapeDtypeStruct((B_pad, out_pad), jnp.float32),
        grid_spec=pltpu.PrefetchScalarGridSpec(
            num_scalar_prefetch=0,
            grid=(B_pad // block_b,),
            in_specs=[
                pl.BlockSpec((block_b, k1), lambda i: (i, 0)),   # [x | t/T] tile
                const((k1, hidden_pad)),                         # w1 (f32)
                const((1, hidden_pad)),                          # b1
                const((hidden_pad, hidden_pad)),                 # w2 (bf16)
                const((1, hidden_pad)),                          # b2
                const((hidden_pad, hidden_pad)),                 # w3 (bf16)
                const((1, hidden_pad)),                          # b3
                const((hidden_pad, out_pad)),                    # w4 (bf16)
                const((1, out_pad)),                             # b4
            ],
            out_specs=pl.BlockSpec((block_b, out_pad), lambda i: (i, 0)),
        ),
        compiler_params=pltpu.CompilerParams(
            dimension_semantics=("parallel",)),
    )(xt, p["w1"], p["b1"], p["w2"], p["b2"], p["w3"], p["b3"],
      p["w4"], p["b4"])

    if slice_output:
        # Callers fusing this into a larger pipeline should instead keep the
        # lane-dense (B_pad, 128) slab and slice only at the very end.
        return out[:B, :out_dim]
    return out


def model_forward(x, t, prepared_params, *, T, out_dim):
    """Equivalent of Model.forward(x, t): x (B, dim), t (B,)."""
    dim = x.shape[-1]
    x = x.reshape(-1, dim).astype(jnp.float32)
    t_norm = (t.astype(jnp.float32) / float(T)).reshape(-1, 1)
    k1 = prepared_params["w1"].shape[0]
    xt = jnp.concatenate([x, t_norm], axis=1)
    xt = jnp.pad(xt, ((0, 0), (0, k1 - (dim + 1))))
    return mlp_forward(xt, prepared_params, out_dim=out_dim)


def init_params(key, dim, hidden=400):
    """Init mimicking PyTorch nn.Linear default (U[-1/sqrt(fan_in), +])."""
    def linear(k, fan_in, fan_out):
        kw, kb = jax.random.split(k)
        bound = 1.0 / jnp.sqrt(fan_in)
        w = jax.random.uniform(kw, (fan_in, fan_out), jnp.float32, -bound, bound)
        b = jax.random.uniform(kb, (1, fan_out), jnp.float32, -bound, bound)
        return w, b

    k1, k2, k3, k4 = jax.random.split(key, 4)
    w1, b1 = linear(k1, dim + 1, hidden)
    w2, b2 = linear(k2, hidden, hidden)
    w3, b3 = linear(k3, hidden, hidden)
    w4, b4 = linear(k4, hidden, dim)
    return dict(w1=w1, b1=b1, w2=w2, b2=b2, w3=w3, b3=b3, w4=w4, b4=b4)


if __name__ == "__main__":
    dim = 4      # data dimension
    T = 1000     # diffusion horizon
    B = 8        # small sampling batch (weight-DMA / overhead-bound regime)

    key = jax.random.PRNGKey(0)
    kx, kt, kp = jax.random.split(key, 3)

    x = jax.random.normal(kx, (B, dim), dtype=jnp.float32)
    t = jax.random.randint(kt, (B,), 0, T).astype(jnp.float32)
    params = init_params(kp, dim)
    prep = prepare_params(params)   # one-time pad/split/cast

    fwd = jax.jit(functools.partial(model_forward, T=T, out_dim=dim))
    out = jax.block_until_ready(fwd(x, t, prep))

    # Pure-JAX all-f32 reference against the unpadded parameters.
    def ref(x, t, p):
        h = jnp.concatenate([x, t[:, None] / float(T)], axis=1)
        h = jnp.maximum(h @ p["w1"] + p["b1"], 0.0)
        h = jnp.maximum(h @ p["w2"] + p["b2"], 0.0)
        h = jnp.maximum(h @ p["w3"] + p["b3"], 0.0)
        return h @ p["w4"] + p["b4"]

    expected = ref(x, t, params)
    assert out.shape == (B, dim)
    # bf16 operands (f32 accumulation) in layers 2-4 introduce ~1e-3..1e-2
    # relative error vs. the all-f32 reference; 5e-2 leaves a large margin.
    assert jnp.allclose(out, expected, atol=5e-2, rtol=5e-2), float(
        jnp.max(jnp.abs(out - expected)))

    # Larger batch exercises the multi-tile grid path (>=2 "parallel" steps).
    B2 = 384
    x2 = jax.random.normal(jax.random.PRNGKey(1), (B2, dim), dtype=jnp.float32)
    t2 = jax.random.randint(jax.random.PRNGKey(2), (B2,), 0, T).astype(jnp.float32)
    out2 = jax.block_until_ready(fwd(x2, t2, prep))
    assert out2.shape == (B2, dim)
    assert jnp.allclose(out2, ref(x2, t2, params), atol=5e-2, rtol=5e-2), float(
        jnp.max(jnp.abs(out2 - ref(x2, t2, params))))

    print("KERNEL_OK")
</pallas_src>

<mosaic_0001>
module attributes {stable_mosaic.version = 11 : i64} {
  func.func @_mlp_kernel(%arg0: i32, %arg1: memref<128x8xf32, #tpu.memory_space<vmem>>, %arg2: memref<8x512xf32, #tpu.memory_space<vmem>>, %arg3: memref<1x512xf32, #tpu.memory_space<vmem>>, %arg4: memref<512x512xbf16, #tpu.memory_space<vmem>>, %arg5: memref<1x512xf32, #tpu.memory_space<vmem>>, %arg6: memref<512x512xbf16, #tpu.memory_space<vmem>>, %arg7: memref<1x512xf32, #tpu.memory_space<vmem>>, %arg8: memref<512x128xbf16, #tpu.memory_space<vmem>>, %arg9: memref<1x128xf32, #tpu.memory_space<vmem>>, %arg10: memref<128x128xf32, #tpu.memory_space<vmem>>) attributes {dimension_semantics = [#tpu.dimension_semantics<parallel>], iteration_bounds = array<i64: 1>, scalar_prefetch = 0 : i64, scratch_operands = 0 : i64, tpu.core_type = #tpu.core_type<tc>, window_params = [{transform_indices = @transform_0, window_bounds = array<i64: 128, 8>}, {pipeline_mode = #tpu.pipeline_mode<synchronous>, transform_indices = @transform_1, window_bounds = array<i64: 8, 512>}, {pipeline_mode = #tpu.pipeline_mode<synchronous>, transform_indices = @transform_2, window_bounds = array<i64: 1, 512>}, {pipeline_mode = #tpu.pipeline_mode<synchronous>, transform_indices = @transform_3, window_bounds = array<i64: 512, 512>}, {pipeline_mode = #tpu.pipeline_mode<synchronous>, transform_indices = @transform_4, window_bounds = array<i64: 1, 512>}, {pipeline_mode = #tpu.pipeline_mode<synchronous>, transform_indices = @transform_5, window_bounds = array<i64: 512, 512>}, {pipeline_mode = #tpu.pipeline_mode<synchronous>, transform_indices = @transform_6, window_bounds = array<i64: 1, 512>}, {pipeline_mode = #tpu.pipeline_mode<synchronous>, transform_indices = @transform_7, window_bounds = array<i64: 512, 128>}, {pipeline_mode = #tpu.pipeline_mode<synchronous>, transform_indices = @transform_8, window_bounds = array<i64: 1, 128>}, {transform_indices = @transform_9, window_bounds = array<i64: 128, 128>}]} {
    %c0 = arith.constant 0 : index
    %c0_0 = arith.constant 0 : index
    %0 = vector.load %arg1[%c0, %c0_0] : memref<128x8xf32, #tpu.memory_space<vmem>>, vector<128x8xf32>
    %c0_1 = arith.constant 0 : index
    %c0_2 = arith.constant 0 : index
    %1 = vector.load %arg2[%c0_1, %c0_2] : memref<8x512xf32, #tpu.memory_space<vmem>>, vector<8x512xf32>
    %cst = arith.constant dense<0.000000e+00> : vector<128x512xf32>
    %2 = tpu.matmul %0, %1, %cst {dimension_numbers = #tpu.dot_dimension_numbers<[1], [0], [0], [1], [0, 0, 1, 1], [], []>} : vector<128x8xf32>, vector<8x512xf32>, vector<128x512xf32> -> vector<128x512xf32>
    %c0_3 = arith.constant 0 : index
    %c0_4 = arith.constant 0 : index
    %3 = vector.load %arg3[%c0_3, %c0_4] : memref<1x512xf32, #tpu.memory_space<vmem>>, vector<1x512xf32>
    %4 = vector.broadcast %3 : vector<1x512xf32> to vector<128x512xf32>
    %5 = arith.addf %2, %4 : vector<128x512xf32>
    %cst_5 = arith.constant 0.000000e+00 : f32
    %6 = vector.broadcast %cst_5 : f32 to vector<128x512xf32>
    %7 = arith.maximumf %5, %6 : vector<128x512xf32>
    %8 = arith.truncf %7 : vector<128x512xf32> to vector<128x512xbf16>
    %c0_6 = arith.constant 0 : index
    %c0_7 = arith.constant 0 : index
    %9 = vector.load %arg4[%c0_6, %c0_7] : memref<512x512xbf16, #tpu.memory_space<vmem>>, vector<512x512xbf16>
    %cst_8 = arith.constant dense<0.000000e+00> : vector<128x512xf32>
    %10 = tpu.matmul %8, %9, %cst_8 {dimension_numbers = #tpu.dot_dimension_numbers<[1], [0], [0], [1], [0, 0, 1, 1], [], []>} : vector<128x512xbf16>, vector<512x512xbf16>, vector<128x512xf32> -> vector<128x512xf32>
    %c0_9 = arith.constant 0 : index
    %c0_10 = arith.constant 0 : index
    %11 = vector.load %arg5[%c0_9, %c0_10] : memref<1x512xf32, #tpu.memory_space<vmem>>, vector<1x512xf32>
    %12 = vector.broadcast %11 : vector<1x512xf32> to vector<128x512xf32>
    %13 = arith.addf %10, %12 : vector<128x512xf32>
    %cst_11 = arith.constant 0.000000e+00 : f32
    %14 = vector.broadcast %cst_11 : f32 to vector<128x512xf32>
    %15 = arith.maximumf %13, %14 : vector<128x512xf32>
    %16 = arith.truncf %15 : vector<128x512xf32> to vector<128x512xbf16>
    %c0_12 = arith.constant 0 : index
    %c0_13 = arith.constant 0 : index
    %17 = vector.load %arg6[%c0_12, %c0_13] : memref<512x512xbf16, #tpu.memory_space<vmem>>, vector<512x512xbf16>
    %cst_14 = arith.constant dense<0.000000e+00> : vector<128x512xf32>
    %18 = tpu.matmul %16, %17, %cst_14 {dimension_numbers = #tpu.dot_dimension_numbers<[1], [0], [0], [1], [0, 0, 1, 1], [], []>} : vector<128x512xbf16>, vector<512x512xbf16>, vector<128x512xf32> -> vector<128x512xf32>
    %c0_15 = arith.constant 0 : index
    %c0_16 = arith.constant 0 : index
    %19 = vector.load %arg7[%c0_15, %c0_16] : memref<1x512xf32, #tpu.memory_space<vmem>>, vector<1x512xf32>
    %20 = vector.broadcast %19 : vector<1x512xf32> to vector<128x512xf32>
    %21 = arith.addf %18, %20 : vector<128x512xf32>
    %cst_17 = arith.constant 0.000000e+00 : f32
    %22 = vector.broadcast %cst_17 : f32 to vector<128x512xf32>
    %23 = arith.maximumf %21, %22 : vector<128x512xf32>
    %24 = arith.truncf %23 : vector<128x512xf32> to vector<128x512xbf16>
    %c0_18 = arith.constant 0 : index
    %c0_19 = arith.constant 0 : index
    %25 = vector.load %arg8[%c0_18, %c0_19] : memref<512x128xbf16, #tpu.memory_space<vmem>>, vector<512x128xbf16>
    %cst_20 = arith.constant dense<0.000000e+00> : vector<128x128xf32>
    %26 = tpu.matmul %24, %25, %cst_20 {dimension_numbers = #tpu.dot_dimension_numbers<[1], [0], [0], [1], [0, 0, 1, 1], [], []>} : vector<128x512xbf16>, vector<512x128xbf16>, vector<128x128xf32> -> vector<128x128xf32>
    %c0_21 = arith.constant 0 : index
    %c0_22 = arith.constant 0 : index
    %27 = vector.load %arg9[%c0_21, %c0_22] : memref<1x128xf32, #tpu.memory_space<vmem>>, vector<1x128xf32>
    %28 = vector.broadcast %27 : vector<1x128xf32> to vector<128x128xf32>
    %29 = arith.addf %26, %28 : vector<128x128xf32>
    %c0_23 = arith.constant 0 : index
    %c0_24 = arith.constant 0 : index
    %30 = vector.load %arg10[%c0_23, %c0_24] : memref<128x128xf32, #tpu.memory_space<vmem>>, vector<128x128xf32>
    tpu.vector_store %arg10[%c0_23, %c0_24], %29 {strides = array<i32>} : memref<128x128xf32, #tpu.memory_space<vmem>>, vector<128x128xf32>,
    return
  }
  func.func @transform_0(%arg0: i32) -> (i32, i32) {
    %c0_i32 = arith.constant 0 : i32
    %c0_i32_0 = arith.constant 0 : i32
    return %arg0, %c0_i32 : i32, i32
  }
  func.func @transform_1(%arg0: i32) -> (i32, i32) {
    %c0_i32 = arith.constant 0 : i32
    %c0_i32_0 = arith.constant 0 : i32
    %c0_i32_1 = arith.constant 0 : i32
    return %c0_i32, %c0_i32_0 : i32, i32
  }
  func.func @transform_2(%arg0: i32) -> (i32, i32) {
    %c0_i32 = arith.constant 0 : i32
    %c0_i32_0 = arith.constant 0 : i32
    %c0_i32_1 = arith.constant 0 : i32
    return %c0_i32, %c0_i32_0 : i32, i32
  }
  func.func @transform_3(%arg0: i32) -> (i32, i32) {
    %c0_i32 = arith.constant 0 : i32
    %c0_i32_0 = arith.constant 0 : i32
    %c0_i32_1 = arith.constant 0 : i32
    return %c0_i32, %c0_i32_0 : i32, i32
  }
  func.func @transform_4(%arg0: i32) -> (i32, i32) {
    %c0_i32 = arith.constant 0 : i32
    %c0_i32_0 = arith.constant 0 : i32
    %c0_i32_1 = arith.constant 0 : i32
    return %c0_i32, %c0_i32_0 : i32, i32
  }
  func.func @transform_5(%arg0: i32) -> (i32, i32) {
    %c0_i32 = arith.constant 0 : i32
    %c0_i32_0 = arith.constant 0 : i32
    %c0_i32_1 = arith.constant 0 : i32
    return %c0_i32, %c0_i32_0 : i32, i32
  }
  func.func @transform_6(%arg0: i32) -> (i32, i32) {
    %c0_i32 = arith.constant 0 : i32
    %c0_i32_0 = arith.constant 0 : i32
    %c0_i32_1 = arith.constant 0 : i32
    return %c0_i32, %c0_i32_0 : i32, i32
  }
  func.func @transform_7(%arg0: i32) -> (i32, i32) {
    %c0_i32 = arith.constant 0 : i32
    %c0_i32_0 = arith.constant 0 : i32
    %c0_i32_1 = arith.constant 0 : i32
    return %c0_i32, %c0_i32_0 : i32, i32
  }
  func.func @transform_8(%arg0: i32) -> (i32, i32) {
    %c0_i32 = arith.constant 0 : i32
    %c0_i32_0 = arith.constant 0 : i32
    %c0_i32_1 = arith.constant 0 : i32
    return %c0_i32, %c0_i32_0 : i32, i32
  }
  func.func @transform_9(%arg0: i32) -> (i32, i32) {
    %c0_i32 = arith.constant 0 : i32
    %c0_i32_0 = arith.constant 0 : i32
    return %arg0, %c0_i32 : i32, i32
  }
}

</mosaic_0001>

<bundles_post_ra>
// kernel: model_forward.1
= control target key start
LH: loop header
LB: loop body
LE: loop exit
PB: predicated region body
PF: predicated region fallthrough
CT: control target
= control target key end

     0   :  { %14 = vsyncpa [#allocation3], 0  ;;  %s6866_s0 = inlined_call_operand.vmem [shape: f32[128,8], index: 0, kind: input, shape index: {}]   ;;  %s6867_s1 = inlined_call_operand.vmem [shape: f32[8,512], index: 1, kind: input, shape index: {}]   ;;  %s6868_s2 = inlined_call_operand.vmem [shape: f32[1,512], index: 2, kind: input, shape index: {}]   ;;  %s6869_s3 = inlined_call_operand.hbm [shape: bf16[512,512], index: 3, kind: input, shape index: {}]   ;;  %s6870_s4 = inlined_call_operand.vmem [shape: f32[1,512], index: 4, kind: input, shape index: {}]   ;;  %s6871_s5 = inlined_call_operand.hbm [shape: bf16[512,512], index: 5, kind: input, shape index: {}]   ;;  %s6872_s6 = inlined_call_operand.vmem [shape: f32[1,512], index: 6, kind: input, shape index: {}]   ;;  %s6873_s7 = inlined_call_operand.hbm [shape: bf16[512,128], index: 7, kind: input, shape index: {}]   ;;  %s6874_s8 = inlined_call_operand.vmem [shape: f32[1,128], index: 8, kind: input, shape index: {}]   ;;  %s6875_s9 = inlined_call_operand.vmem [shape: f32[128,128], index: 9, kind: output, shape index: {}]  }
   0x1   :  { %15 = vsyncpa [#allocation5], 0  ;;  %s41_s11 = sshll.u32 %s6871_s5, 4  ;;  %s5898_s12 = smov [#allocation4]   ;;  %s42_s11 = int_to_ptr.hbm [resolvable:$true] %s41_s11 }
   0x2   :  { %s43_s13 = sshll.u32 %s5898_s12, 4  ;;  %s26_s16 = sshll.u32 %s6869_s3, 4  ;;  %s44_s13 = int_to_ptr.vmem [resolvable:$true] %s43_s13  ;;  %s27_s16 = int_to_ptr.hbm [resolvable:$true] %s26_s16 }
   0x3   :  { %s5899_s17 = smov 256   ;;  %s5900_s18 = smov 16  }
   0x4   :  { %49 = dma.hbm_to_vmem [thread:$0]  %s42_s11, 16384, %s44_s13, [#allocation5], %s5899_s17, %s5899_s17, %s5900_s18  }
   0x5   :  { %s5901_s19 = smov [#allocation2]   ;;  %s56_s23 = sshll.u32 %s6873_s7, 4  ;;  %s57_s23 = int_to_ptr.hbm [resolvable:$true] %s56_s23 }
   0x6   :  { %s28_s20 = sshll.u32 %s5901_s19, 4  ;;  %s5902_s5 = smov [#allocation6]   ;;  %s29_s20 = int_to_ptr.vmem [resolvable:$true] %s28_s20 }
   0x7   :  { %34 = dma.hbm_to_vmem [thread:$0]  %s27_s16, 16384, %s29_s20, [#allocation3], %s5899_s17, %s5899_s17, %s5900_s18  }
   0x8   :  { %s58_s24 = sshll.u32 %s5902_s5, 4  ;;  %s5903_s25 = smov 64   ;;  %s59_s24 = int_to_ptr.vmem [resolvable:$true] %s58_s24 }
   0x9   :  { %s5904_s26 = smov 4  }
   0xa   :  { %64 = dma.hbm_to_vmem [thread:$0]  %s57_s23, 4096, %s59_s24, [#allocation5], %s5903_s25, %s5903_s25, %s5904_s26  }
   0xb   :  { %5894 = dma.done.wait [#allocation3], 16384  }
   0xc   :  { %5895 = vsyncadd [#allocation3], 4294950912 }
   0xd   :  { %5896 = dma.done.wait [#allocation5], 20480  }
   0xe   :  { %5897 = vsyncadd [#allocation5], 4294946816  ;;  %v95_v0 = vld [vmem:[%s6867_s1] sm:$0xff]  ;;  %v96_v1 = vld [vmem:[%s6867_s1 + $0x8] sm:$0xff]  ;;  %vm109_vm0 = vcmask 64512  }
   0xf   :  { %v97_v2 = vld [vmem:[%s6867_s1 + $0x10] sm:$0xff]  ;;  %173 = vmatpush.msra.mxu0 %v95_v0  ;;  %238 = vmatpush.msra.mxu1 %v96_v1  ;;  %v98_v3 = vld [vmem:[%s6867_s1 + $0x18] sm:$0xff]  ;;  %v79_v4 = vld [vmem:[%s6866_s0] sm:$0xff] }
  0x10   :  { %303 = vmatpush.msra.mxu2 %v97_v2  ;;  %368 = vmatpush.msra.mxu3 %v98_v3  ;;  %v4742_v5 = vld [vmem:[#allocation2 + $0x2e0] sm:$0xf]  ;;  %v5618_v6 = vld [vmem:[#allocation2 + $0x2ec] sm:$0xf0]  ;;  %v80_v26 = vld [vmem:[%s6866_s0 + $0x8] sm:$0xff] }
  0x11   :  { %4308 = vmatmul.msk.f32.vlgmr.msra.gmra.mxu0 %vm109_vm0, %v79_v4  ;;  %4324 = vmatmul.msk.f32.vlgmr.msra.gmra.mxu1 %vm109_vm0, %v79_v4  ;;  %v4743_v7 = vor.u32 %v5618_v6, %v4742_v5  ;;  %v4486_v8 = vld [vmem:[#allocation2 + $0xe0] sm:$0xf]  ;;  %v5554_v9 = vld [vmem:[#allocation2 + $0xec] sm:$0xf0]  ;;  %v82_v43 = vld [vmem:[%s6866_s0 + $0x18] sm:$0xff] }
  0x12   :  { %v4870_v10 = vld [vmem:[#allocation2 + $0x3e0] sm:$0xf]  ;;  %4340 = vmatmul.msk.f32.vlgmr.msra.gmra.mxu2 %vm109_vm0, %v79_v4  ;;  %4356 = vmatmul.msk.f32.vlgmr.msra.gmra.mxu3 %vm109_vm0, %v79_v4  ;;  %v4487_v11 = vor.u32 %v5554_v9, %v4486_v8  ;;  %v5650_v12 = vld [vmem:[#allocation2 + $0x3ec] sm:$0xf0]  ;;  %v84_v57 = vld [vmem:[%s6866_s0 + $0x28] sm:$0xff] }
  0x13   :  { %v4614_v13 = vld [vmem:[#allocation2 + $0x1e0] sm:$0xf]  ;;  %v5586_v14 = vld [vmem:[#allocation2 + $0x1ec] sm:$0xf0]  ;;  %1390 = vmatpush.bf16.msrb.mxu2 %v4743_v7  ;;  %v4871_v15 = vor.u32 %v5650_v12, %v4870_v10  ;;  %v86_v7 = vld [vmem:[%s6866_s0 + $0x38] sm:$0xff] }
  0x14   :  { %v4615_v16 = vor.u32 %v5586_v14, %v4614_v13  ;;  %v4726_v17 = vld [vmem:[#allocation2 + $0x2c0] sm:$0xf]  ;;  %1292 = vmatpush.bf16.msrb.mxu0 %v4487_v11  ;;  %v5614_v18 = vld [vmem:[#allocation2 + $0x2cc] sm:$0xf0] }
  0x15   :  { %v4470_v19 = vld [vmem:[#allocation2 + $0xc0] sm:$0xf]  ;;  %v5550_v20 = vld [vmem:[#allocation2 + $0xcc] sm:$0xf0]  ;;  %1439 = vmatpush.bf16.msrb.mxu3 %v4871_v15  ;;  %v4727_v21 = vor.u32 %v5614_v18, %v4726_v17 }
  0x16   :  { %1341 = vmatpush.bf16.msrb.mxu1 %v4615_v16  ;;  %v4471_v22 = vor.u32 %v5550_v20, %v4470_v19  ;;  %v4854_v23 = vld [vmem:[#allocation2 + $0x3c0] sm:$0xf]  ;;  %v5646_v24 = vld [vmem:[#allocation2 + $0x3cc] sm:$0xf0] }
  0x17   :  { %v4598_v25 = vld [vmem:[#allocation2 + $0x1c0] sm:$0xf]  ;;  %v5582_v27 = vld [vmem:[#allocation2 + $0x1cc] sm:$0xf0]  ;;  %1391 = vmatpush.bf16.msrb.mxu2 %v4727_v21  ;;  %v4855_v28 = vor.u32 %v5646_v24, %v4854_v23  ;;  %v88_v21 = vld [vmem:[%s6866_s0 + $0x48] sm:$0xff] }
  0x18   :  { %v4599_v29 = vor.u32 %v5582_v27, %v4598_v25  ;;  %1293 = vmatpush.bf16.msrb.mxu0 %v4471_v22  ;;  %v81_v30 = vld [vmem:[%s6866_s0 + $0x10] sm:$0xff]  ;;  %v4710_v31 = vld [vmem:[#allocation2 + $0x2a0] sm:$0xf] }
  0x19   :  { %4309 = vmatmul.msk.f32.gmra.mxu0 %vm109_vm0, %v80_v26  ;;  %4325 = vmatmul.msk.f32.gmra.mxu1 %vm109_vm0, %v80_v26  ;;  %v5610_v32 = vld [vmem:[#allocation2 + $0x2ac] sm:$0xf0]  ;;  %v4454_v33 = vld [vmem:[#allocation2 + $0xa0] sm:$0xf] }
  0x1a   :  { %4341 = vmatmul.msk.f32.gmra.mxu2 %vm109_vm0, %v80_v26  ;;  %4357 = vmatmul.msk.f32.gmra.mxu3 %vm109_vm0, %v80_v26  ;;  %v4711_v34 = vor.u32 %v5610_v32, %v4710_v31  ;;  %v5546_v35 = vld [vmem:[#allocation2 + $0xac] sm:$0xf0]  ;;  %v4838_v36 = vld [vmem:[#allocation2 + $0x3a0] sm:$0xf] }
  0x1b   :  { %1440 = vmatpush.bf16.msrb.mxu3 %v4855_v28  ;;  %1342 = vmatpush.bf16.msrb.mxu1 %v4599_v29  ;;  %v5642_v37 = vld [vmem:[#allocation2 + $0x3ac] sm:$0xf0]  ;;  %v4455_v38 = vor.u32 %v5546_v35, %v4454_v33  ;;  %v4582_v40 = vld [vmem:[#allocation2 + $0x1a0] sm:$0xf]  ;;  %v90_v35 = vld [vmem:[%s6866_s0 + $0x58] sm:$0xff] }
  0x1c   :  { %v4839_v39 = vor.u32 %v5642_v37, %v4838_v36  ;;  %v5578_v41 = vld [vmem:[#allocation2 + $0x1ac] sm:$0xf0]  ;;  %1392 = vmatpush.bf16.msrb.mxu2 %v4711_v34  ;;  %v83_v44 = vld [vmem:[%s6866_s0 + $0x20] sm:$0xff] }
  0x1d   :  { %v4583_v42 = vor.u32 %v5578_v41, %v4582_v40  ;;  %1294 = vmatpush.bf16.msrb.mxu0 %v4455_v38  ;;  %v4694_v45 = vld [vmem:[#allocation2 + $0x280] sm:$0xf]  ;;  %v5606_v46 = vld [vmem:[#allocation2 + $0x28c] sm:$0xf0]  ;;  %v92_v40 = vld [vmem:[%s6866_s0 + $0x68] sm:$0xff] }
  0x1e   :  { %v4438_v47 = vld [vmem:[#allocation2 + $0x80] sm:$0xf]  ;;  %v4695_v48 = vor.u32 %v5606_v46, %v4694_v45  ;;  %v5542_v49 = vld [vmem:[#allocation2 + $0x8c] sm:$0xf0] }
  0x1f   :  { %1441 = vmatpush.bf16.msrb.mxu3 %v4839_v39  ;;  %1343 = vmatpush.bf16.msrb.mxu1 %v4583_v42  ;;  %v4822_v50 = vld [vmem:[#allocation2 + $0x380] sm:$0xf]  ;;  %v5638_v51 = vld [vmem:[#allocation2 + $0x38c] sm:$0xf0]  ;;  %v4439_v52 = vor.u32 %v5542_v49, %v4438_v47 }
  0x20   :  { %v4823_v53 = vor.u32 %v5638_v51, %v4822_v50  ;;  %v4566_v54 = vld [vmem:[#allocation2 + $0x180] sm:$0xf]  ;;  %v5574_v55 = vld [vmem:[#allocation2 + $0x18c] sm:$0xf0]  ;;  %1393 = vmatpush.bf16.msrb.mxu2 %v4695_v48  ;;  %v5616_v51 = vld [vmem:[#allocation2 + $0x2e4] sm:$0xf] }
  0x21   :  { %4310 = vmatmul.msk.f32.gmra.mxu0 %vm109_vm0, %v81_v30  ;;  %4326 = vmatmul.msk.f32.gmra.mxu1 %vm109_vm0, %v81_v30  ;;  %v4567_v56 = vor.u32 %v5574_v55, %v4566_v54  ;;  %v85_v58 = vld [vmem:[%s6866_s0 + $0x30] sm:$0xff]  ;;  %v4678_v59 = vld [vmem:[#allocation2 + $0x260] sm:$0xf]  ;;  %v94_v54 = vld [vmem:[%s6866_s0 + $0x78] sm:$0xff] }
  0x22   :  { %4342 = vmatmul.msk.f32.gmra.mxu2 %vm109_vm0, %v81_v30  ;;  %4358 = vmatmul.msk.f32.gmra.mxu3 %vm109_vm0, %v81_v30  ;;  %v5602_v60 = vld [vmem:[#allocation2 + $0x26c] sm:$0xf0]  ;;  %v4422_v61 = vld [vmem:[#allocation2 + $0x60] sm:$0xf]  ;;  %v5552_v55 = vld [vmem:[#allocation2 + $0xe4] sm:$0xf] }
  0x23   :  { %1295 = vmatpush.bf16.msrb.mxu0 %v4439_v52  ;;  %1442 = vmatpush.bf16.msrb.mxu3 %v4823_v53  ;;  %v4679_v62 = vor.u32 %v5602_v60, %v4678_v59  ;;  %v5538_v63 = vld [vmem:[#allocation2 + $0x6c] sm:$0xf0]  ;;  %v4806_v0 = vld [vmem:[#allocation2 + $0x360] sm:$0xf]  ;;  %v4744_v52 = vld [vmem:[#allocation2 + $0x2f0] sm:$0xf0] }
  0x24   :  { %1344 = vmatpush.bf16.msrb.mxu1 %v4567_v56  ;;  %v5634_v1 = vld [vmem:[#allocation2 + $0x36c] sm:$0xf0]  ;;  %v4423_v2 = vor.u32 %v5538_v63, %v4422_v61  ;;  %v4550_v4 = vld [vmem:[#allocation2 + $0x160] sm:$0xf]  ;;  %v4747_v53 = vor.u32 %v5616_v51, %v4744_v52  ;;  %v4488_v56 = vld [vmem:[#allocation2 + $0xf0] sm:$0xf0] }
  0x25   :  { %v4807_v3 = vor.u32 %v5634_v1, %v4806_v0  ;;  %v5570_v5 = vld [vmem:[#allocation2 + $0x16c] sm:$0xf0]  ;;  %1394 = vmatpush.bf16.msrb.mxu2 %v4679_v62  ;;  %v87_v8 = vld [vmem:[%s6866_s0 + $0x40] sm:$0xff]  ;;  %v4872_v59 = vld [vmem:[#allocation2 + $0x3f0] sm:$0xf0] }
  0x26   :  { %v4551_v6 = vor.u32 %v5570_v5, %v4550_v4  ;;  %v4662_v9 = vld [vmem:[#allocation2 + $0x240] sm:$0xf]  ;;  %v5598_v10 = vld [vmem:[#allocation2 + $0x24c] sm:$0xf0]  ;;  %v5584_v61 = vld [vmem:[#allocation2 + $0x1e4] sm:$0xf] }
  0x27   :  { %1296 = vmatpush.bf16.msrb.mxu0 %v4423_v2  ;;  %1443 = vmatpush.bf16.msrb.mxu3 %v4807_v3  ;;  %v4406_v11 = vld [vmem:[#allocation2 + $0x40] sm:$0xf]  ;;  %v4663_v12 = vor.u32 %v5598_v10, %v4662_v9  ;;  %v5534_v13 = vld [vmem:[#allocation2 + $0x4c] sm:$0xf0]  ;;  %v4616_v62 = vld [vmem:[#allocation2 + $0x1f0] sm:$0xf0] }
  0x28   :  { %1345 = vmatpush.bf16.msrb.mxu1 %v4551_v6  ;;  %v4790_v14 = vld [vmem:[#allocation2 + $0x340] sm:$0xf]  ;;  %v5630_v15 = vld [vmem:[#allocation2 + $0x34c] sm:$0xf0]  ;;  %v4407_v16 = vor.u32 %v5534_v13, %v4406_v11  ;;  %v4619_v63 = vor.u32 %v5584_v61, %v4616_v62  ;;  %v4456_v61 = vld [vmem:[#allocation2 + $0xb0] sm:$0xf0] }
  0x29   :  { %4311 = vmatmul.msk.f32.gmra.mxu0 %vm109_vm0, %v82_v43  ;;  %4327 = vmatmul.msk.f32.gmra.mxu1 %vm109_vm0, %v82_v43  ;;  %v4791_v17 = vor.u32 %v5630_v15, %v4790_v14  ;;  %v4534_v18 = vld [vmem:[#allocation2 + $0x140] sm:$0xf]  ;;  %v5566_v19 = vld [vmem:[#allocation2 + $0x14c] sm:$0xf0] }
  0x2a   :  { %4343 = vmatmul.msk.f32.gmra.mxu2 %vm109_vm0, %v82_v43  ;;  %4359 = vmatmul.msk.f32.gmra.mxu3 %vm109_vm0, %v82_v43  ;;  %v4535_v20 = vor.u32 %v5566_v19, %v4534_v18  ;;  %v89_v22 = vld [vmem:[%s6866_s0 + $0x50] sm:$0xff]  ;;  %v4646_v23 = vld [vmem:[#allocation2 + $0x220] sm:$0xf] }
  0x2b   :  { %1395 = vmatpush.bf16.msrb.mxu2 %v4663_v12  ;;  %1297 = vmatpush.bf16.msrb.mxu0 %v4407_v16  ;;  %v5594_v24 = vld [vmem:[#allocation2 + $0x22c] sm:$0xf0]  ;;  %v4390_v25 = vld [vmem:[#allocation2 + $0x20] sm:$0xf] }
  0x2c   :  { %1444 = vmatpush.bf16.msrb.mxu3 %v4791_v17  ;;  %1346 = vmatpush.bf16.msrb.mxu1 %v4535_v20  ;;  %v4647_v26 = vor.u32 %v5594_v24, %v4646_v23  ;;  %v5530_v27 = vld [vmem:[#allocation2 + $0x2c] sm:$0xf0]  ;;  %v4774_v28 = vld [vmem:[#allocation2 + $0x320] sm:$0xf]  ;;  %v5548_v20 = vld [vmem:[#allocation2 + $0xc4] sm:$0xf] }
  0x2d   :  { %v5626_v29 = vld [vmem:[#allocation2 + $0x32c] sm:$0xf0]  ;;  %v4391_v30 = vor.u32 %v5530_v27, %v4390_v25  ;;  %v4518_v32 = vld [vmem:[#allocation2 + $0x120] sm:$0xf]  ;;  %v5644_v25 = vld [vmem:[#allocation2 + $0x3c4] sm:$0xf] }
  0x2e   :  { %v4775_v31 = vor.u32 %v5626_v29, %v4774_v28  ;;  %v5562_v33 = vld [vmem:[#allocation2 + $0x12c] sm:$0xf0]  ;;  %v91_v36 = vld [vmem:[%s6866_s0 + $0x60] sm:$0xff] }
  0x2f   :  { %1396 = vmatpush.bf16.msrb.mxu2 %v4647_v26  ;;  %v4519_v34 = vor.u32 %v5562_v33, %v4518_v32  ;;  %1298 = vmatpush.bf16.msrb.mxu0 %v4391_v30  ;;  %v4630_v37 = vld [vmem:[#allocation2 + $0x200] sm:$0xf]  ;;  %v5590_v38 = vld [vmem:[#allocation2 + $0x20c] sm:$0xf0]  ;;  %v4856_v26 = vld [vmem:[#allocation2 + $0x3d0] sm:$0xf0] }
  0x30   :  { %1445 = vmatpush.bf16.msrb.mxu3 %v4775_v31  ;;  %v4631_v39 = vor.u32 %v5590_v38, %v4630_v37  ;;  %v4374_v41 = vld [vmem:[#allocation2] sm:$0xf]  ;;  %v5526_v42 = vld [vmem:[#allocation2 + $0xc] sm:$0xf0]  ;;  %v4859_v27 = vor.u32 %v5644_v25, %v4856_v26  ;;  %v5580_v30 = vld [vmem:[#allocation2 + $0x1c4] sm:$0xf] }
  0x31   :  { %4312 = vmatmul.msk.f32.gmra.mxu0 %vm109_vm0, %v83_v44  ;;  %4328 = vmatmul.msk.f32.gmra.mxu1 %vm109_vm0, %v83_v44  ;;  %v4758_v43 = vld [vmem:[#allocation2 + $0x300] sm:$0xf]  ;;  %v5622_v45 = vld [vmem:[#allocation2 + $0x30c] sm:$0xf0]  ;;  %v4600_v31 = vld [vmem:[#allocation2 + $0x1d0] sm:$0xf0] }
  0x32   :  { %4344 = vmatmul.msk.f32.gmra.mxu2 %vm109_vm0, %v83_v44  ;;  %4360 = vmatmul.msk.f32.gmra.mxu3 %vm109_vm0, %v83_v44  ;;  %v4375_v44 = vor.u32 %v5526_v42, %v4374_v41  ;;  %v4502_v46 = vld [vmem:[#allocation2 + $0x100] sm:$0xf]  ;;  %v5558_v47 = vld [vmem:[#allocation2 + $0x10c] sm:$0xf0]  ;;  %v4759_v48 = vor.u32 %v5622_v45, %v4758_v43 }
  0x33   :  { %1347 = vmatpush.bf16.msrb.mxu1 %v4519_v34  ;;  %1397 = vmatpush.bf16.msrb.mxu2 %v4631_v39  ;;  %v4503_v49 = vor.u32 %v5558_v47, %v4502_v46  ;;  %v93_v50 = vld [vmem:[%s6866_s0 + $0x70] sm:$0xff]  ;;  %v99_v0 = vld [vmem:[%s6868_s2] sm:$0xf]  ;;  %v4603_v34 = vor.u32 %v5580_v30, %v4600_v31  ;;  %v5604_v31 = vld [vmem:[#allocation2 + $0x284] sm:$0xf] }
  0x34   :  { %1299 = vmatpush.bf16.msrb.mxu0 %v4375_v44  ;;  %1446 = vmatpush.bf16.msrb.mxu3 %v4759_v48  ;;  %v6091_v3 = vperm.slane %v99_v0, 0  ;;  %v6093_v4 = vperm.slane %v99_v0, 1  ;;  %v6099_v18 = vperm.slane %v99_v0, 2  ;;  %v6101_v19 = vperm.slane %v99_v0, 3 }
  0x37   :  { %1348 = vmatpush.bf16.msrb.mxu1 %v4503_v49  ;;  %1586 = vmatpush.bf16.msra.mxu2 %v4747_v53  ;;  %v5608_v49 = vld [vmem:[#allocation2 + $0x2a4] sm:$0xf] }
  0x39   :  { %4313 = vmatmul.msk.f32.gmra.mxu0 %vm109_vm0, %v84_v57  ;;  %4329 = vmatmul.msk.f32.gmra.mxu1 %vm109_vm0, %v84_v57 }
  0x3a   :  { %4345 = vmatmul.msk.f32.gmra.mxu2 %vm109_vm0, %v84_v57  ;;  %4361 = vmatmul.msk.f32.gmra.mxu3 %vm109_vm0, %v84_v57  ;;  %v5648_v57 = vld [vmem:[#allocation2 + $0x3e4] sm:$0xf] }
  0x3b   :  { %v4875_v60 = vor.u32 %v5648_v57, %v4872_v59  ;;  %1537 = vmatpush.bf16.msra.mxu1 %v4619_v63 }
  0x3d   :  { %1635 = vmatpush.bf16.msra.mxu3 %v4875_v60  ;;  %v5544_v60 = vld [vmem:[#allocation2 + $0xa4] sm:$0xf] }
  0x3e   :  { %v4459_v0 = vor.u32 %v5544_v60, %v4456_v61 }
  0x3f   :  { %1538 = vmatpush.bf16.msra.mxu1 %v4603_v34 }
  0x41   :  { %4314 = vmatmul.msk.f32.gmra.mxu0 %vm109_vm0, %v85_v58  ;;  %4330 = vmatmul.msk.f32.gmra.mxu1 %vm109_vm0, %v85_v58 }
  0x42   :  { %4346 = vmatmul.msk.f32.gmra.mxu2 %vm109_vm0, %v85_v58  ;;  %4362 = vmatmul.msk.f32.gmra.mxu3 %vm109_vm0, %v85_v58  ;;  %v4491_v58 = vor.u32 %v5552_v55, %v4488_v56 }
  0x43   :  { %1636 = vmatpush.bf16.msra.mxu3 %v4859_v27 }
  0x44   :  { %1488 = vmatpush.bf16.msra.mxu0 %v4491_v58 }
  0x49   :  { %4315 = vmatmul.msk.f32.gmra.mxu0 %vm109_vm0, %v86_v7  ;;  %4331 = vmatmul.msk.f32.gmra.mxu1 %vm109_vm0, %v86_v7 }
  0x4a   :  { %4347 = vmatmul.msk.f32.gmra.mxu2 %vm109_vm0, %v86_v7  ;;  %4363 = vmatmul.msk.f32.gmra.mxu3 %vm109_vm0, %v86_v7  ;;  %v5612_v7 = vld [vmem:[#allocation2 + $0x2c4] sm:$0xf] }
  0x51   :  { %4316 = vmatmul.msk.f32.gmra.mxu0 %vm109_vm0, %v87_v8  ;;  %4332 = vmatmul.msk.f32.gmra.mxu1 %vm109_vm0, %v87_v8 }
  0x52   :  { %4348 = vmatmul.msk.f32.gmra.mxu2 %vm109_vm0, %v87_v8  ;;  %4364 = vmatmul.msk.f32.gmra.mxu3 %vm109_vm0, %v87_v8  ;;  %v4728_v8 = vld [vmem:[#allocation2 + $0x2d0] sm:$0xf0] }
  0x53   :  { %v4731_v11 = vor.u32 %v5612_v7, %v4728_v8  ;;  %v5576_v8 = vld [vmem:[#allocation2 + $0x1a4] sm:$0xf] }
  0x55   :  { %1587 = vmatpush.bf16.msra.mxu2 %v4731_v11 }
  0x59   :  { %4317 = vmatmul.msk.f32.gmra.mxu0 %vm109_vm0, %v88_v21  ;;  %4333 = vmatmul.msk.f32.gmra.mxu1 %vm109_vm0, %v88_v21 }
  0x5a   :  { %4349 = vmatmul.msk.f32.gmra.mxu2 %vm109_vm0, %v88_v21  ;;  %4365 = vmatmul.msk.f32.gmra.mxu3 %vm109_vm0, %v88_v21  ;;  %v4472_v21 = vld [vmem:[#allocation2 + $0xd0] sm:$0xf0] }
  0x5b   :  { %v4475_v24 = vor.u32 %v5548_v20, %v4472_v21 }
  0x5d   :  { %1489 = vmatpush.bf16.msra.mxu0 %v4475_v24 }
  0x61   :  { %4318 = vmatmul.msk.f32.gmra.mxu0 %vm109_vm0, %v89_v22  ;;  %4334 = vmatmul.msk.f32.gmra.mxu1 %vm109_vm0, %v89_v22 }
  0x62   :  { %4350 = vmatmul.msk.f32.gmra.mxu2 %vm109_vm0, %v89_v22  ;;  %4366 = vmatmul.msk.f32.gmra.mxu3 %vm109_vm0, %v89_v22 }
  0x63   :  { %1490 = vmatpush.bf16.msra.mxu0 %v4459_v0 }
  0x69   :  { %4319 = vmatmul.msk.f32.gmra.mxu0 %vm109_vm0, %v90_v35  ;;  %4335 = vmatmul.msk.f32.gmra.mxu1 %vm109_vm0, %v90_v35 }
  0x6a   :  { %4351 = vmatmul.msk.f32.gmra.mxu2 %vm109_vm0, %v90_v35  ;;  %4367 = vmatmul.msk.f32.gmra.mxu3 %vm109_vm0, %v90_v35 }
  0x71   :  { %4320 = vmatmul.msk.f32.gmra.mxu0 %vm109_vm0, %v91_v36  ;;  %4336 = vmatmul.msk.f32.gmra.mxu1 %vm109_vm0, %v91_v36 }
  0x72   :  { %4352 = vmatmul.msk.f32.gmra.mxu2 %vm109_vm0, %v91_v36  ;;  %4368 = vmatmul.msk.f32.gmra.mxu3 %vm109_vm0, %v91_v36 }
  0x79   :  { %4321 = vmatmul.msk.f32.gmra.mxu0 %vm109_vm0, %v92_v40  ;;  %4337 = vmatmul.msk.f32.gmra.mxu1 %vm109_vm0, %v92_v40 }
  0x7a   :  { %4353 = vmatmul.msk.f32.gmra.mxu2 %vm109_vm0, %v92_v40  ;;  %4369 = vmatmul.msk.f32.gmra.mxu3 %vm109_vm0, %v92_v40 }
  0x81   :  { %4322 = vmatmul.msk.f32.gmra.mxu0 %vm109_vm0, %v93_v50  ;;  %4338 = vmatmul.msk.f32.gmra.mxu1 %vm109_vm0, %v93_v50 }
  0x82   :  { %4354 = vmatmul.msk.f32.gmra.mxu2 %vm109_vm0, %v93_v50  ;;  %4370 = vmatmul.msk.f32.gmra.mxu3 %vm109_vm0, %v93_v50  ;;  %v4712_v50 = vld [vmem:[#allocation2 + $0x2b0] sm:$0xf0] }
  0x83   :  { %v4715_v53 = vor.u32 %v5608_v49, %v4712_v50  ;;  %v5636_v49 = vld [vmem:[#allocation2 + $0x384] sm:$0xf]  ;;  %v4824_v50 = vld [vmem:[#allocation2 + $0x390] sm:$0xf0] }
  0x85   :  { %1588 = vmatpush.bf16.msra.mxu2 %v4715_v53 }
  0x89   :  { %4323 = vmatmul.msk.f32.gmra.mxu0 %vm109_vm0, %v94_v54  ;;  %4339 = vmatmul.msk.f32.gmra.mxu1 %vm109_vm0, %v94_v54 }
  0x8a   :  { %4355 = vmatmul.msk.f32.gmra.mxu2 %vm109_vm0, %v94_v54  ;;  %4371 = vmatmul.msk.f32.gmra.mxu3 %vm109_vm0, %v94_v54 }
  0x8e   :  { %v175_v1 = vpop.f32.mrf.mxu0  ;;  %v240_v2 = vpop.f32.mrf.mxu1 }
  0x8f   :  { %v176_v5 = vadd.f32 %v175_v1, %v6091_v3  ;;  %v241_v6 = vadd.f32 %v240_v2, %v6093_v4  ;;  %v5640_v1 = vld [vmem:[#allocation2 + $0x3a4] sm:$0xf]  ;;  %v4840_v2 = vld [vmem:[#allocation2 + $0x3b0] sm:$0xf0] }
  0x91   :  { %v418_v14 = vmax.f32 %v176_v5, 0.0  ;;  %v419_v15 = vmax.f32 %v241_v6, 0.0  ;;  %v4843_v5 = vor.u32 %v5640_v1, %v4840_v2 }
  0x93   :  { %1637 = vmatpush.bf16.msra.mxu3 %v4843_v5 }
  0x95   :  { %v305_v9 = vpop.f32.mrf.mxu2  ;;  %v370_v10 = vpop.f32.mrf.mxu3 }
  0x96   :  { %v178_v12 = vpop.f32.mrf.mxu0  ;;  %v243_v13 = vpop.f32.mrf.mxu1  ;;  %v306_v32 = vadd.f32 %v305_v9, %v6099_v18  ;;  %v371_v33 = vadd.f32 %v370_v10, %v6101_v19  ;;  %v4584_v9 = vld [vmem:[#allocation2 + $0x1b0] sm:$0xf0] }
  0x97   :  { %v179_v16 = vadd.f32 %v178_v12, %v6091_v3  ;;  %v244_v17 = vadd.f32 %v243_v13, %v6093_v4  ;;  %v4587_v12 = vor.u32 %v5576_v8, %v4584_v9 }
  0x98   :  { %v420_v41 = vmax.f32 %v306_v32, 0.0  ;;  %v421_v42 = vmax.f32 %v371_v33, 0.0  ;;  %v4696_v32 = vld [vmem:[#allocation2 + $0x290] sm:$0xf0] }
  0x99   :  { %v422_v22 = vmax.f32 %v179_v16, 0.0  ;;  %v423_v23 = vmax.f32 %v244_v17, 0.0  ;;  %1539 = vmatpush.bf16.msra.mxu1 %v4587_v12 }
  0x9b   :  { %v6103_v28 = vpack.c.bf16 %v422_v22, %v418_v14  ;;  %v6105_v29 = vpack.c.bf16 %v423_v23, %v419_v15 }
  0x9d   :  { %v308_v35 = vpop.f32.mrf.mxu2  ;;  %v373_v36 = vpop.f32.mrf.mxu3  ;;  %1300 = vmatmul.bf16.vlgmr.msrb.gmra.mxu0 %v6103_v28  ;;  %1349 = vmatmul.bf16.vlgmr.msrb.gmra.mxu1 %v6105_v29 }
  0x9e   :  { %v309_v37 = vadd.f32 %v308_v35, %v6099_v18  ;;  %v374_v38 = vadd.f32 %v373_v36, %v6101_v19  ;;  %v181_v39 = vpop.f32.mrf.mxu0  ;;  %v246_v40 = vpop.f32.mrf.mxu1  ;;  %v4699_v35 = vor.u32 %v5604_v31, %v4696_v32  ;;  %v4424_v31 = vld [vmem:[#allocation2 + $0x70] sm:$0xf0] }
  0x9f   :  { %v182_v47 = vadd.f32 %v181_v39, %v6091_v3  ;;  %v247_v48 = vadd.f32 %v246_v40, %v6093_v4 }
  0xa0   :  { %v424_v43 = vmax.f32 %v309_v37, 0.0  ;;  %v425_v44 = vmax.f32 %v374_v38, 0.0  ;;  %1589 = vmatpush.bf16.msra.mxu2 %v4699_v35  ;;  %v5632_v35 = vld [vmem:[#allocation2 + $0x364] sm:$0xf] }
  0xa1   :  { %v426_v56 = vmax.f32 %v182_v47, 0.0  ;;  %v427_v57 = vmax.f32 %v247_v48, 0.0 }
  0xa2   :  { %v6113_v45 = vpack.c.bf16 %v424_v43, %v420_v41  ;;  %v6115_v46 = vpack.c.bf16 %v425_v44, %v421_v42  ;;  %v5540_v42 = vld [vmem:[#allocation2 + $0x84] sm:$0xf]  ;;  %v4440_v43 = vld [vmem:[#allocation2 + $0x90] sm:$0xf0] }
  0xa3   :  { %v4443_v48 = vor.u32 %v5540_v42, %v4440_v43 }
  0xa4   :  { %1398 = vmatmul.bf16.vlgmr.msrb.gmra.mxu2 %v6113_v45  ;;  %1447 = vmatmul.bf16.vlgmr.msrb.gmra.mxu3 %v6115_v46 }
  0xa5   :  { %v311_v51 = vpop.f32.mrf.mxu2  ;;  %v376_v52 = vpop.f32.mrf.mxu3  ;;  %1491 = vmatpush.bf16.msra.mxu0 %v4443_v48 }
  0xa6   :  { %v184_v54 = vpop.f32.mrf.mxu0  ;;  %v249_v55 = vpop.f32.mrf.mxu1  ;;  %v312_v10 = vadd.f32 %v311_v51, %v6099_v18  ;;  %v377_v11 = vadd.f32 %v376_v52, %v6101_v19  ;;  %v4827_v51 = vor.u32 %v5636_v49, %v4824_v50 }
  0xa7   :  { %v185_v58 = vadd.f32 %v184_v54, %v6091_v3  ;;  %v250_v59 = vadd.f32 %v249_v55, %v6093_v4  ;;  %v5572_v54 = vld [vmem:[#allocation2 + $0x184] sm:$0xf]  ;;  %v4568_v55 = vld [vmem:[#allocation2 + $0x190] sm:$0xf0] }
  0xa8   :  { %v428_v21 = vmax.f32 %v312_v10, 0.0  ;;  %v429_v22 = vmax.f32 %v377_v11, 0.0  ;;  %1638 = vmatpush.bf16.msra.mxu3 %v4827_v51 }
  0xa9   :  { %v430_v62 = vmax.f32 %v185_v58, 0.0  ;;  %v431_v63 = vmax.f32 %v250_v59, 0.0  ;;  %v4571_v58 = vor.u32 %v5572_v54, %v4568_v55 }
  0xab   :  { %v6123_v6 = vpack.c.bf16 %v430_v62, %v426_v56  ;;  %v6125_v7 = vpack.c.bf16 %v431_v63, %v427_v57  ;;  %1540 = vmatpush.bf16.msra.mxu1 %v4571_v58 }
  0xad   :  { %v314_v13 = vpop.f32.mrf.mxu2  ;;  %v379_v14 = vpop.f32.mrf.mxu3  ;;  %1305 = vmatmul.bf16.gmra.mxu0 %v6123_v6  ;;  %1354 = vmatmul.bf16.gmra.mxu1 %v6125_v7 }
  0xae   :  { %v315_v15 = vadd.f32 %v314_v13, %v6099_v18  ;;  %v380_v16 = vadd.f32 %v379_v14, %v6101_v19  ;;  %v187_v17 = vpop.f32.mrf.mxu0  ;;  %v252_v20 = vpop.f32.mrf.mxu1  ;;  %v5600_v13 = vld [vmem:[#allocation2 + $0x264] sm:$0xf]  ;;  %v4680_v14 = vld [vmem:[#allocation2 + $0x270] sm:$0xf0] }
  0xaf   :  { %v188_v27 = vadd.f32 %v187_v17, %v6091_v3  ;;  %v253_v30 = vadd.f32 %v252_v20, %v6093_v4  ;;  %v4683_v17 = vor.u32 %v5600_v13, %v4680_v14 }
  0xb0   :  { %v432_v23 = vmax.f32 %v315_v15, 0.0  ;;  %v433_v24 = vmax.f32 %v380_v16, 0.0 }
  0xb1   :  { %v434_v38 = vmax.f32 %v188_v27, 0.0  ;;  %v435_v39 = vmax.f32 %v253_v30, 0.0  ;;  %1590 = vmatpush.bf16.msra.mxu2 %v4683_v17  ;;  %v5536_v30 = vld [vmem:[#allocation2 + $0x64] sm:$0xf]  ;;  %v4408_v17 = vld [vmem:[#allocation2 + $0x50] sm:$0xf0] }
  0xb2   :  { %v6133_v25 = vpack.c.bf16 %v432_v23, %v428_v21  ;;  %v6135_v26 = vpack.c.bf16 %v433_v24, %v429_v22 }
  0xb4   :  { %1403 = vmatmul.bf16.gmra.mxu2 %v6133_v25  ;;  %1452 = vmatmul.bf16.gmra.mxu3 %v6135_v26 }
  0xb5   :  { %v317_v33 = vpop.f32.mrf.mxu2  ;;  %v382_v34 = vpop.f32.mrf.mxu3 }
  0xb6   :  { %v190_v36 = vpop.f32.mrf.mxu0  ;;  %v255_v37 = vpop.f32.mrf.mxu1  ;;  %v318_v56 = vadd.f32 %v317_v33, %v6099_v18  ;;  %v383_v57 = vadd.f32 %v382_v34, %v6101_v19  ;;  %v4427_v34 = vor.u32 %v5536_v30, %v4424_v31 }
  0xb7   :  { %v191_v40 = vadd.f32 %v190_v36, %v6091_v3  ;;  %v256_v41 = vadd.f32 %v255_v37, %v6093_v4  ;;  %v4808_v36 = vld [vmem:[#allocation2 + $0x370] sm:$0xf0] }
  0xb8   :  { %v436_v1 = vmax.f32 %v318_v56, 0.0  ;;  %v437_v2 = vmax.f32 %v383_v57, 0.0  ;;  %v4811_v37 = vor.u32 %v5632_v35, %v4808_v36  ;;  %1492 = vmatpush.bf16.msra.mxu0 %v4427_v34 }
  0xb9   :  { %v438_v44 = vmax.f32 %v191_v40, 0.0  ;;  %v439_v47 = vmax.f32 %v256_v41, 0.0  ;;  %v5568_v40 = vld [vmem:[#allocation2 + $0x164] sm:$0xf]  ;;  %v4552_v41 = vld [vmem:[#allocation2 + $0x170] sm:$0xf0] }
  0xba   :  { %1639 = vmatpush.bf16.msra.mxu3 %v4811_v37 }
  0xbb   :  { %v6143_v52 = vpack.c.bf16 %v438_v44, %v434_v38  ;;  %v6145_v53 = vpack.c.bf16 %v439_v47, %v435_v39  ;;  %v4555_v44 = vor.u32 %v5568_v40, %v4552_v41 }
  0xbd   :  { %v320_v59 = vpop.f32.mrf.mxu2  ;;  %v385_v60 = vpop.f32.mrf.mxu3  ;;  %1310 = vmatmul.bf16.gmra.mxu0 %v6143_v52  ;;  %1359 = vmatmul.bf16.gmra.mxu1 %v6145_v53 }
  0xbe   :  { %v321_v61 = vadd.f32 %v320_v59, %v6099_v18  ;;  %v386_v62 = vadd.f32 %v385_v60, %v6101_v19  ;;  %v193_v63 = vpop.f32.mrf.mxu0  ;;  %v258_v0 = vpop.f32.mrf.mxu1  ;;  %1541 = vmatpush.bf16.msra.mxu1 %v4555_v44 }
  0xbf   :  { %v194_v11 = vadd.f32 %v193_v63, %v6091_v3  ;;  %v259_v12 = vadd.f32 %v258_v0, %v6093_v4  ;;  %v5596_v63 = vld [vmem:[#allocation2 + $0x244] sm:$0xf]  ;;  %v4664_v0 = vld [vmem:[#allocation2 + $0x250] sm:$0xf0] }
  0xc0   :  { %v440_v5 = vmax.f32 %v321_v61, 0.0  ;;  %v441_v8 = vmax.f32 %v386_v62, 0.0 }
  0xc1   :  { %v442_v22 = vmax.f32 %v194_v11, 0.0  ;;  %v443_v23 = vmax.f32 %v259_v12, 0.0 }
  0xc2   :  { %v6153_v9 = vpack.c.bf16 %v440_v5, %v436_v1  ;;  %v6155_v10 = vpack.c.bf16 %v441_v8, %v437_v2  ;;  %v4667_v5 = vor.u32 %v5596_v63, %v4664_v0 }
  0xc4   :  { %1408 = vmatmul.bf16.gmra.mxu2 %v6153_v9  ;;  %1457 = vmatmul.bf16.gmra.mxu3 %v6155_v10 }
  0xc5   :  { %v323_v15 = vpop.f32.mrf.mxu2  ;;  %v388_v16 = vpop.f32.mrf.mxu3  ;;  %1591 = vmatpush.bf16.msra.mxu2 %v4667_v5 }
  0xc6   :  { %v196_v20 = vpop.f32.mrf.mxu0  ;;  %v261_v21 = vpop.f32.mrf.mxu1  ;;  %v324_v42 = vadd.f32 %v323_v15, %v6099_v18  ;;  %v389_v43 = vadd.f32 %v388_v16, %v6101_v19  ;;  %v5532_v16 = vld [vmem:[#allocation2 + $0x44] sm:$0xf] }
  0xc7   :  { %v197_v24 = vadd.f32 %v196_v20, %v6091_v3  ;;  %v262_v27 = vadd.f32 %v261_v21, %v6093_v4 }
  0xc8   :  { %v444_v55 = vmax.f32 %v324_v42, 0.0  ;;  %v445_v56 = vmax.f32 %v389_v43, 0.0 }
  0xc9   :  { %v446_v32 = vmax.f32 %v197_v24, 0.0  ;;  %v447_v33 = vmax.f32 %v262_v27, 0.0  ;;  %v4792_v24 = vld [vmem:[#allocation2 + $0x350] sm:$0xf0] }
  0xcb   :  { %v6163_v38 = vpack.c.bf16 %v446_v32, %v442_v22  ;;  %v6165_v39 = vpack.c.bf16 %v447_v33, %v443_v23  ;;  %v4411_v22 = vor.u32 %v5532_v16, %v4408_v17  ;;  %v5628_v23 = vld [vmem:[#allocation2 + $0x344] sm:$0xf]  ;;  %v4536_v33 = vld [vmem:[#allocation2 + $0x150] sm:$0xf0] }
  0xcc   :  { %v4795_v27 = vor.u32 %v5628_v23, %v4792_v24  ;;  %v5564_v32 = vld [vmem:[#allocation2 + $0x144] sm:$0xf] }
  0xcd   :  { %v326_v47 = vpop.f32.mrf.mxu2  ;;  %v391_v48 = vpop.f32.mrf.mxu3  ;;  %1315 = vmatmul.bf16.gmra.mxu0 %v6163_v38  ;;  %1364 = vmatmul.bf16.gmra.mxu1 %v6165_v39  ;;  %v4539_v36 = vor.u32 %v5564_v32, %v4536_v33  ;;  %v5624_v17 = vld [vmem:[#allocation2 + $0x324] sm:$0xf] }
  0xce   :  { %v327_v49 = vadd.f32 %v326_v47, %v6099_v18  ;;  %v392_v50 = vadd.f32 %v391_v48, %v6101_v19  ;;  %v199_v51 = vpop.f32.mrf.mxu0  ;;  %v264_v54 = vpop.f32.mrf.mxu1  ;;  %1493 = vmatpush.bf16.msra.mxu0 %v4411_v22  ;;  %1640 = vmatpush.bf16.msra.mxu3 %v4795_v27  ;;  %v5560_v24 = vld [vmem:[#allocation2 + $0x124] sm:$0xf]  ;;  %v4520_v27 = vld [vmem:[#allocation2 + $0x130] sm:$0xf0] }
  0xcf   :  { %v200_v61 = vadd.f32 %v199_v51, %v6091_v3  ;;  %v265_v62 = vadd.f32 %v264_v54, %v6093_v4  ;;  %1542 = vmatpush.bf16.msra.mxu1 %v4539_v36 }
  0xd0   :  { %v448_v57 = vmax.f32 %v327_v49, 0.0  ;;  %v449_v58 = vmax.f32 %v392_v50, 0.0 }
  0xd1   :  { %v450_v12 = vmax.f32 %v200_v61, 0.0  ;;  %v451_v13 = vmax.f32 %v265_v62, 0.0 }
  0xd2   :  { %v6173_v59 = vpack.c.bf16 %v448_v57, %v444_v55  ;;  %v6175_v60 = vpack.c.bf16 %v449_v58, %v445_v56  ;;  %v5592_v57 = vld [vmem:[#allocation2 + $0x224] sm:$0xf]  ;;  %v4648_v58 = vld [vmem:[#allocation2 + $0x230] sm:$0xf0] }
  0xd3   :  { %v4651_v63 = vor.u32 %v5592_v57, %v4648_v58  ;;  %v5588_v57 = vld [vmem:[#allocation2 + $0x204] sm:$0xf]  ;;  %v4632_v58 = vld [vmem:[#allocation2 + $0x210] sm:$0xf0] }
  0xd4   :  { %1413 = vmatmul.bf16.gmra.mxu2 %v6173_v59  ;;  %1462 = vmatmul.bf16.gmra.mxu3 %v6175_v60 }
  0xd5   :  { %v329_v1 = vpop.f32.mrf.mxu2  ;;  %v394_v2 = vpop.f32.mrf.mxu3  ;;  %1592 = vmatpush.bf16.msra.mxu2 %v4651_v63 }
  0xd6   :  { %v202_v8 = vpop.f32.mrf.mxu0  ;;  %v267_v11 = vpop.f32.mrf.mxu1  ;;  %v330_v34 = vadd.f32 %v329_v1, %v6099_v18  ;;  %v395_v35 = vadd.f32 %v394_v2, %v6101_v19 }
  0xd7   :  { %v203_v14 = vadd.f32 %v202_v8, %v6091_v3  ;;  %v268_v15 = vadd.f32 %v267_v11, %v6093_v4 }
  0xd8   :  { %v452_v47 = vmax.f32 %v330_v34, 0.0  ;;  %v453_v48 = vmax.f32 %v395_v35, 0.0  ;;  %v4523_v34 = vor.u32 %v5560_v24, %v4520_v27 }
  0xd9   :  { %v454_v20 = vmax.f32 %v203_v14, 0.0  ;;  %v455_v21 = vmax.f32 %v268_v15, 0.0 }
  0xda   :  { %1543 = vmatpush.bf16.msra.mxu1 %v4523_v34 }
  0xdb   :  { %v6183_v30 = vpack.c.bf16 %v454_v20, %v450_v12  ;;  %v6185_v31 = vpack.c.bf16 %v455_v21, %v451_v13  ;;  %v5528_v12 = vld [vmem:[#allocation2 + $0x24] sm:$0xf]  ;;  %v4392_v13 = vld [vmem:[#allocation2 + $0x30] sm:$0xf0] }
  0xdc   :  { %v4395_v16 = vor.u32 %v5528_v12, %v4392_v13  ;;  %v4776_v20 = vld [vmem:[#allocation2 + $0x330] sm:$0xf0] }
  0xdd   :  { %v332_v37 = vpop.f32.mrf.mxu2  ;;  %v397_v40 = vpop.f32.mrf.mxu3  ;;  %1320 = vmatmul.bf16.gmra.mxu0 %v6183_v30  ;;  %1369 = vmatmul.bf16.gmra.mxu1 %v6185_v31  ;;  %v4779_v21 = vor.u32 %v5624_v17, %v4776_v20 }
  0xde   :  { %v333_v41 = vadd.f32 %v332_v37, %v6099_v18  ;;  %v398_v42 = vadd.f32 %v397_v40, %v6101_v19  ;;  %v205_v43 = vpop.f32.mrf.mxu0  ;;  %v270_v44 = vpop.f32.mrf.mxu1  ;;  %1494 = vmatpush.bf16.msra.mxu0 %v4395_v16  ;;  %v4504_v16 = vld [vmem:[#allocation2 + $0x110] sm:$0xf0] }
  0xdf   :  { %v206_v55 = vadd.f32 %v205_v43, %v6091_v3  ;;  %v271_v56 = vadd.f32 %v270_v44, %v6093_v4  ;;  %1641 = vmatpush.bf16.msra.mxu3 %v4779_v21 }
  0xe0   :  { %v456_v49 = vmax.f32 %v333_v41, 0.0  ;;  %v457_v50 = vmax.f32 %v398_v42, 0.0 }
  0xe1   :  { %v458_v2 = vmax.f32 %v206_v55, 0.0  ;;  %v459_v5 = vmax.f32 %v271_v56, 0.0 }
  0xe2   :  { %v6193_v51 = vpack.c.bf16 %v456_v49, %v452_v47  ;;  %v6195_v54 = vpack.c.bf16 %v457_v50, %v453_v48 }
  0xe4   :  { %1418 = vmatmul.bf16.gmra.mxu2 %v6193_v51  ;;  %1467 = vmatmul.bf16.gmra.mxu3 %v6195_v54 }
  0xe5   :  { %v335_v61 = vpop.f32.mrf.mxu2  ;;  %v400_v62 = vpop.f32.mrf.mxu3 }
  0xe6   :  { %v208_v0 = vpop.f32.mrf.mxu0  ;;  %v273_v1 = vpop.f32.mrf.mxu1  ;;  %v336_v32 = vadd.f32 %v335_v61, %v6099_v18  ;;  %v401_v33 = vadd.f32 %v400_v62, %v6101_v19  ;;  %v5524_v61 = vld [vmem:[#allocation2 + $0x4] sm:$0xf] }
  0xe7   :  { %v209_v8 = vadd.f32 %v208_v0, %v6091_v3  ;;  %v274_v11 = vadd.f32 %v273_v1, %v6093_v4  ;;  %v4635_v0 = vor.u32 %v5588_v57, %v4632_v58  ;;  %v4376_v1 = vld [vmem:[#allocation2 + $0x10] sm:$0xf0] }
  0xe8   :  { %v460_v43 = vmax.f32 %v336_v32, 0.0  ;;  %v461_v44 = vmax.f32 %v401_v33, 0.0  ;;  %v4379_v13 = vor.u32 %v5524_v61, %v4376_v1 }
  0xe9   :  { %v462_v14 = vmax.f32 %v209_v8, 0.0  ;;  %v463_v15 = vmax.f32 %v274_v11, 0.0  ;;  %1593 = vmatpush.bf16.msra.mxu2 %v4635_v0 }
  0xea   :  { %1495 = vmatpush.bf16.msra.mxu0 %v4379_v13 }
  0xeb   :  { %v6203_v22 = vpack.c.bf16 %v462_v14, %v458_v2  ;;  %v6205_v23 = vpack.c.bf16 %v463_v15, %v459_v5  ;;  %v5620_v2 = vld [vmem:[#allocation2 + $0x304] sm:$0xf]  ;;  %v4760_v5 = vld [vmem:[#allocation2 + $0x310] sm:$0xf0] }
  0xec   :  { %v4763_v14 = vor.u32 %v5620_v2, %v4760_v5  ;;  %v5556_v15 = vld [vmem:[#allocation2 + $0x104] sm:$0xf]  ;;  %v4750_v5 = vld [vmem:[#allocation2 + $0x2e8] sm:$0xf] }
  0xed   :  { %v338_v35 = vpop.f32.mrf.mxu2  ;;  %v403_v36 = vpop.f32.mrf.mxu3  ;;  %1325 = vmatmul.bf16.gmra.mxu0 %v6203_v22  ;;  %1374 = vmatmul.bf16.gmra.mxu1 %v6205_v23  ;;  %v4507_v24 = vor.u32 %v5556_v15, %v4504_v16  ;;  %v5555_v15 = vld [vmem:[#allocation2 + $0xf4] sm:$0xf0]  ;;  %v4878_v16 = vld [vmem:[#allocation2 + $0x3e8] sm:$0xf] }
  0xee   :  { %v339_v37 = vadd.f32 %v338_v35, %v6099_v18  ;;  %v404_v40 = vadd.f32 %v403_v36, %v6101_v19  ;;  %v211_v41 = vpop.f32.mrf.mxu0  ;;  %v276_v42 = vpop.f32.mrf.mxu1  ;;  %1642 = vmatpush.bf16.msra.mxu3 %v4763_v14 }
  0xef   :  { %v212_v55 = vadd.f32 %v211_v41, %v6091_v3  ;;  %v277_v56 = vadd.f32 %v276_v42, %v6093_v4  ;;  %1544 = vmatpush.bf16.msra.mxu1 %v4507_v24 }
  0xf0   :  { %v464_v47 = vmax.f32 %v339_v37, 0.0  ;;  %v465_v48 = vmax.f32 %v404_v40, 0.0 }
  0xf1   :  { %v466_v8 = vmax.f32 %v212_v55, 0.0  ;;  %v467_v17 = vmax.f32 %v277_v56, 0.0 }
  0xf2   :  { %v6213_v49 = vpack.c.bf16 %v464_v47, %v460_v43  ;;  %v6215_v50 = vpack.c.bf16 %v465_v48, %v461_v44 }
  0xf4   :  { %1423 = vmatmul.bf16.gmra.mxu2 %v6213_v49  ;;  %1472 = vmatmul.bf16.gmra.mxu3 %v6215_v50 }
  0xf5   :  { %v341_v62 = vpop.f32.mrf.mxu2  ;;  %v406_v63 = vpop.f32.mrf.mxu3 }
  0xf6   :  { %v214_v11 = vpop.f32.mrf.mxu0  ;;  %v279_v12 = vpop.f32.mrf.mxu1  ;;  %v342_v33 = vadd.f32 %v341_v62, %v6099_v18  ;;  %v407_v34 = vadd.f32 %v406_v63, %v6101_v19 }
  0xf7   :  { %v215_v20 = vadd.f32 %v214_v11, %v6091_v3  ;;  %v280_v21 = vadd.f32 %v279_v12, %v6093_v4  ;;  %v4494_v11 = vld [vmem:[#allocation2 + $0xe8] sm:$0xf] }
  0xf8   :  { %v468_v47 = vmax.f32 %v342_v33, 0.0  ;;  %v469_v48 = vmax.f32 %v407_v34, 0.0  ;;  %v4495_v24 = vor.u32 %v5555_v15, %v4494_v11  ;;  %v5551_v11 = vld [vmem:[#allocation2 + $0xd4] sm:$0xf0] }
  0xf9   :  { %v470_v27 = vmax.f32 %v215_v20, 0.0  ;;  %v471_v32 = vmax.f32 %v280_v21, 0.0 }
  0xfa   :  { %1684 = vmatpush.bf16.msrb.mxu0 %v4495_v24  ;;  %v5583_v24 = vld [vmem:[#allocation2 + $0x1d4] sm:$0xf0] }
  0xfb   :  { %v6225_v35 = vpack.c.bf16 %v470_v27, %v466_v8  ;;  %v6227_v36 = vpack.c.bf16 %v471_v32, %v467_v17  ;;  %v5619_v8 = vld [vmem:[#allocation2 + $0x2f4] sm:$0xf0] }
  0xfc   :  { %v4751_v14 = vor.u32 %v5619_v8, %v4750_v5  ;;  %v5651_v17 = vld [vmem:[#allocation2 + $0x3f4] sm:$0xf0]  ;;  %v4478_v5 = vld [vmem:[#allocation2 + $0xc8] sm:$0xf] }
  0xfd   :  { %v344_v37 = vpop.f32.mrf.mxu2  ;;  %v409_v40 = vpop.f32.mrf.mxu3  ;;  %1330 = vmatmul.bf16.gmra.mxu0 %v6225_v35  ;;  %1379 = vmatmul.bf16.gmra.mxu1 %v6227_v36  ;;  %v4879_v27 = vor.u32 %v5651_v17, %v4878_v16 }
  0xfe   :  { %v345_v41 = vadd.f32 %v344_v37, %v6099_v18  ;;  %v410_v42 = vadd.f32 %v409_v40, %v6101_v19  ;;  %v217_v43 = vpop.f32.mrf.mxu0  ;;  %v282_v44 = vpop.f32.mrf.mxu1  ;;  %1782 = vmatpush.bf16.msrb.mxu2 %v4751_v14  ;;  %v4479_v14 = vor.u32 %v5551_v11, %v4478_v5 }
  0xff   :  { %v218_v57 = vadd.f32 %v217_v43, %v6091_v3  ;;  %v283_v58 = vadd.f32 %v282_v44, %v6093_v4  ;;  %1831 = vmatpush.bf16.msrb.mxu3 %v4879_v27  ;;  %v5587_v43 = vld [vmem:[#allocation2 + $0x1f4] sm:$0xf0] }
 0x100   :  { %v472_v55 = vmax.f32 %v345_v41, 0.0  ;;  %v473_v56 = vmax.f32 %v410_v42, 0.0  ;;  %v4622_v42 = vld [vmem:[#allocation2 + $0x1e8] sm:$0xf]  ;;  %1685 = vmatpush.bf16.msrb.mxu0 %v4479_v14  ;;  %v5579_v14 = vld [vmem:[#allocation2 + $0x1b4] sm:$0xf0] }
 0x101   :  { %v474_v63 = vmax.f32 %v218_v57, 0.0  ;;  %v475_v0 = vmax.f32 %v283_v58, 0.0 }
 0x102   :  { %v6235_v61 = vpack.c.bf16 %v472_v55, %v468_v47  ;;  %v6237_v62 = vpack.c.bf16 %v473_v56, %v469_v48 }
 0x104   :  { %1428 = vmatmul.bf16.gmra.mxu2 %v6235_v61  ;;  %1477 = vmatmul.bf16.gmra.mxu3 %v6237_v62 }
 0x105   :  { %v347_v1 = vpop.f32.mrf.mxu2  ;;  %v412_v2 = vpop.f32.mrf.mxu3 }
 0x106   :  { %v220_v12 = vpop.f32.mrf.mxu0  ;;  %v285_v13 = vpop.f32.mrf.mxu1  ;;  %v348_v40 = vadd.f32 %v347_v1, %v6099_v18  ;;  %v413_v41 = vadd.f32 %v412_v2, %v6101_v19  ;;  %v6260_v1 = vld [vmem:[%s6870_s4] sm:$0xf]  ;;  %v5615_v2 = vld [vmem:[#allocation2 + $0x2d4] sm:$0xf0] }
 0x107   :  { %v221_v20 = vadd.f32 %v220_v12, %v6091_v3  ;;  %v286_v21 = vadd.f32 %v285_v13, %v6093_v4  ;;  %v4623_v4 = vor.u32 %v5587_v43, %v4622_v42  ;;  %v4862_v12 = vld [vmem:[#allocation2 + $0x3c8] sm:$0xf]  ;;  %v5647_v13 = vld [vmem:[#allocation2 + $0x3d4] sm:$0xf0] }
 0x108   :  { %v476_v55 = vmax.f32 %v348_v40, 0.0  ;;  %v477_v56 = vmax.f32 %v413_v41, 0.0  ;;  %v4863_v15 = vor.u32 %v5647_v13, %v4862_v12  ;;  %v4718_v43 = vld [vmem:[#allocation2 + $0x2a8] sm:$0xf] }
 0x109   :  { %v478_v32 = vmax.f32 %v221_v20, 0.0  ;;  %v479_v33 = vmax.f32 %v286_v21, 0.0  ;;  %1733 = vmatpush.bf16.msrb.mxu1 %v4623_v4  ;;  %v4606_v21 = vld [vmem:[#allocation2 + $0x1c8] sm:$0xf] }
 0x10a   :  { %1832 = vmatpush.bf16.msrb.mxu3 %v4863_v15  ;;  %v4590_v13 = vld [vmem:[#allocation2 + $0x1a8] sm:$0xf] }
 0x10b   :  { %v6243_v34 = vpack.c.bf16 %v478_v32, %v474_v63  ;;  %v6245_v37 = vpack.c.bf16 %v479_v33, %v475_v0  ;;  %v4607_v32 = vor.u32 %v5583_v24, %v4606_v21 }
 0x10d   :  { %v350_v3 = vpop.f32.mrf.mxu2  ;;  %v415_v44 = vpop.f32.mrf.mxu3  ;;  %1335 = vmatmul.bf16.gmra.mxu0 %v6243_v34  ;;  %1384 = vmatmul.bf16.gmra.mxu1 %v6245_v37 }
 0x10e   :  { %v351_v47 = vadd.f32 %v350_v3, %v6099_v18  ;;  %v416_v48 = vadd.f32 %v415_v44, %v6101_v19  ;;  %v6265_v18 = vperm.slane %v6260_v1, 0  ;;  %v4734_v19 = vld [vmem:[#allocation2 + $0x2c8] sm:$0xf]  ;;  %1734 = vmatpush.bf16.msrb.mxu1 %v4607_v32  ;;  %v5611_v3 = vld [vmem:[#allocation2 + $0x2b4] sm:$0xf0] }
 0x10f   :  { %v4735_v8 = vor.u32 %v5615_v2, %v4734_v19  ;;  %v4462_v44 = vld [vmem:[#allocation2 + $0xa8] sm:$0xf] }
 0x110   :  { %v480_v57 = vmax.f32 %v351_v47, 0.0  ;;  %v481_v58 = vmax.f32 %v416_v48, 0.0  ;;  %v4719_v48 = vor.u32 %v5611_v3, %v4718_v43 }
 0x111   :  { %1783 = vmatpush.bf16.msrb.mxu2 %v4735_v8 }
 0x112   :  { %v6253_v63 = vpack.c.bf16 %v480_v57, %v476_v55  ;;  %v6255_v0 = vpack.c.bf16 %v481_v58, %v477_v56  ;;  %v5547_v55 = vld [vmem:[#allocation2 + $0xb4] sm:$0xf0]  ;;  %v4846_v56 = vld [vmem:[#allocation2 + $0x3a8] sm:$0xf] }
 0x113   :  { %v5643_v57 = vld [vmem:[#allocation2 + $0x3b4] sm:$0xf0]  ;;  %v4463_v19 = vor.u32 %v5547_v55, %v4462_v44  ;;  %v4702_v44 = vld [vmem:[#allocation2 + $0x288] sm:$0xf] }
 0x114   :  { %1433 = vmatmul.bf16.gmra.mxu2 %v6253_v63  ;;  %1482 = vmatmul.bf16.gmra.mxu3 %v6255_v0  ;;  %v4847_v2 = vor.u32 %v5643_v57, %v4846_v56  ;;  %v5543_v56 = vld [vmem:[#allocation2 + $0x94] sm:$0xf0]  ;;  %v4830_v57 = vld [vmem:[#allocation2 + $0x388] sm:$0xf] }
 0x115   :  { %1784 = vmatpush.bf16.msrb.mxu2 %v4719_v48  ;;  %1686 = vmatpush.bf16.msrb.mxu0 %v4463_v19 }
 0x116   :  { %1833 = vmatpush.bf16.msrb.mxu3 %v4847_v2 }
 0x11a   :  { %v1301_v16 = vpop.f32.mrf.mxu0  ;;  %v1350_v17 = vpop.f32.mrf.mxu1 }
 0x11b   :  { %v1302_v20 = vadd.f32 %v1301_v16, %v6265_v18  ;;  %v4591_v16 = vor.u32 %v5579_v14, %v4590_v13  ;;  %v4574_v14 = vld [vmem:[#allocation2 + $0x188] sm:$0xf] }
 0x11d   :  { %v1351_v27 = vadd.f32 %v1350_v17, %v1302_v20  ;;  %1496 = vmatmul.bf16.vlgmr.msra.gmra.mxu0 %v6103_v28  ;;  %1545 = vmatmul.bf16.vlgmr.msra.gmra.mxu1 %v6105_v29 }
 0x11e   :  { %1735 = vmatpush.bf16.msrb.mxu1 %v4591_v16  ;;  %v5575_v16 = vld [vmem:[#allocation2 + $0x194] sm:$0xf0] }
 0x122   :  { %v1303_v33 = vpop.f32.mrf.mxu0  ;;  %v1352_v40 = vpop.f32.mrf.mxu1 }
 0x123   :  { %v1304_v41 = vadd.f32 %v1303_v33, %v6265_v18 }
 0x124   :  { %1594 = vmatmul.bf16.vlgmr.msra.gmra.mxu2 %v6113_v45  ;;  %1643 = vmatmul.bf16.vlgmr.msra.gmra.mxu3 %v6115_v46 }
 0x125   :  { %v1353_v42 = vadd.f32 %v1352_v40, %v1304_v41 }
 0x127   :  { %v1399_v4 = vpop.f32.mrf.mxu2  ;;  %v1448_v47 = vpop.f32.mrf.mxu3 }
 0x128   :  { %v1400_v58 = vadd.f32 %v1399_v4, %v1351_v27  ;;  %v5607_v4 = vld [vmem:[#allocation2 + $0x294] sm:$0xf0] }
 0x12a   :  { %v1449_v5 = vadd.f32 %v1448_v47, %v1400_v58  ;;  %v1306_v8 = vpop.f32.mrf.mxu0  ;;  %v1355_v11 = vpop.f32.mrf.mxu1  ;;  %v4446_v47 = vld [vmem:[#allocation2 + $0x88] sm:$0xf]  ;;  %v5639_v58 = vld [vmem:[#allocation2 + $0x394] sm:$0xf0] }
 0x12b   :  { %v1307_v12 = vadd.f32 %v1306_v8, %v6265_v18  ;;  %v4447_v2 = vor.u32 %v5543_v56, %v4446_v47 }
 0x12c   :  { %v2076_v40 = vmax.f32 %v1449_v5, 0.0  ;;  %v4831_v5 = vor.u32 %v5639_v58, %v4830_v57  ;;  %v5539_v58 = vld [vmem:[#allocation2 + $0x74] sm:$0xf0] }
 0x12d   :  { %v1356_v15 = vadd.f32 %v1355_v11, %v1307_v12  ;;  %1501 = vmatmul.bf16.gmra.mxu0 %v6123_v6  ;;  %1550 = vmatmul.bf16.gmra.mxu1 %v6125_v7 }
 0x12e   :  { %1687 = vmatpush.bf16.msrb.mxu0 %v4447_v2  ;;  %1834 = vmatpush.bf16.msrb.mxu3 %v4831_v5  ;;  %v5635_v2 = vld [vmem:[#allocation2 + $0x374] sm:$0xf0] }
 0x12f   :  { %v1401_v17 = vpop.f32.mrf.mxu2  ;;  %v1450_v20 = vpop.f32.mrf.mxu3 }
 0x130   :  { %v1402_v21 = vadd.f32 %v1401_v17, %v1353_v42  ;;  %v4703_v42 = vor.u32 %v5607_v4, %v4702_v44 }
 0x132   :  { %v1451_v24 = vadd.f32 %v1450_v20, %v1402_v21  ;;  %v1308_v27 = vpop.f32.mrf.mxu0  ;;  %v1357_v32 = vpop.f32.mrf.mxu1  ;;  %1785 = vmatpush.bf16.msrb.mxu2 %v4703_v42  ;;  %v4575_v20 = vor.u32 %v5575_v16, %v4574_v14  ;;  %v4430_v42 = vld [vmem:[#allocation2 + $0x68] sm:$0xf] }
 0x133   :  { %v1309_v33 = vadd.f32 %v1308_v27, %v6265_v18 }
 0x134   :  { %v2080_v41 = vmax.f32 %v1451_v24, 0.0  ;;  %1599 = vmatmul.bf16.gmra.mxu2 %v6133_v25  ;;  %1648 = vmatmul.bf16.gmra.mxu3 %v6135_v26 }
 0x135   :  { %v1358_v43 = vadd.f32 %v1357_v32, %v1309_v33  ;;  %1736 = vmatpush.bf16.msrb.mxu1 %v4575_v20  ;;  %v4558_v20 = vld [vmem:[#allocation2 + $0x168] sm:$0xf] }
 0x136   :  { %v6279_v3 = vpack.c.bf16 %v2080_v41, %v2076_v40 }
 0x137   :  { %v1404_v48 = vpop.f32.mrf.mxu2  ;;  %v1453_v55 = vpop.f32.mrf.mxu3 }
 0x138   :  { %v1405_v19 = vadd.f32 %v1404_v48, %v1356_v15  ;;  %v4686_v48 = vld [vmem:[#allocation2 + $0x268] sm:$0xf] }
 0x13a   :  { %v1454_v8 = vadd.f32 %v1453_v55, %v1405_v19  ;;  %v1311_v11 = vpop.f32.mrf.mxu0  ;;  %v1360_v12 = vpop.f32.mrf.mxu1  ;;  %v5603_v55 = vld [vmem:[#allocation2 + $0x274] sm:$0xf0]  ;;  %v4814_v19 = vld [vmem:[#allocation2 + $0x368] sm:$0xf] }
 0x13b   :  { %v1312_v13 = vadd.f32 %v1311_v11, %v6265_v18  ;;  %v4431_v11 = vor.u32 %v5539_v58, %v4430_v42  ;;  %v4414_v58 = vld [vmem:[#allocation2 + $0x48] sm:$0xf] }
 0x13c   :  { %v2084_v41 = vmax.f32 %v1454_v8, 0.0  ;;  %v4815_v8 = vor.u32 %v5635_v2, %v4814_v19 }
 0x13d   :  { %v1361_v17 = vadd.f32 %v1360_v12, %v1312_v13  ;;  %1506 = vmatmul.bf16.gmra.mxu0 %v6143_v52  ;;  %1555 = vmatmul.bf16.gmra.mxu1 %v6145_v53 }
 0x13e   :  { %1688 = vmatpush.bf16.msrb.mxu0 %v4431_v11  ;;  %1835 = vmatpush.bf16.msrb.mxu3 %v4815_v8  ;;  %v4798_v11 = vld [vmem:[#allocation2 + $0x348] sm:$0xf]  ;;  %v5631_v8 = vld [vmem:[#allocation2 + $0x354] sm:$0xf0] }
 0x13f   :  { %v1406_v21 = vpop.f32.mrf.mxu2  ;;  %v1455_v15 = vpop.f32.mrf.mxu3 }
 0x140   :  { %v1407_v24 = vadd.f32 %v1406_v21, %v1358_v43  ;;  %v4687_v43 = vor.u32 %v5603_v55, %v4686_v48  ;;  %v5571_v21 = vld [vmem:[#allocation2 + $0x174] sm:$0xf0] }
 0x142   :  { %v1456_v27 = vadd.f32 %v1455_v15, %v1407_v24  ;;  %v1313_v32 = vpop.f32.mrf.mxu0  ;;  %v1362_v33 = vpop.f32.mrf.mxu1  ;;  %1786 = vmatpush.bf16.msrb.mxu2 %v4687_v43  ;;  %v4559_v24 = vor.u32 %v5571_v21, %v4558_v20  ;;  %v5599_v43 = vld [vmem:[#allocation2 + $0x254] sm:$0xf0] }
 0x143   :  { %v1314_v40 = vadd.f32 %v1313_v32, %v6265_v18 }
 0x144   :  { %v2088_v44 = vmax.f32 %v1456_v27, 0.0  ;;  %1604 = vmatmul.bf16.gmra.mxu2 %v6153_v9  ;;  %1653 = vmatmul.bf16.gmra.mxu3 %v6155_v10 }
 0x145   :  { %v1363_v4 = vadd.f32 %v1362_v33, %v1314_v40  ;;  %1737 = vmatpush.bf16.msrb.mxu1 %v4559_v24 }
 0x146   :  { %v6287_v47 = vpack.c.bf16 %v2088_v44, %v2084_v41 }
 0x147   :  { %v1409_v56 = vpop.f32.mrf.mxu2  ;;  %v1458_v57 = vpop.f32.mrf.mxu3 }
 0x148   :  { %v1410_v5 = vadd.f32 %v1409_v56, %v1361_v17 }
 0x14a   :  { %v1459_v12 = vadd.f32 %v1458_v57, %v1410_v5  ;;  %v1316_v13 = vpop.f32.mrf.mxu0  ;;  %v1365_v14 = vpop.f32.mrf.mxu1  ;;  %v4670_v57 = vld [vmem:[#allocation2 + $0x248] sm:$0xf]  ;;  %v5535_v5 = vld [vmem:[#allocation2 + $0x54] sm:$0xf0] }
 0x14b   :  { %v1317_v16 = vadd.f32 %v1316_v13, %v6265_v18 }
 0x14c   :  { %v2092_v48 = vmax.f32 %v1459_v12, 0.0  ;;  %v4799_v12 = vor.u32 %v5631_v8, %v4798_v11  ;;  %v4398_v11 = vld [vmem:[#allocation2 + $0x28] sm:$0xf] }
 0x14d   :  { %v1366_v15 = vadd.f32 %v1365_v14, %v1317_v16  ;;  %1511 = vmatmul.bf16.gmra.mxu0 %v6163_v38  ;;  %1560 = vmatmul.bf16.gmra.mxu1 %v6165_v39  ;;  %v4415_v14 = vor.u32 %v5535_v5, %v4414_v58  ;;  %v5595_v5 = vld [vmem:[#allocation2 + $0x234] sm:$0xf0] }
 0x14e   :  { %1836 = vmatpush.bf16.msrb.mxu3 %v4799_v12  ;;  %v4782_v12 = vld [vmem:[#allocation2 + $0x328] sm:$0xf] }
 0x14f   :  { %v1411_v27 = vpop.f32.mrf.mxu2  ;;  %v1460_v17 = vpop.f32.mrf.mxu3  ;;  %1689 = vmatpush.bf16.msrb.mxu0 %v4415_v14  ;;  %v5531_v14 = vld [vmem:[#allocation2 + $0x34] sm:$0xf0] }
 0x150   :  { %v1412_v32 = vadd.f32 %v1411_v27, %v1363_v4  ;;  %v4671_v4 = vor.u32 %v5599_v43, %v4670_v57  ;;  %v4542_v27 = vld [vmem:[#allocation2 + $0x148] sm:$0xf] }
 0x152   :  { %v1461_v33 = vadd.f32 %v1460_v17, %v1412_v32  ;;  %v1318_v40 = vpop.f32.mrf.mxu0  ;;  %v1367_v41 = vpop.f32.mrf.mxu1  ;;  %1787 = vmatpush.bf16.msrb.mxu2 %v4671_v4  ;;  %v5567_v17 = vld [vmem:[#allocation2 + $0x154] sm:$0xf0]  ;;  %v4654_v4 = vld [vmem:[#allocation2 + $0x228] sm:$0xf] }
 0x153   :  { %v1319_v44 = vadd.f32 %v1318_v40, %v6265_v18 }
 0x154   :  { %v2096_v55 = vmax.f32 %v1461_v33, 0.0  ;;  %1609 = vmatmul.bf16.gmra.mxu2 %v6173_v59  ;;  %1658 = vmatmul.bf16.gmra.mxu3 %v6175_v60  ;;  %v4543_v33 = vor.u32 %v5567_v17, %v4542_v27 }
 0x155   :  { %v1368_v42 = vadd.f32 %v1367_v41, %v1319_v44 }
 0x156   :  { %v6295_v56 = vpack.c.bf16 %v2096_v55, %v2092_v48  ;;  %1738 = vmatpush.bf16.msrb.mxu1 %v4543_v33 }
 0x157   :  { %v1414_v19 = vpop.f32.mrf.mxu2  ;;  %v1463_v2 = vpop.f32.mrf.mxu3 }
 0x158   :  { %v1415_v13 = vadd.f32 %v1414_v19, %v1366_v15 }
 0x15a   :  { %v1464_v16 = vadd.f32 %v1463_v2, %v1415_v13  ;;  %v1321_v20 = vpop.f32.mrf.mxu0  ;;  %v1370_v21 = vpop.f32.mrf.mxu1 }
 0x15b   :  { %v1322_v24 = vadd.f32 %v1321_v20, %v6265_v18  ;;  %v5627_v20 = vld [vmem:[#allocation2 + $0x334] sm:$0xf0] }
 0x15c   :  { %v2100_v43 = vmax.f32 %v1464_v16, 0.0  ;;  %v4783_v16 = vor.u32 %v5627_v20, %v4782_v12  ;;  %v5591_v12 = vld [vmem:[#allocation2 + $0x214] sm:$0xf0]  ;;  %v4382_v20 = vld [vmem:[#allocation2 + $0x8] sm:$0xf] }
 0x15d   :  { %v1371_v32 = vadd.f32 %v1370_v21, %v1322_v24  ;;  %1516 = vmatmul.bf16.gmra.mxu0 %v6183_v30  ;;  %1565 = vmatmul.bf16.gmra.mxu1 %v6185_v31  ;;  %v4399_v24 = vor.u32 %v5531_v14, %v4398_v11  ;;  %v4638_v14 = vld [vmem:[#allocation2 + $0x208] sm:$0xf] }
 0x15e   :  { %1837 = vmatpush.bf16.msrb.mxu3 %v4783_v16  ;;  %v5527_v16 = vld [vmem:[#allocation2 + $0x14] sm:$0xf0] }
 0x15f   :  { %v1416_v40 = vpop.f32.mrf.mxu2  ;;  %v1465_v15 = vpop.f32.mrf.mxu3  ;;  %1690 = vmatpush.bf16.msrb.mxu0 %v4399_v24 }
 0x160   :  { %v1417_v41 = vadd.f32 %v1416_v40, %v1368_v42  ;;  %v4655_v42 = vor.u32 %v5595_v5, %v4654_v4 }
 0x162   :  { %v1466_v44 = vadd.f32 %v1465_v15, %v1417_v41  ;;  %v1323_v48 = vpop.f32.mrf.mxu0  ;;  %v1372_v55 = vpop.f32.mrf.mxu1  ;;  %1788 = vmatpush.bf16.msrb.mxu2 %v4655_v42  ;;  %v4526_v15 = vld [vmem:[#allocation2 + $0x128] sm:$0xf]  ;;  %v5563_v41 = vld [vmem:[#allocation2 + $0x134] sm:$0xf0] }
 0x163   :  { %v1324_v57 = vadd.f32 %v1323_v48, %v6265_v18  ;;  %v4527_v48 = vor.u32 %v5563_v41, %v4526_v15  ;;  %v4383_v15 = vor.u32 %v5527_v16, %v4382_v20  ;;  %v4510_v41 = vld [vmem:[#allocation2 + $0x108] sm:$0xf] }
 0x164   :  { %v2104_v58 = vmax.f32 %v1466_v44, 0.0  ;;  %1614 = vmatmul.bf16.gmra.mxu2 %v6193_v51  ;;  %1663 = vmatmul.bf16.gmra.mxu3 %v6195_v54 }
 0x165   :  { %v1373_v19 = vadd.f32 %v1372_v55, %v1324_v57  ;;  %1739 = vmatpush.bf16.msrb.mxu1 %v4527_v48  ;;  %v5559_v48 = vld [vmem:[#allocation2 + $0x114] sm:$0xf0]  ;;  %1691 = vmatpush.bf16.msrb.mxu0 %v4383_v15 }
 0x166   :  { %v6303_v2 = vpack.c.bf16 %v2104_v58, %v2100_v43 }
 0x167   :  { %v1419_v8 = vpop.f32.mrf.mxu2  ;;  %v1468_v13 = vpop.f32.mrf.mxu3 }
 0x168   :  { %v1420_v21 = vadd.f32 %v1419_v8, %v1371_v32 }
 0x16a   :  { %v1469_v27 = vadd.f32 %v1468_v13, %v1420_v21  ;;  %v1326_v17 = vpop.f32.mrf.mxu0  ;;  %v1375_v33 = vpop.f32.mrf.mxu1 }
 0x16b   :  { %v1327_v40 = vadd.f32 %v1326_v17, %v6265_v18  ;;  %v4766_v17 = vld [vmem:[#allocation2 + $0x308] sm:$0xf] }
 0x16c   :  { %v2108_v11 = vmax.f32 %v1469_v27, 0.0 }
 0x16d   :  { %v1376_v44 = vadd.f32 %v1375_v33, %v1327_v40  ;;  %1521 = vmatmul.bf16.gmra.mxu0 %v6203_v22  ;;  %1570 = vmatmul.bf16.gmra.mxu1 %v6205_v23  ;;  %v5623_v33 = vld [vmem:[#allocation2 + $0x314] sm:$0xf0] }
 0x16e   :  { %v4767_v27 = vor.u32 %v5623_v33, %v4766_v17  ;;  %v5617_v17 = vld [vmem:[#allocation2 + $0x2ec] sm:$0xf]  ;;  %v4752_v33 = vld [vmem:[#allocation2 + $0x2f8] sm:$0xf0] }
 0x16f   :  { %v1421_v55 = vpop.f32.mrf.mxu2  ;;  %v1470_v32 = vpop.f32.mrf.mxu3 }
 0x170   :  { %v1422_v57 = vadd.f32 %v1421_v55, %v1373_v19  ;;  %v4639_v19 = vor.u32 %v5591_v12, %v4638_v14  ;;  %v4511_v55 = vor.u32 %v5559_v48, %v4510_v41  ;;  %1838 = vmatpush.bf16.msrb.mxu3 %v4767_v27  ;;  %v4496_v41 = vld [vmem:[#allocation2 + $0xf8] sm:$0xf0]  ;;  %v5649_v48 = vld [vmem:[#allocation2 + $0x3ec] sm:$0xf] }
 0x172   :  { %v1471_v43 = vadd.f32 %v1470_v32, %v1422_v57  ;;  %v1328_v58 = vpop.f32.mrf.mxu0  ;;  %v1377_v4 = vpop.f32.mrf.mxu1  ;;  %1789 = vmatpush.bf16.msrb.mxu2 %v4639_v19  ;;  %1740 = vmatpush.bf16.msrb.mxu1 %v4511_v55  ;;  %v4880_v55 = vld [vmem:[#allocation2 + $0x3f8] sm:$0xf0] }
 0x173   :  { %v1329_v5 = vadd.f32 %v1328_v58, %v6265_v18 }
 0x174   :  { %v2112_v8 = vmax.f32 %v1471_v43, 0.0  ;;  %1619 = vmatmul.bf16.gmra.mxu2 %v6213_v49  ;;  %1668 = vmatmul.bf16.gmra.mxu3 %v6215_v50 }
 0x175   :  { %v1378_v13 = vadd.f32 %v1377_v4, %v1329_v5 }
 0x176   :  { %v6311_v42 = vpack.c.bf16 %v2112_v8, %v2108_v11 }
 0x177   :  { %v1424_v21 = vpop.f32.mrf.mxu2  ;;  %v1473_v24 = vpop.f32.mrf.mxu3 }
 0x178   :  { %6881 = vst [vmem:[#allocation9_spill] sm:$0xff] %v6311_v42  ;;  %v1425_v40 = vadd.f32 %v1424_v21, %v1376_v44 }
 0x17a   :  { %v1474_v32 = vadd.f32 %v1473_v24, %v1425_v40  ;;  %v1331_v57 = vpop.f32.mrf.mxu0  ;;  %v1380_v43 = vpop.f32.mrf.mxu1  ;;  %v5553_v40 = vld [vmem:[#allocation2 + $0xec] sm:$0xf] }
 0x17b   :  { %v1332_v58 = vadd.f32 %v1331_v57, %v6265_v18 }
 0x17c   :  { %v2116_v21 = vmax.f32 %v1474_v32, 0.0  ;;  %v4883_v32 = vor.u32 %v5649_v48, %v4880_v55  ;;  %v6328_v48 = vperm.slane %v6260_v1, 1 }
 0x17d   :  { %v1381_v4 = vadd.f32 %v1380_v43, %v1332_v58  ;;  %1526 = vmatmul.bf16.gmra.mxu0 %v6225_v35  ;;  %1575 = vmatmul.bf16.gmra.mxu1 %v6227_v36  ;;  %v4499_v43 = vor.u32 %v5553_v40, %v4496_v41 }
 0x17e   :  { %2027 = vmatpush.bf16.msra.mxu3 %v4883_v32 }
 0x17f   :  { %v1426_v44 = vpop.f32.mrf.mxu2  ;;  %v1475_v5 = vpop.f32.mrf.mxu3  ;;  %1880 = vmatpush.bf16.msra.mxu0 %v4499_v43  ;;  %v4736_v43 = vld [vmem:[#allocation2 + $0x2d8] sm:$0xf0] }
 0x180   :  { %v1427_v11 = vadd.f32 %v1426_v44, %v1378_v13  ;;  %v4755_v13 = vor.u32 %v5617_v17, %v4752_v33 }
 0x182   :  { %v1476_v8 = vadd.f32 %v1475_v5, %v1427_v11  ;;  %v1333_v14 = vpop.f32.mrf.mxu0  ;;  %v1382_v12 = vpop.f32.mrf.mxu1  ;;  %1978 = vmatpush.bf16.msra.mxu2 %v4755_v13 }
 0x183   :  { %v1334_v20 = vadd.f32 %v1333_v14, %v6265_v18  ;;  %v4624_v14 = vld [vmem:[#allocation2 + $0x1f8] sm:$0xf0] }
 0x184   :  { %v2120_v24 = vmax.f32 %v1476_v8, 0.0  ;;  %1624 = vmatmul.bf16.gmra.mxu2 %v6235_v61  ;;  %1673 = vmatmul.bf16.gmra.mxu3 %v6237_v62  ;;  %v5585_v8 = vld [vmem:[#allocation2 + $0x1ec] sm:$0xf] }
 0x185   :  { %v1383_v19 = vadd.f32 %v1382_v12, %v1334_v20  ;;  %v4627_v20 = vor.u32 %v5585_v8, %v4624_v14 }
 0x186   :  { %v6319_v16 = vpack.c.bf16 %v2120_v24, %v2116_v21 }
 0x187   :  { %v1429_v15 = vpop.f32.mrf.mxu2  ;;  %v1478_v27 = vpop.f32.mrf.mxu3  ;;  %1929 = vmatpush.bf16.msra.mxu1 %v4627_v20 }
 0x188   :  { %6882 = vst [vmem:[#allocation10_spill] sm:$0xff] %v6319_v16  ;;  %v1430_v57 = vadd.f32 %v1429_v15, %v1381_v4 }
 0x18a   :  { %v1479_v58 = vadd.f32 %v1478_v27, %v1430_v57  ;;  %v1336_v44 = vpop.f32.mrf.mxu0  ;;  %v1385_v5 = vpop.f32.mrf.mxu1  ;;  %v5613_v57 = vld [vmem:[#allocation2 + $0x2cc] sm:$0xf] }
 0x18b   :  { %v1337_v11 = vadd.f32 %v1336_v44, %v6265_v18 }
 0x18c   :  { %v2124_v27 = vmax.f32 %v1479_v58, 0.0  ;;  %v4864_v58 = vld [vmem:[#allocation2 + $0x3d8] sm:$0xf0] }
 0x18d   :  { %v1386_v12 = vadd.f32 %v1385_v5, %v1337_v11  ;;  %1531 = vmatmul.bf16.gmra.mxu0 %v6243_v34  ;;  %1580 = vmatmul.bf16.gmra.mxu1 %v6245_v37  ;;  %v4739_v5 = vor.u32 %v5613_v57, %v4736_v43  ;;  %v4480_v11 = vld [vmem:[#allocation2 + $0xd8] sm:$0xf0] }
 0x18f   :  { %v1431_v21 = vpop.f32.mrf.mxu2  ;;  %v1480_v4 = vpop.f32.mrf.mxu3  ;;  %1979 = vmatpush.bf16.msra.mxu2 %v4739_v5 }
 0x190   :  { %v1432_v24 = vadd.f32 %v1431_v21, %v1383_v19  ;;  %v5549_v19 = vld [vmem:[#allocation2 + $0xcc] sm:$0xf] }
 0x191   :  { %v4483_v14 = vor.u32 %v5549_v19, %v4480_v11 }
 0x192   :  { %v1481_v17 = vadd.f32 %v1480_v4, %v1432_v24  ;;  %v1338_v33 = vpop.f32.mrf.mxu0  ;;  %v1387_v40 = vpop.f32.mrf.mxu1 }
 0x193   :  { %v1339_v15 = vadd.f32 %v1338_v33, %v6265_v18  ;;  %v5645_v18 = vld [vmem:[#allocation2 + $0x3cc] sm:$0xf]  ;;  %1881 = vmatpush.bf16.msra.mxu0 %v4483_v14  ;;  %v4608_v33 = vld [vmem:[#allocation2 + $0x1d8] sm:$0xf0] }
 0x194   :  { %v2128_v13 = vmax.f32 %v1481_v17, 0.0  ;;  %1629 = vmatmul.bf16.gmra.mxu2 %v6253_v63  ;;  %1678 = vmatmul.bf16.gmra.mxu3 %v6255_v0  ;;  %v4867_v20 = vor.u32 %v5645_v18, %v4864_v58  ;;  %v5581_v17 = vld [vmem:[#allocation2 + $0x1cc] sm:$0xf] }
 0x195   :  { %v1388_v41 = vadd.f32 %v1387_v40, %v1339_v15  ;;  %v4611_v15 = vor.u32 %v5581_v17, %v4608_v33  ;;  %v5609_v58 = vld [vmem:[#allocation2 + $0x2ac] sm:$0xf]  ;;  %v4848_v17 = vld [vmem:[#allocation2 + $0x3b8] sm:$0xf0] }
 0x196   :  { %v6330_v55 = vpack.c.bf16 %v2128_v13, %v2124_v27  ;;  %2028 = vmatpush.bf16.msra.mxu3 %v4867_v20  ;;  %v5545_v14 = vld [vmem:[#allocation2 + $0xac] sm:$0xf] }
 0x197   :  { %v1434_v32 = vpop.f32.mrf.mxu2  ;;  %v1483_v44 = vpop.f32.mrf.mxu3  ;;  %1930 = vmatpush.bf16.msra.mxu1 %v4611_v15 }
 0x198   :  { %6883 = vst [vmem:[#allocation11_spill] sm:$0xff] %v6330_v55  ;;  %v1435_v8 = vadd.f32 %v1434_v32, %v1386_v12 }
 0x19a   :  { %v1484_v21 = vadd.f32 %v1483_v44, %v1435_v8  ;;  %v1497_v4 = vpop.f32.mrf.mxu0  ;;  %v1546_v24 = vpop.f32.mrf.mxu1  ;;  %v4720_v8 = vld [vmem:[#allocation2 + $0x2b8] sm:$0xf0] }
 0x19b   :  { %v1498_v1 = vadd.f32 %v1497_v4, %v6328_v48 }
 0x19c   :  { %v2132_v44 = vmax.f32 %v1484_v21, 0.0 }
 0x19d   :  { %v1547_v40 = vadd.f32 %v1546_v24, %v1498_v1  ;;  %1692 = vmatmul.bf16.vlgmr.msrb.gmra.mxu0 %v6103_v28  ;;  %1741 = vmatmul.bf16.vlgmr.msrb.gmra.mxu1 %v6105_v29  ;;  %v4464_v24 = vld [vmem:[#allocation2 + $0xb8] sm:$0xf0]  ;;  %v5641_v1 = vld [vmem:[#allocation2 + $0x3ac] sm:$0xf] }
 0x19e   :  { %v4467_v15 = vor.u32 %v5545_v14, %v4464_v24  ;;  %v4851_v21 = vor.u32 %v5641_v1, %v4848_v17 }
 0x19f   :  { %v1436_v27 = vpop.f32.mrf.mxu2  ;;  %v1485_v12 = vpop.f32.mrf.mxu3 }
 0x1a0   :  { %v1437_v13 = vadd.f32 %v1436_v27, %v1388_v41  ;;  %v4723_v41 = vor.u32 %v5609_v58, %v4720_v8  ;;  %1882 = vmatpush.bf16.msra.mxu0 %v4467_v15  ;;  %2029 = vmatpush.bf16.msra.mxu3 %v4851_v21  ;;  %v4704_v15 = vld [vmem:[#allocation2 + $0x298] sm:$0xf0]  ;;  %v5541_v21 = vld [vmem:[#allocation2 + $0x8c] sm:$0xf] }
 0x1a2   :  { %v1486_v57 = vadd.f32 %v1485_v12, %v1437_v13  ;;  %v1499_v43 = vpop.f32.mrf.mxu0  ;;  %v1548_v19 = vpop.f32.mrf.mxu1  ;;  %1980 = vmatpush.bf16.msra.mxu2 %v4723_v41 }
 0x1a3   :  { %v1500_v32 = vadd.f32 %v1499_v43, %v6328_v48  ;;  %v5577_v43 = vld [vmem:[#allocation2 + $0x1ac] sm:$0xf] }
 0x1a4   :  { %v2136_v5 = vmax.f32 %v1486_v57, 0.0  ;;  %1790 = vmatmul.bf16.vlgmr.msrb.gmra.mxu2 %v6113_v45  ;;  %1839 = vmatmul.bf16.vlgmr.msrb.gmra.mxu3 %v6115_v46 }
 0x1a5   :  { %v1549_v11 = vadd.f32 %v1548_v19, %v1500_v32  ;;  %v4592_v19 = vld [vmem:[#allocation2 + $0x1b8] sm:$0xf0] }
 0x1a6   :  { %v6338_v18 = vpack.c.bf16 %v2136_v5, %v2132_v44  ;;  %v4595_v44 = vor.u32 %v5577_v43, %v4592_v19  ;;  %v5637_v43 = vld [vmem:[#allocation2 + $0x38c] sm:$0xf]  ;;  %v4832_v19 = vld [vmem:[#allocation2 + $0x398] sm:$0xf0] }
 0x1a7   :  { %v1595_v20 = vpop.f32.mrf.mxu2  ;;  %v1644_v4 = vpop.f32.mrf.mxu3 }
 0x1a8   :  { %6884 = vst [vmem:[#allocation12_spill] sm:$0xff] %v6338_v18  ;;  %v1596_v33 = vadd.f32 %v1595_v20, %v1547_v40  ;;  %1931 = vmatpush.bf16.msra.mxu1 %v4595_v44 }
 0x1aa   :  { %v1645_v27 = vadd.f32 %v1644_v4, %v1596_v33  ;;  %v1502_v12 = vpop.f32.mrf.mxu0  ;;  %v1551_v13 = vpop.f32.mrf.mxu1  ;;  %v5605_v33 = vld [vmem:[#allocation2 + $0x28c] sm:$0xf] }
 0x1ab   :  { %v1503_v57 = vadd.f32 %v1502_v12, %v6328_v48 }
 0x1ac   :  { %v2077_v41 = vmax.f32 %v1645_v27, 0.0  ;;  %v4835_v27 = vor.u32 %v5637_v43, %v4832_v19 }
 0x1ad   :  { %v1552_v32 = vadd.f32 %v1551_v13, %v1503_v57  ;;  %1697 = vmatmul.bf16.gmra.mxu0 %v6123_v6  ;;  %1746 = vmatmul.bf16.gmra.mxu1 %v6125_v7  ;;  %v4448_v57 = vld [vmem:[#allocation2 + $0x98] sm:$0xf0] }
 0x1ae   :  { %2030 = vmatpush.bf16.msra.mxu3 %v4835_v27  ;;  %v4688_v27 = vld [vmem:[#allocation2 + $0x278] sm:$0xf0] }
 0x1af   :  { %v1597_v5 = vpop.f32.mrf.mxu2  ;;  %v1646_v40 = vpop.f32.mrf.mxu3 }
 0x1b0   :  { %v1598_v58 = vadd.f32 %v1597_v5, %v1549_v11  ;;  %v4707_v11 = vor.u32 %v5605_v33, %v4704_v15  ;;  %v4451_v5 = vor.u32 %v5541_v21, %v4448_v57 }
 0x1b2   :  { %v1647_v8 = vadd.f32 %v1646_v40, %v1598_v58  ;;  %v1504_v14 = vpop.f32.mrf.mxu0  ;;  %v1553_v20 = vpop.f32.mrf.mxu1  ;;  %1981 = vmatpush.bf16.msra.mxu2 %v4707_v11  ;;  %1883 = vmatpush.bf16.msra.mxu0 %v4451_v5  ;;  %v5601_v5 = vld [vmem:[#allocation2 + $0x26c] sm:$0xf] }
 0x1b3   :  { %v1505_v4 = vadd.f32 %v1504_v14, %v6328_v48 }
 0x1b4   :  { %v2081_v24 = vmax.f32 %v1647_v8, 0.0  ;;  %1795 = vmatmul.bf16.gmra.mxu2 %v6133_v25  ;;  %1844 = vmatmul.bf16.gmra.mxu3 %v6135_v26 }
 0x1b5   :  { %v1554_v1 = vadd.f32 %v1553_v20, %v1505_v4  ;;  %v5573_v20 = vld [vmem:[#allocation2 + $0x18c] sm:$0xf]  ;;  %v4576_v4 = vld [vmem:[#allocation2 + $0x198] sm:$0xf0] }
 0x1b6   :  { %v6346_v17 = vpack.c.bf16 %v2081_v24, %v2077_v41  ;;  %v4579_v24 = vor.u32 %v5573_v20, %v4576_v4  ;;  %v4432_v20 = vld [vmem:[#allocation2 + $0x78] sm:$0xf0]  ;;  %v5633_v4 = vld [vmem:[#allocation2 + $0x36c] sm:$0xf] }
 0x1b7   :  { %v1600_v12 = vpop.f32.mrf.mxu2  ;;  %v1649_v13 = vpop.f32.mrf.mxu3 }
 0x1b8   :  { %v1601_v44 = vadd.f32 %v1600_v12, %v1552_v32  ;;  %1932 = vmatpush.bf16.msra.mxu1 %v4579_v24  ;;  %v4816_v24 = vld [vmem:[#allocation2 + $0x378] sm:$0xf0] }
 0x1ba   :  { %v1650_v40 = vadd.f32 %v1649_v13, %v1601_v44  ;;  %v1507_v58 = vpop.f32.mrf.mxu0  ;;  %v1556_v8 = vpop.f32.mrf.mxu1 }
 0x1bb   :  { %v1508_v14 = vadd.f32 %v1507_v58, %v6328_v48  ;;  %v5537_v58 = vld [vmem:[#allocation2 + $0x6c] sm:$0xf] }
 0x1bc   :  { %v2085_v57 = vmax.f32 %v1650_v40, 0.0  ;;  %v4819_v40 = vor.u32 %v5633_v4, %v4816_v24 }
 0x1bd   :  { %v1557_v41 = vadd.f32 %v1556_v8, %v1508_v14  ;;  %1702 = vmatmul.bf16.gmra.mxu0 %v6143_v52  ;;  %1751 = vmatmul.bf16.gmra.mxu1 %v6145_v53 }
 0x1be   :  { %2031 = vmatpush.bf16.msra.mxu3 %v4819_v40  ;;  %v5597_v40 = vld [vmem:[#allocation2 + $0x24c] sm:$0xf] }
 0x1bf   :  { %v1602_v33 = vpop.f32.mrf.mxu2  ;;  %v1651_v32 = vpop.f32.mrf.mxu3 }
 0x1c0   :  { %v1603_v15 = vadd.f32 %v1602_v33, %v1554_v1  ;;  %v4691_v1 = vor.u32 %v5601_v5, %v4688_v27 }
 0x1c2   :  { %v1652_v21 = vadd.f32 %v1651_v32, %v1603_v15  ;;  %v1509_v12 = vpop.f32.mrf.mxu0  ;;  %v1558_v13 = vpop.f32.mrf.mxu1  ;;  %v4435_v32 = vor.u32 %v5537_v58, %v4432_v20  ;;  %1982 = vmatpush.bf16.msra.mxu2 %v4691_v1 }
 0x1c3   :  { %v1510_v11 = vadd.f32 %v1509_v12, %v6328_v48 }
 0x1c4   :  { %v2089_v43 = vmax.f32 %v1652_v21, 0.0  ;;  %1800 = vmatmul.bf16.gmra.mxu2 %v6153_v9  ;;  %1849 = vmatmul.bf16.gmra.mxu3 %v6155_v10 }
 0x1c5   :  { %v1559_v19 = vadd.f32 %v1558_v13, %v1510_v11  ;;  %1884 = vmatpush.bf16.msra.mxu0 %v4435_v32  ;;  %v5569_v11 = vld [vmem:[#allocation2 + $0x16c] sm:$0xf] }
 0x1c6   :  { %v6354_v44 = vpack.c.bf16 %v2089_v43, %v2085_v57  ;;  %v4560_v57 = vld [vmem:[#allocation2 + $0x178] sm:$0xf0] }
 0x1c7   :  { %v1605_v8 = vpop.f32.mrf.mxu2  ;;  %v1654_v14 = vpop.f32.mrf.mxu3  ;;  %v4563_v5 = vor.u32 %v5569_v11, %v4560_v57  ;;  %v4416_v57 = vld [vmem:[#allocation2 + $0x58] sm:$0xf0] }
 0x1c8   :  { %v1606_v33 = vadd.f32 %v1605_v8, %v1557_v41 }
 0x1c9   :  { %1933 = vmatpush.bf16.msra.mxu1 %v4563_v5  ;;  %v5629_v5 = vld [vmem:[#allocation2 + $0x34c] sm:$0xf] }
 0x1ca   :  { %v1655_v15 = vadd.f32 %v1654_v14, %v1606_v33  ;;  %v1512_v21 = vpop.f32.mrf.mxu0  ;;  %v1561_v12 = vpop.f32.mrf.mxu1 }
 0x1cb   :  { %v1513_v13 = vadd.f32 %v1512_v21, %v6328_v48  ;;  %v4672_v21 = vld [vmem:[#allocation2 + $0x258] sm:$0xf0] }
 0x1cc   :  { %v2093_v4 = vmax.f32 %v1655_v15, 0.0 }
 0x1cd   :  { %v1562_v43 = vadd.f32 %v1561_v12, %v1513_v13  ;;  %1707 = vmatmul.bf16.gmra.mxu0 %v6163_v38  ;;  %1756 = vmatmul.bf16.gmra.mxu1 %v6165_v39  ;;  %v5533_v12 = vld [vmem:[#allocation2 + $0x4c] sm:$0xf] }
 0x1cf   :  { %v1607_v27 = vpop.f32.mrf.mxu2  ;;  %v1656_v41 = vpop.f32.mrf.mxu3 }
 0x1d0   :  { %v1608_v58 = vadd.f32 %v1607_v27, %v1559_v19  ;;  %v4675_v19 = vor.u32 %v5597_v40, %v4672_v21  ;;  %v4800_v27 = vld [vmem:[#allocation2 + $0x358] sm:$0xf0] }
 0x1d1   :  { %v4803_v15 = vor.u32 %v5629_v5, %v4800_v27 }
 0x1d2   :  { %v1657_v8 = vadd.f32 %v1656_v41, %v1608_v58  ;;  %v1514_v14 = vpop.f32.mrf.mxu0  ;;  %v1563_v1 = vpop.f32.mrf.mxu1  ;;  %v4419_v58 = vor.u32 %v5533_v12, %v4416_v57  ;;  %1983 = vmatpush.bf16.msra.mxu2 %v4675_v19 }
 0x1d3   :  { %v1515_v20 = vadd.f32 %v1514_v14, %v6328_v48  ;;  %2032 = vmatpush.bf16.msra.mxu3 %v4803_v15  ;;  %v4656_v15 = vld [vmem:[#allocation2 + $0x238] sm:$0xf0] }
 0x1d4   :  { %v2097_v24 = vmax.f32 %v1657_v8, 0.0  ;;  %1805 = vmatmul.bf16.gmra.mxu2 %v6173_v59  ;;  %1854 = vmatmul.bf16.gmra.mxu3 %v6175_v60 }
 0x1d5   :  { %v1564_v33 = vadd.f32 %v1563_v1, %v1515_v20  ;;  %1885 = vmatpush.bf16.msra.mxu0 %v4419_v58  ;;  %v5565_v20 = vld [vmem:[#allocation2 + $0x14c] sm:$0xf] }
 0x1d6   :  { %v6362_v32 = vpack.c.bf16 %v2097_v24, %v2093_v4  ;;  %v4544_v4 = vld [vmem:[#allocation2 + $0x158] sm:$0xf0]  ;;  %v5593_v58 = vld [vmem:[#allocation2 + $0x22c] sm:$0xf] }
 0x1d7   :  { %v1610_v13 = vpop.f32.mrf.mxu2  ;;  %v1659_v11 = vpop.f32.mrf.mxu3  ;;  %v4547_v40 = vor.u32 %v5565_v20, %v4544_v4  ;;  %v4400_v4 = vld [vmem:[#allocation2 + $0x38] sm:$0xf0] }
 0x1d8   :  { %v1611_v41 = vadd.f32 %v1610_v13, %v1562_v43 }
 0x1d9   :  { %1934 = vmatpush.bf16.msra.mxu1 %v4547_v40  ;;  %v5625_v40 = vld [vmem:[#allocation2 + $0x32c] sm:$0xf] }
 0x1da   :  { %v1660_v8 = vadd.f32 %v1659_v11, %v1611_v41  ;;  %v1517_v14 = vpop.f32.mrf.mxu0  ;;  %v1566_v18 = vpop.f32.mrf.mxu1 }
 0x1db   :  { %v1518_v1 = vadd.f32 %v1517_v14, %v6328_v48  ;;  %v5529_v14 = vld [vmem:[#allocation2 + $0x2c] sm:$0xf] }
 0x1dc   :  { %v2101_v5 = vmax.f32 %v1660_v8, 0.0 }
 0x1dd   :  { %v1567_v24 = vadd.f32 %v1566_v18, %v1518_v1  ;;  %1712 = vmatmul.bf16.gmra.mxu0 %v6183_v30  ;;  %1761 = vmatmul.bf16.gmra.mxu1 %v6185_v31 }
 0x1df   :  { %v1612_v21 = vpop.f32.mrf.mxu2  ;;  %v1661_v43 = vpop.f32.mrf.mxu3 }
 0x1e0   :  { %v1613_v12 = vadd.f32 %v1612_v21, %v1564_v33  ;;  %v4659_v33 = vor.u32 %v5593_v58, %v4656_v15  ;;  %v4784_v21 = vld [vmem:[#allocation2 + $0x338] sm:$0xf0] }
 0x1e1   :  { %v4787_v8 = vor.u32 %v5625_v40, %v4784_v21 }
 0x1e2   :  { %v1662_v13 = vadd.f32 %v1661_v43, %v1613_v12  ;;  %v1519_v11 = vpop.f32.mrf.mxu0  ;;  %v1568_v19 = vpop.f32.mrf.mxu1  ;;  %v4403_v12 = vor.u32 %v5529_v14, %v4400_v4  ;;  %1984 = vmatpush.bf16.msra.mxu2 %v4659_v33 }
 0x1e3   :  { %v1520_v57 = vadd.f32 %v1519_v11, %v6328_v48  ;;  %2033 = vmatpush.bf16.msra.mxu3 %v4787_v8  ;;  %v4640_v8 = vld [vmem:[#allocation2 + $0x218] sm:$0xf0] }
 0x1e4   :  { %v2105_v27 = vmax.f32 %v1662_v13, 0.0  ;;  %1810 = vmatmul.bf16.gmra.mxu2 %v6193_v51  ;;  %1859 = vmatmul.bf16.gmra.mxu3 %v6195_v54 }
 0x1e5   :  { %v1569_v18 = vadd.f32 %v1568_v19, %v1520_v57  ;;  %1886 = vmatpush.bf16.msra.mxu0 %v4403_v12  ;;  %v5561_v57 = vld [vmem:[#allocation2 + $0x12c] sm:$0xf] }
 0x1e6   :  { %v6370_v41 = vpack.c.bf16 %v2105_v27, %v2101_v5  ;;  %v4528_v5 = vld [vmem:[#allocation2 + $0x138] sm:$0xf0]  ;;  %v5589_v12 = vld [vmem:[#allocation2 + $0x20c] sm:$0xf] }
 0x1e7   :  { %v1615_v1 = vpop.f32.mrf.mxu2  ;;  %v1664_v20 = vpop.f32.mrf.mxu3  ;;  %v4531_v58 = vor.u32 %v5561_v57, %v4528_v5  ;;  %v4384_v5 = vld [vmem:[#allocation2 + $0x18] sm:$0xf0] }
 0x1e8   :  { %v1616_v43 = vadd.f32 %v1615_v1, %v1567_v24 }
 0x1e9   :  { %1935 = vmatpush.bf16.msra.mxu1 %v4531_v58  ;;  %v5621_v58 = vld [vmem:[#allocation2 + $0x30c] sm:$0xf] }
 0x1ea   :  { %v1665_v13 = vadd.f32 %v1664_v20, %v1616_v43  ;;  %v1522_v11 = vpop.f32.mrf.mxu0  ;;  %v1571_v55 = vpop.f32.mrf.mxu1 }
 0x1eb   :  { %v1523_v19 = vadd.f32 %v1522_v11, %v6328_v48  ;;  %v5525_v11 = vld [vmem:[#allocation2 + $0xc] sm:$0xf] }
 0x1ec   :  { %v2109_v40 = vmax.f32 %v1665_v13, 0.0 }
 0x1ed   :  { %v1572_v27 = vadd.f32 %v1571_v55, %v1523_v19  ;;  %1717 = vmatmul.bf16.gmra.mxu0 %v6203_v22  ;;  %1766 = vmatmul.bf16.gmra.mxu1 %v6205_v23 }
 0x1ef   :  { %v1617_v15 = vpop.f32.mrf.mxu2  ;;  %v1666_v24 = vpop.f32.mrf.mxu3 }
 0x1f0   :  { %v1618_v14 = vadd.f32 %v1617_v15, %v1569_v18  ;;  %v4643_v18 = vor.u32 %v5589_v12, %v4640_v8  ;;  %v4768_v15 = vld [vmem:[#allocation2 + $0x318] sm:$0xf0] }
 0x1f1   :  { %v4771_v13 = vor.u32 %v5621_v58, %v4768_v15 }
 0x1f2   :  { %v1667_v1 = vadd.f32 %v1666_v24, %v1618_v14  ;;  %v1524_v20 = vpop.f32.mrf.mxu0  ;;  %v1573_v33 = vpop.f32.mrf.mxu1  ;;  %v4387_v14 = vor.u32 %v5525_v11, %v4384_v5  ;;  %1985 = vmatpush.bf16.msra.mxu2 %v4643_v18 }
 0x1f3   :  { %v1525_v4 = vadd.f32 %v1524_v20, %v6328_v48  ;;  %v4512_v20 = vld [vmem:[#allocation2 + $0x118] sm:$0xf0]  ;;  %2034 = vmatpush.bf16.msra.mxu3 %v4771_v13 }
 0x1f4   :  { %v2113_v21 = vmax.f32 %v1667_v1, 0.0  ;;  %1815 = vmatmul.bf16.gmra.mxu2 %v6213_v49  ;;  %1864 = vmatmul.bf16.gmra.mxu3 %v6215_v50  ;;  %v5557_v1 = vld [vmem:[#allocation2 + $0x10c] sm:$0xf] }
 0x1f5   :  { %v1574_v55 = vadd.f32 %v1573_v33, %v1525_v4  ;;  %v4515_v16 = vor.u32 %v5557_v1, %v4512_v20  ;;  %1887 = vmatpush.bf16.msra.mxu0 %v4387_v14 }
 0x1f6   :  { %v6378_v43 = vpack.c.bf16 %v2113_v21, %v2109_v40 }
 0x1f7   :  { %v1620_v19 = vpop.f32.mrf.mxu2  ;;  %v1669_v57 = vpop.f32.mrf.mxu3  ;;  %1936 = vmatpush.bf16.msra.mxu1 %v4515_v16 }
 0x1f8   :  { %v1621_v24 = vadd.f32 %v1620_v19, %v1572_v27 }
 0x1fa   :  { %v1670_v42 = vadd.f32 %v1669_v57, %v1621_v24  ;;  %v1527_v33 = vpop.f32.mrf.mxu0  ;;  %v1576_v4 = vpop.f32.mrf.mxu1 }
 0x1fb   :  { %v1528_v40 = vadd.f32 %v1527_v33, %v6328_v48 }
 0x1fc   :  { %v2117_v5 = vmax.f32 %v1670_v42, 0.0 }
 0x1fd   :  { %v1577_v21 = vadd.f32 %v1576_v4, %v1528_v40  ;;  %1722 = vmatmul.bf16.gmra.mxu0 %v6225_v35  ;;  %1771 = vmatmul.bf16.gmra.mxu1 %v6227_v36 }
 0x1ff   :  { %v1622_v27 = vpop.f32.mrf.mxu2  ;;  %v1671_v12 = vpop.f32.mrf.mxu3 }
 0x200   :  { %v1623_v8 = vadd.f32 %v1622_v27, %v1574_v55 }
 0x202   :  { %v1672_v11 = vadd.f32 %v1671_v12, %v1623_v8  ;;  %v1529_v19 = vpop.f32.mrf.mxu0  ;;  %v1578_v18 = vpop.f32.mrf.mxu1 }
 0x203   :  { %v1530_v57 = vadd.f32 %v1529_v19, %v6328_v48 }
 0x204   :  { %v2121_v58 = vmax.f32 %v1672_v11, 0.0  ;;  %1820 = vmatmul.bf16.gmra.mxu2 %v6235_v61  ;;  %1869 = vmatmul.bf16.gmra.mxu3 %v6237_v62 }
 0x205   :  { %v1579_v16 = vadd.f32 %v1578_v18, %v1530_v57 }
 0x206   :  { %v6386_v15 = vpack.c.bf16 %v2121_v58, %v2117_v5  ;;  %v5254_v58 = vld [vmem:[#allocation4 + $0x2e0] sm:$0xf] }
 0x207   :  { %v1625_v24 = vpop.f32.mrf.mxu2  ;;  %v1674_v14 = vpop.f32.mrf.mxu3 }
 0x208   :  { %v1626_v13 = vadd.f32 %v1625_v24, %v1577_v21  ;;  %v5746_v24 = vld [vmem:[#allocation4 + $0x2ec] sm:$0xf0] }
 0x20a   :  { %v1675_v1 = vadd.f32 %v1674_v14, %v1626_v13  ;;  %v1532_v20 = vpop.f32.mrf.mxu0  ;;  %v1581_v55 = vpop.f32.mrf.mxu1 }
 0x20b   :  { %v1533_v33 = vadd.f32 %v1532_v20, %v6328_v48 }
 0x20c   :  { %v2125_v18 = vmax.f32 %v1675_v1, 0.0  ;;  %v5255_v1 = vor.u32 %v5746_v24, %v5254_v58  ;;  %v5714_v58 = vld [vmem:[#allocation4 + $0x1ec] sm:$0xf0] }
 0x20d   :  { %v1582_v4 = vadd.f32 %v1581_v55, %v1533_v33  ;;  %1727 = vmatmul.bf16.gmra.mxu0 %v6243_v34  ;;  %1776 = vmatmul.bf16.gmra.mxu1 %v6245_v37 }
 0x20e   :  { %3048 = vmatpush.bf16.msrb.mxu2 %v5255_v1 }
 0x20f   :  { %v1627_v42 = vpop.f32.mrf.mxu2  ;;  %v1676_v40 = vpop.f32.mrf.mxu3 }
 0x210   :  { %v1628_v27 = vadd.f32 %v1627_v42, %v1579_v16  ;;  %v6399_v16 = vld [vmem:[%s6870_s4] sm:$0xf] }
 0x212   :  { %v1677_v12 = vadd.f32 %v1676_v40, %v1628_v27  ;;  %v1534_v8 = vpop.f32.mrf.mxu0  ;;  %v1583_v11 = vpop.f32.mrf.mxu1  ;;  %v4998_v27 = vld [vmem:[#allocation4 + $0xe0] sm:$0xf] }
 0x213   :  { %v1535_v19 = vadd.f32 %v1534_v8, %v6328_v48  ;;  %v6402_v48 = vperm.slane %v6399_v16, 2 }
 0x214   :  { %v2129_v21 = vmax.f32 %v1677_v12, 0.0  ;;  %1825 = vmatmul.bf16.gmra.mxu2 %v6253_v63  ;;  %1874 = vmatmul.bf16.gmra.mxu3 %v6255_v0  ;;  %v5682_v12 = vld [vmem:[#allocation4 + $0xec] sm:$0xf0] }
 0x215   :  { %v1584_v57 = vadd.f32 %v1583_v11, %v1535_v19  ;;  %v4999_v11 = vor.u32 %v5682_v12, %v4998_v27  ;;  %v5382_v19 = vld [vmem:[#allocation4 + $0x3e0] sm:$0xf] }
 0x216   :  { %v6394_v5 = vpack.c.bf16 %v2129_v21, %v2125_v18  ;;  %v5778_v18 = vld [vmem:[#allocation4 + $0x3ec] sm:$0xf0]  ;;  %v5126_v21 = vld [vmem:[#allocation4 + $0x1e0] sm:$0xf] }
 0x217   :  { %v1630_v14 = vpop.f32.mrf.mxu2  ;;  %v1679_v13 = vpop.f32.mrf.mxu3  ;;  %2950 = vmatpush.bf16.msrb.mxu0 %v4999_v11  ;;  %v5238_v12 = vld [vmem:[#allocation4 + $0x2c0] sm:$0xf]  ;;  %v5742_v11 = vld [vmem:[#allocation4 + $0x2cc] sm:$0xf0] }
 0x218   :  { %6885 = vst [vmem:[#allocation13_spill] sm:$0xff] %v6394_v5  ;;  %v1631_v20 = vadd.f32 %v1630_v14, %v1582_v4  ;;  %v5383_v5 = vor.u32 %v5778_v18, %v5382_v19  ;;  %v5127_v14 = vor.u32 %v5714_v58, %v5126_v21 }
 0x21a   :  { %v1680_v55 = vadd.f32 %v1679_v13, %v1631_v20  ;;  %v1693_v33 = vpop.f32.mrf.mxu0  ;;  %v1742_v42 = vpop.f32.mrf.mxu1  ;;  %3097 = vmatpush.bf16.msrb.mxu3 %v5383_v5  ;;  %2999 = vmatpush.bf16.msrb.mxu1 %v5127_v14  ;;  %v5239_v5 = vor.u32 %v5742_v11, %v5238_v12  ;;  %v5678_v14 = vld [vmem:[#allocation4 + $0xcc] sm:$0xf0] }
 0x21b   :  { %v1694_v40 = vadd.f32 %v1693_v33, %v6402_v48 }
 0x21c   :  { %3049 = vmatpush.bf16.msrb.mxu2 %v5239_v5 }
 0x21d   :  { %v1743_v8 = vadd.f32 %v1742_v42, %v1694_v40  ;;  %1888 = vmatmul.bf16.vlgmr.msra.gmra.mxu0 %v6103_v28  ;;  %1937 = vmatmul.bf16.vlgmr.msra.gmra.mxu1 %v6105_v29  ;;  %v2133_v42 = vmax.f32 %v1680_v55, 0.0 }
 0x21f   :  { %v1632_v4 = vpop.f32.mrf.mxu2  ;;  %v1681_v24 = vpop.f32.mrf.mxu3 }
 0x220   :  { %v1633_v13 = vadd.f32 %v1632_v4, %v1584_v57 }
 0x222   :  { %v1682_v1 = vadd.f32 %v1681_v24, %v1633_v13  ;;  %v1695_v20 = vpop.f32.mrf.mxu0  ;;  %v1744_v33 = vpop.f32.mrf.mxu1  ;;  %v4982_v24 = vld [vmem:[#allocation4 + $0xc0] sm:$0xf] }
 0x223   :  { %v1696_v28 = vadd.f32 %v1695_v20, %v6402_v48  ;;  %v5366_v13 = vld [vmem:[#allocation4 + $0x3c0] sm:$0xf] }
 0x224   :  { %v2137_v29 = vmax.f32 %v1682_v1, 0.0  ;;  %1986 = vmatmul.bf16.vlgmr.msra.gmra.mxu2 %v6113_v45  ;;  %2035 = vmatmul.bf16.vlgmr.msra.gmra.mxu3 %v6115_v46  ;;  %v4983_v46 = vor.u32 %v5678_v14, %v4982_v24  ;;  %v5774_v1 = vld [vmem:[#allocation4 + $0x3cc] sm:$0xf0]  ;;  %v5110_v20 = vld [vmem:[#allocation4 + $0x1c0] sm:$0xf] }
 0x225   :  { %v1745_v40 = vadd.f32 %v1744_v33, %v1696_v28  ;;  %v5367_v33 = vor.u32 %v5774_v1, %v5366_v13  ;;  %v5710_v28 = vld [vmem:[#allocation4 + $0x1cc] sm:$0xf0] }
 0x226   :  { %v6410_v27 = vpack.c.bf16 %v2137_v29, %v2133_v42  ;;  %2951 = vmatpush.bf16.msrb.mxu0 %v4983_v46  ;;  %v5111_v29 = vor.u32 %v5710_v28, %v5110_v20  ;;  %v5674_v28 = vld [vmem:[#allocation4 + $0xac] sm:$0xf0] }
 0x227   :  { %v1791_v19 = vpop.f32.mrf.mxu2  ;;  %v1840_v57 = vpop.f32.mrf.mxu3  ;;  %3098 = vmatpush.bf16.msrb.mxu3 %v5367_v33  ;;  %v4966_v33 = vld [vmem:[#allocation4 + $0xa0] sm:$0xf] }
 0x228   :  { %v1792_v18 = vadd.f32 %v1791_v19, %v1743_v8  ;;  %3000 = vmatpush.bf16.msrb.mxu1 %v5111_v29  ;;  %v5094_v29 = vld [vmem:[#allocation4 + $0x1a0] sm:$0xf] }
 0x22a   :  { %v1841_v21 = vadd.f32 %v1840_v57, %v1792_v18  ;;  %v1698_v58 = vpop.f32.mrf.mxu0  ;;  %v1747_v4 = vpop.f32.mrf.mxu1 }
 0x22b   :  { %v1699_v55 = vadd.f32 %v1698_v58, %v6402_v48 }
 0x22c   :  { %v2078_v5 = vmax.f32 %v1841_v21, 0.0 }
 0x22d   :  { %v1748_v45 = vadd.f32 %v1747_v4, %v1699_v55  ;;  %1893 = vmatmul.bf16.gmra.mxu0 %v6123_v6  ;;  %1942 = vmatmul.bf16.gmra.mxu1 %v6125_v7  ;;  %v5222_v4 = vld [vmem:[#allocation4 + $0x2a0] sm:$0xf]  ;;  %v5738_v55 = vld [vmem:[#allocation4 + $0x2ac] sm:$0xf0] }
 0x22e   :  { %v5223_v14 = vor.u32 %v5738_v55, %v5222_v4 }
 0x22f   :  { %v1793_v8 = vpop.f32.mrf.mxu2  ;;  %v1842_v42 = vpop.f32.mrf.mxu3 }
 0x230   :  { %v1794_v12 = vadd.f32 %v1793_v8, %v1745_v40  ;;  %3050 = vmatpush.bf16.msrb.mxu2 %v5223_v14  ;;  %v5350_v8 = vld [vmem:[#allocation4 + $0x3a0] sm:$0xf] }
 0x231   :  { %v5206_v14 = vld [vmem:[#allocation4 + $0x280] sm:$0xf] }
 0x232   :  { %v1843_v11 = vadd.f32 %v1842_v42, %v1794_v12  ;;  %v1700_v19 = vpop.f32.mrf.mxu0  ;;  %v1749_v57 = vpop.f32.mrf.mxu1  ;;  %v5770_v42 = vld [vmem:[#allocation4 + $0x3ac] sm:$0xf0] }
 0x233   :  { %v1701_v6 = vadd.f32 %v1700_v19, %v6402_v48  ;;  %v5351_v12 = vor.u32 %v5770_v42, %v5350_v8  ;;  %v4950_v8 = vld [vmem:[#allocation4 + $0x80] sm:$0xf]  ;;  %v5670_v42 = vld [vmem:[#allocation4 + $0x8c] sm:$0xf0] }
 0x234   :  { %v2082_v7 = vmax.f32 %v1843_v11, 0.0  ;;  %1991 = vmatmul.bf16.gmra.mxu2 %v6133_v25  ;;  %2040 = vmatmul.bf16.gmra.mxu3 %v6135_v26  ;;  %v4967_v26 = vor.u32 %v5674_v28, %v4966_v33  ;;  %v5706_v11 = vld [vmem:[#allocation4 + $0x1ac] sm:$0xf0] }
 0x235   :  { %v1750_v18 = vadd.f32 %v1749_v57, %v1701_v6  ;;  %v5095_v57 = vor.u32 %v5706_v11, %v5094_v29  ;;  %3099 = vmatpush.bf16.msrb.mxu3 %v5351_v12  ;;  %v5334_v29 = vld [vmem:[#allocation4 + $0x380] sm:$0xf]  ;;  %v5766_v12 = vld [vmem:[#allocation4 + $0x38c] sm:$0xf0] }
 0x236   :  { %v6418_v58 = vpack.c.bf16 %v2082_v7, %v2078_v5  ;;  %2952 = vmatpush.bf16.msrb.mxu0 %v4967_v26  ;;  %v5078_v11 = vld [vmem:[#allocation4 + $0x180] sm:$0xf] }
 0x237   :  { %v1796_v24 = vpop.f32.mrf.mxu2  ;;  %v1845_v40 = vpop.f32.mrf.mxu3  ;;  %3001 = vmatpush.bf16.msrb.mxu1 %v5095_v57 }
 0x238   :  { %v1797_v46 = vadd.f32 %v1796_v24, %v1748_v45 }
 0x23a   :  { %v1846_v13 = vadd.f32 %v1845_v40, %v1797_v46  ;;  %v1703_v1 = vpop.f32.mrf.mxu0  ;;  %v1752_v20 = vpop.f32.mrf.mxu1  ;;  %v5734_v46 = vld [vmem:[#allocation4 + $0x28c] sm:$0xf0] }
 0x23b   :  { %v1704_v21 = vadd.f32 %v1703_v1, %v6402_v48 }
 0x23c   :  { %v2086_v55 = vmax.f32 %v1846_v13, 0.0 }
 0x23d   :  { %v1753_v25 = vadd.f32 %v1752_v20, %v1704_v21  ;;  %1898 = vmatmul.bf16.gmra.mxu0 %v6143_v52  ;;  %1947 = vmatmul.bf16.gmra.mxu1 %v6145_v53  ;;  %v5207_v20 = vor.u32 %v5734_v46, %v5206_v14  ;;  %v5190_v46 = vld [vmem:[#allocation4 + $0x260] sm:$0xf] }
 0x23f   :  { %v1798_v45 = vpop.f32.mrf.mxu2  ;;  %v1847_v19 = vpop.f32.mrf.mxu3  ;;  %3051 = vmatpush.bf16.msrb.mxu2 %v5207_v20 }
 0x240   :  { %v1799_v6 = vadd.f32 %v1798_v45, %v1750_v18  ;;  %v5335_v45 = vor.u32 %v5766_v12, %v5334_v29  ;;  %v5762_v29 = vld [vmem:[#allocation4 + $0x36c] sm:$0xf0]  ;;  %v5062_v12 = vld [vmem:[#allocation4 + $0x160] sm:$0xf] }
 0x242   :  { %v1848_v5 = vadd.f32 %v1847_v19, %v1799_v6  ;;  %v1705_v7 = vpop.f32.mrf.mxu0  ;;  %v1754_v4 = vpop.f32.mrf.mxu1  ;;  %v5702_v19 = vld [vmem:[#allocation4 + $0x18c] sm:$0xf0]  ;;  %3100 = vmatpush.bf16.msrb.mxu3 %v5335_v45 }
 0x243   :  { %v1706_v52 = vadd.f32 %v1705_v7, %v6402_v48  ;;  %v5079_v6 = vor.u32 %v5702_v19, %v5078_v11  ;;  %v5698_v45 = vld [vmem:[#allocation4 + $0x16c] sm:$0xf0] }
 0x244   :  { %v2090_v53 = vmax.f32 %v1848_v5, 0.0  ;;  %1996 = vmatmul.bf16.gmra.mxu2 %v6153_v9  ;;  %2045 = vmatmul.bf16.gmra.mxu3 %v6155_v10  ;;  %v4951_v10 = vor.u32 %v5670_v42, %v4950_v8  ;;  %v4934_v8 = vld [vmem:[#allocation4 + $0x60] sm:$0xf]  ;;  %v5666_v42 = vld [vmem:[#allocation4 + $0x6c] sm:$0xf0] }
 0x245   :  { %v1755_v24 = vadd.f32 %v1754_v4, %v1706_v52  ;;  %3002 = vmatpush.bf16.msrb.mxu1 %v5079_v6 }
 0x246   :  { %v6426_v40 = vpack.c.bf16 %v2090_v53, %v2086_v55  ;;  %2953 = vmatpush.bf16.msrb.mxu0 %v4951_v10  ;;  %v5318_v10 = vld [vmem:[#allocation4 + $0x360] sm:$0xf] }
 0x247   :  { %v1801_v1 = vpop.f32.mrf.mxu2  ;;  %v1850_v18 = vpop.f32.mrf.mxu3  ;;  %v5319_v11 = vor.u32 %v5762_v29, %v5318_v10  ;;  %v5694_v10 = vld [vmem:[#allocation4 + $0x14c] sm:$0xf0] }
 0x248   :  { %v1802_v21 = vadd.f32 %v1801_v1, %v1753_v25  ;;  %v5730_v1 = vld [vmem:[#allocation4 + $0x26c] sm:$0xf0] }
 0x249   :  { %v5191_v20 = vor.u32 %v5730_v1, %v5190_v46  ;;  %3101 = vmatpush.bf16.msrb.mxu3 %v5319_v11 }
 0x24a   :  { %v1851_v33 = vadd.f32 %v1850_v18, %v1802_v21  ;;  %v1708_v28 = vpop.f32.mrf.mxu0  ;;  %v1757_v26 = vpop.f32.mrf.mxu1 }
 0x24b   :  { %v1709_v13 = vadd.f32 %v1708_v28, %v6402_v48  ;;  %3052 = vmatpush.bf16.msrb.mxu2 %v5191_v20 }
 0x24c   :  { %v2094_v55 = vmax.f32 %v1851_v33, 0.0 }
 0x24d   :  { %v1758_v9 = vadd.f32 %v1757_v26, %v1709_v13  ;;  %1903 = vmatmul.bf16.gmra.mxu0 %v6163_v38  ;;  %1952 = vmatmul.bf16.gmra.mxu1 %v6165_v39 }
 0x24f   :  { %v1803_v25 = vpop.f32.mrf.mxu2  ;;  %v1852_v57 = vpop.f32.mrf.mxu3 }
 0x250   :  { %v1804_v5 = vadd.f32 %v1803_v25, %v1755_v24  ;;  %v5063_v25 = vor.u32 %v5698_v45, %v5062_v12 }
 0x252   :  { %v1853_v7 = vadd.f32 %v1852_v57, %v1804_v5  ;;  %v1710_v4 = vpop.f32.mrf.mxu0  ;;  %v1759_v52 = vpop.f32.mrf.mxu1  ;;  %3003 = vmatpush.bf16.msrb.mxu1 %v5063_v25 }
 0x253   :  { %v1711_v38 = vadd.f32 %v1710_v4, %v6402_v48 }
 0x254   :  { %v2098_v39 = vmax.f32 %v1853_v7, 0.0  ;;  %2001 = vmatmul.bf16.gmra.mxu2 %v6173_v59  ;;  %2050 = vmatmul.bf16.gmra.mxu3 %v6175_v60  ;;  %v4935_v60 = vor.u32 %v5666_v42, %v4934_v8  ;;  %v5758_v8 = vld [vmem:[#allocation4 + $0x34c] sm:$0xf0]  ;;  %v5046_v42 = vld [vmem:[#allocation4 + $0x140] sm:$0xf] }
 0x255   :  { %v1760_v53 = vadd.f32 %v1759_v52, %v1711_v38  ;;  %v5047_v12 = vor.u32 %v5694_v10, %v5046_v42  ;;  %v5754_v42 = vld [vmem:[#allocation4 + $0x32c] sm:$0xf0]  ;;  %v5142_v10 = vld [vmem:[#allocation4 + $0x200] sm:$0xf] }
 0x256   :  { %v6434_v14 = vpack.c.bf16 %v2098_v39, %v2094_v55  ;;  %2954 = vmatpush.bf16.msrb.mxu0 %v4935_v60  ;;  %v5174_v55 = vld [vmem:[#allocation4 + $0x240] sm:$0xf]  ;;  %v5726_v39 = vld [vmem:[#allocation4 + $0x24c] sm:$0xf0] }
 0x257   :  { %v1806_v18 = vpop.f32.mrf.mxu2  ;;  %v1855_v24 = vpop.f32.mrf.mxu3  ;;  %v5175_v1 = vor.u32 %v5726_v39, %v5174_v55  ;;  %3004 = vmatpush.bf16.msrb.mxu1 %v5047_v12  ;;  %v5722_v55 = vld [vmem:[#allocation4 + $0x22c] sm:$0xf0] }
 0x258   :  { %v1807_v21 = vadd.f32 %v1806_v18, %v1758_v9 }
 0x259   :  { %3053 = vmatpush.bf16.msrb.mxu2 %v5175_v1 }
 0x25a   :  { %v1856_v28 = vadd.f32 %v1855_v24, %v1807_v21  ;;  %v1713_v26 = vpop.f32.mrf.mxu0  ;;  %v1762_v13 = vpop.f32.mrf.mxu1 }
 0x25b   :  { %v1714_v33 = vadd.f32 %v1713_v26, %v6402_v48  ;;  %v4918_v26 = vld [vmem:[#allocation4 + $0x40] sm:$0xf] }
 0x25c   :  { %v2102_v4 = vmax.f32 %v1856_v28, 0.0 }
 0x25d   :  { %v1763_v59 = vadd.f32 %v1762_v13, %v1714_v33  ;;  %1908 = vmatmul.bf16.gmra.mxu0 %v6183_v30  ;;  %1957 = vmatmul.bf16.gmra.mxu1 %v6185_v31  ;;  %v5662_v13 = vld [vmem:[#allocation4 + $0x4c] sm:$0xf0]  ;;  %v5302_v33 = vld [vmem:[#allocation4 + $0x340] sm:$0xf] }
 0x25e   :  { %v5303_v60 = vor.u32 %v5758_v8, %v5302_v33  ;;  %v5286_v8 = vld [vmem:[#allocation4 + $0x320] sm:$0xf] }
 0x25f   :  { %v1808_v9 = vpop.f32.mrf.mxu2  ;;  %v1857_v19 = vpop.f32.mrf.mxu3 }
 0x260   :  { %v1809_v57 = vadd.f32 %v1808_v9, %v1760_v53  ;;  %3102 = vmatpush.bf16.msrb.mxu3 %v5303_v60 }
 0x262   :  { %v1858_v6 = vadd.f32 %v1857_v19, %v1809_v57  ;;  %v1715_v5 = vpop.f32.mrf.mxu0  ;;  %v1764_v7 = vpop.f32.mrf.mxu1  ;;  %v4902_v57 = vld [vmem:[#allocation4 + $0x20] sm:$0xf] }
 0x263   :  { %v1716_v30 = vadd.f32 %v1715_v5, %v6402_v48 }
 0x264   :  { %v2106_v31 = vmax.f32 %v1858_v6, 0.0  ;;  %2006 = vmatmul.bf16.gmra.mxu2 %v6193_v51  ;;  %2055 = vmatmul.bf16.gmra.mxu3 %v6195_v54  ;;  %v4919_v54 = vor.u32 %v5662_v13, %v4918_v26  ;;  %v5658_v6 = vld [vmem:[#allocation4 + $0x2c] sm:$0xf0] }
 0x265   :  { %v1765_v52 = vadd.f32 %v1764_v7, %v1716_v30  ;;  %v4903_v7 = vor.u32 %v5658_v6, %v4902_v57  ;;  %v5030_v30 = vld [vmem:[#allocation4 + $0x120] sm:$0xf] }
 0x266   :  { %v6442_v38 = vpack.c.bf16 %v2106_v31, %v2102_v4  ;;  %2955 = vmatpush.bf16.msrb.mxu0 %v4919_v54  ;;  %v5690_v4 = vld [vmem:[#allocation4 + $0x12c] sm:$0xf0] }
 0x267   :  { %v1811_v46 = vpop.f32.mrf.mxu2  ;;  %v1860_v53 = vpop.f32.mrf.mxu3  ;;  %v5031_v39 = vor.u32 %v5690_v4, %v5030_v30 }
 0x268   :  { %v1812_v18 = vadd.f32 %v1811_v46, %v1763_v59 }
 0x269   :  { %3005 = vmatpush.bf16.msrb.mxu1 %v5031_v39  ;;  %v5270_v39 = vld [vmem:[#allocation4 + $0x300] sm:$0xf] }
 0x26a   :  { %v1861_v24 = vadd.f32 %v1860_v53, %v1812_v18  ;;  %v1718_v20 = vpop.f32.mrf.mxu0  ;;  %v1767_v21 = vpop.f32.mrf.mxu1  ;;  %2956 = vmatpush.bf16.msrb.mxu0 %v4903_v7 }
 0x26b   :  { %v1719_v28 = vadd.f32 %v1718_v20, %v6402_v48 }
 0x26c   :  { %v2110_v25 = vmax.f32 %v1861_v24, 0.0  ;;  %v5654_v24 = vld [vmem:[#allocation4 + $0xc] sm:$0xf0] }
 0x26d   :  { %v1768_v51 = vadd.f32 %v1767_v21, %v1719_v28  ;;  %1913 = vmatmul.bf16.gmra.mxu0 %v6203_v22  ;;  %1962 = vmatmul.bf16.gmra.mxu1 %v6205_v23  ;;  %v5686_v21 = vld [vmem:[#allocation4 + $0x10c] sm:$0xf0] }
 0x26f   :  { %v1813_v59 = vpop.f32.mrf.mxu2  ;;  %v1862_v29 = vpop.f32.mrf.mxu3 }
 0x270   :  { %v1814_v11 = vadd.f32 %v1813_v59, %v1765_v52  ;;  %v5158_v52 = vld [vmem:[#allocation4 + $0x220] sm:$0xf]  ;;  %v5718_v59 = vld [vmem:[#allocation4 + $0x20c] sm:$0xf0] }
 0x271   :  { %v5159_v1 = vor.u32 %v5722_v55, %v5158_v52 }
 0x272   :  { %v1863_v45 = vadd.f32 %v1862_v29, %v1814_v11  ;;  %v1720_v9 = vpop.f32.mrf.mxu0  ;;  %v1769_v19 = vpop.f32.mrf.mxu1  ;;  %v5143_v11 = vor.u32 %v5718_v59, %v5142_v10  ;;  %v5000_v59 = vld [vmem:[#allocation4 + $0xf0] sm:$0xf0] }
 0x273   :  { %v1721_v22 = vadd.f32 %v1720_v9, %v6402_v48  ;;  %3054 = vmatpush.bf16.msrb.mxu2 %v5159_v1 }
 0x274   :  { %v2114_v23 = vmax.f32 %v1863_v45, 0.0  ;;  %2011 = vmatmul.bf16.gmra.mxu2 %v6213_v49  ;;  %2060 = vmatmul.bf16.gmra.mxu3 %v6215_v50  ;;  %v4886_v49 = vld [vmem:[#allocation4] sm:$0xf] }
 0x275   :  { %v1770_v5 = vadd.f32 %v1769_v19, %v1721_v22  ;;  %v5014_v50 = vld [vmem:[#allocation4 + $0x100] sm:$0xf]  ;;  %v4887_v20 = vor.u32 %v5654_v24, %v4886_v49 }
 0x276   :  { %v6450_v31 = vpack.c.bf16 %v2114_v23, %v2110_v25  ;;  %v5015_v54 = vor.u32 %v5686_v21, %v5014_v50 }
 0x277   :  { %v1816_v46 = vpop.f32.mrf.mxu2  ;;  %v1865_v53 = vpop.f32.mrf.mxu3  ;;  %2957 = vmatpush.bf16.msrb.mxu0 %v4887_v20  ;;  %3055 = vmatpush.bf16.msrb.mxu2 %v5143_v11 }
 0x278   :  { %v1817_v18 = vadd.f32 %v1816_v46, %v1768_v51  ;;  %3006 = vmatpush.bf16.msrb.mxu1 %v5015_v54  ;;  %v5287_v51 = vor.u32 %v5754_v42, %v5286_v8  ;;  %v5750_v46 = vld [vmem:[#allocation4 + $0x30c] sm:$0xf0] }
 0x27a   :  { %v1866_v28 = vadd.f32 %v1865_v53, %v1817_v18  ;;  %v1723_v26 = vpop.f32.mrf.mxu0  ;;  %v1772_v13 = vpop.f32.mrf.mxu1  ;;  %3103 = vmatpush.bf16.msrb.mxu3 %v5287_v51 }
 0x27b   :  { %v1724_v33 = vadd.f32 %v1723_v26, %v6402_v48 }
 0x27c   :  { %v2118_v23 = vmax.f32 %v1866_v28, 0.0 }
 0x27d   :  { %v1773_v60 = vadd.f32 %v1772_v13, %v1724_v33  ;;  %1918 = vmatmul.bf16.gmra.mxu0 %v6225_v35  ;;  %1967 = vmatmul.bf16.gmra.mxu1 %v6227_v36  ;;  %v5256_v13 = vld [vmem:[#allocation4 + $0x2f0] sm:$0xf0] }
 0x27f   :  { %v1818_v29 = vpop.f32.mrf.mxu2  ;;  %v1867_v12 = vpop.f32.mrf.mxu3 }
 0x280   :  { %v1819_v45 = vadd.f32 %v1818_v29, %v1770_v5  ;;  %v5384_v29 = vld [vmem:[#allocation4 + $0x3f0] sm:$0xf0] }
 0x282   :  { %v1868_v9 = vadd.f32 %v1867_v12, %v1819_v45  ;;  %v1725_v19 = vpop.f32.mrf.mxu0  ;;  %v1774_v22 = vpop.f32.mrf.mxu1  ;;  %v5712_v12 = vld [vmem:[#allocation4 + $0x1e4] sm:$0xf]  ;;  %v5128_v45 = vld [vmem:[#allocation4 + $0x1f0] sm:$0xf0] }
 0x283   :  { %v1726_v25 = vadd.f32 %v1725_v19, %v6402_v48 }
 0x284   :  { %v2122_v57 = vmax.f32 %v1868_v9, 0.0  ;;  %2016 = vmatmul.bf16.gmra.mxu2 %v6235_v61  ;;  %2065 = vmatmul.bf16.gmra.mxu3 %v6237_v62  ;;  %v5271_v61 = vor.u32 %v5750_v46, %v5270_v39 }
 0x285   :  { %v1775_v35 = vadd.f32 %v1774_v22, %v1726_v25  ;;  %v5131_v22 = vor.u32 %v5712_v12, %v5128_v45  ;;  %v5736_v12 = vld [vmem:[#allocation4 + $0x2a4] sm:$0xf] }
 0x286   :  { %v6458_v36 = vpack.c.bf16 %v2122_v57, %v2118_v23  ;;  %3104 = vmatpush.bf16.msrb.mxu3 %v5271_v61  ;;  %v6471_v23 = vperm.slane %v6399_v16, 3 }
 0x287   :  { %v1821_v6 = vpop.f32.mrf.mxu2  ;;  %v1870_v7 = vpop.f32.mrf.mxu3  ;;  %3195 = vmatpush.bf16.msra.mxu1 %v5131_v22 }
 0x288   :  { %v1822_v30 = vadd.f32 %v1821_v6, %v1773_v60 }
 0x28a   :  { %v1871_v4 = vadd.f32 %v1870_v7, %v1822_v30  ;;  %v1728_v5 = vpop.f32.mrf.mxu0  ;;  %v1777_v52 = vpop.f32.mrf.mxu1 }
 0x28b   :  { %v1729_v55 = vadd.f32 %v1728_v5, %v6402_v48 }
 0x28c   :  { %v2126_v21 = vmax.f32 %v1871_v4, 0.0 }
 0x28d   :  { %v1778_v53 = vadd.f32 %v1777_v52, %v1729_v55  ;;  %1923 = vmatmul.bf16.gmra.mxu0 %v6243_v34  ;;  %1972 = vmatmul.bf16.gmra.mxu1 %v6245_v37  ;;  %v5744_v37 = vld [vmem:[#allocation4 + $0x2e4] sm:$0xf]  ;;  %v5240_v55 = vld [vmem:[#allocation4 + $0x2d0] sm:$0xf0] }
 0x28e   :  { %v5259_v8 = vor.u32 %v5744_v37, %v5256_v13  ;;  %v5740_v52 = vld [vmem:[#allocation4 + $0x2c4] sm:$0xf]  ;;  %v5112_v13 = vld [vmem:[#allocation4 + $0x1d0] sm:$0xf0] }
 0x28f   :  { %v1823_v62 = vpop.f32.mrf.mxu2  ;;  %v1872_v1 = vpop.f32.mrf.mxu3 }
 0x290   :  { %v1824_v18 = vadd.f32 %v1823_v62, %v1775_v35  ;;  %3244 = vmatpush.bf16.msra.mxu2 %v5259_v8 }
 0x292   :  { %v1873_v49 = vadd.f32 %v1872_v1, %v1824_v18  ;;  %v1730_v24 = vpop.f32.mrf.mxu0  ;;  %v1779_v50 = vpop.f32.mrf.mxu1 }
 0x293   :  { %v1731_v20 = vadd.f32 %v1730_v24, %v6402_v48  ;;  %v5680_v48 = vld [vmem:[#allocation4 + $0xe4] sm:$0xf]  ;;  %v4984_v24 = vld [vmem:[#allocation4 + $0xd0] sm:$0xf0] }
 0x294   :  { %v2130_v28 = vmax.f32 %v1873_v49, 0.0  ;;  %2021 = vmatmul.bf16.gmra.mxu2 %v6253_v63  ;;  %2070 = vmatmul.bf16.gmra.mxu3 %v6255_v0  ;;  %v5003_v63 = vor.u32 %v5680_v48, %v5000_v59  ;;  %v5776_v0 = vld [vmem:[#allocation4 + $0x3e4] sm:$0xf] }
 0x295   :  { %v1780_v26 = vadd.f32 %v1779_v50, %v1731_v20  ;;  %v5387_v11 = vor.u32 %v5776_v0, %v5384_v29  ;;  %v5676_v49 = vld [vmem:[#allocation4 + $0xc4] sm:$0xf] }
 0x296   :  { %v6466_v34 = vpack.c.bf16 %v2130_v28, %v2126_v21  ;;  %3146 = vmatpush.bf16.msra.mxu0 %v5003_v63  ;;  %v4987_v50 = vor.u32 %v5676_v49, %v4984_v24  ;;  %v5772_v20 = vld [vmem:[#allocation4 + $0x3c4] sm:$0xf]  ;;  %v5368_v21 = vld [vmem:[#allocation4 + $0x3d0] sm:$0xf0] }
 0x297   :  { %v1826_v54 = vpop.f32.mrf.mxu2  ;;  %v1875_v33 = vpop.f32.mrf.mxu3  ;;  %3293 = vmatpush.bf16.msra.mxu3 %v5387_v11  ;;  %v5708_v28 = vld [vmem:[#allocation4 + $0x1c4] sm:$0xf]  ;;  %v5371_v37 = vor.u32 %v5772_v20, %v5368_v21  ;;  %v5224_v11 = vld [vmem:[#allocation4 + $0x2b0] sm:$0xf0] }
 0x298   :  { %v1827_v42 = vadd.f32 %v1826_v54, %v1778_v53  ;;  %v5243_v53 = vor.u32 %v5740_v52, %v5240_v55  ;;  %v5115_v8 = vor.u32 %v5708_v28, %v5112_v13  ;;  %v5768_v52 = vld [vmem:[#allocation4 + $0x3a4] sm:$0xf]  ;;  %v5352_v55 = vld [vmem:[#allocation4 + $0x3b0] sm:$0xf0] }
 0x299   :  { %v5732_v13 = vld [vmem:[#allocation4 + $0x284] sm:$0xf] }
 0x29a   :  { %v1876_v60 = vadd.f32 %v1875_v33, %v1827_v42  ;;  %v1889_v51 = vpop.f32.mrf.mxu0  ;;  %v1938_v10 = vpop.f32.mrf.mxu1  ;;  %3245 = vmatpush.bf16.msra.mxu2 %v5243_v53  ;;  %3147 = vmatpush.bf16.msra.mxu0 %v4987_v50  ;;  %v5355_v53 = vor.u32 %v5768_v52, %v5352_v55 }
 0x29b   :  { %v1890_v4 = vadd.f32 %v1889_v51, %v6471_v23  ;;  %3294 = vmatpush.bf16.msra.mxu3 %v5371_v37  ;;  %3196 = vmatpush.bf16.msra.mxu1 %v5115_v8 }
 0x29c   :  { %v2134_v7 = vmax.f32 %v1876_v60, 0.0 }
 0x29d   :  { %2958 = vmatmul.bf16.vlgmr.msrb.gmra.mxu0 %v6279_v3  ;;  %3007 = vmatmul.bf16.vlgmr.msrb.gmra.mxu1 %v6346_v17  ;;  %v1939_v61 = vadd.f32 %v1938_v10, %v1890_v4 }
 0x29f   :  { %v1828_v9 = vpop.f32.mrf.mxu2  ;;  %v1877_v19 = vpop.f32.mrf.mxu3  ;;  %3295 = vmatpush.bf16.msra.mxu3 %v5355_v53 }
 0x2a0   :  { %v1829_v25 = vadd.f32 %v1828_v9, %v1780_v26 }
 0x2a2   :  { %v1878_v57 = vadd.f32 %v1877_v19, %v1829_v25  ;;  %v1891_v35 = vpop.f32.mrf.mxu0  ;;  %v1940_v6 = vpop.f32.mrf.mxu1  ;;  %v5227_v19 = vor.u32 %v5736_v12, %v5224_v11  ;;  %v5764_v11 = vld [vmem:[#allocation4 + $0x384] sm:$0xf] }
 0x2a3   :  { %v1892_v16 = vadd.f32 %v1891_v35, %v6471_v23 }
 0x2a4   :  { %v2138_v30 = vmax.f32 %v1878_v57, 0.0  ;;  %3056 = vmatmul.bf16.vlgmr.msrb.gmra.mxu2 %v6418_v58 }
 0x2a5   :  { %v1941_v26 = vadd.f32 %v1940_v6, %v1892_v16  ;;  %3246 = vmatpush.bf16.msra.mxu2 %v5227_v19 }
 0x2a6   :  { %v6475_v5 = vpack.c.bf16 %v2138_v30, %v2134_v7  ;;  %v5672_v7 = vld [vmem:[#allocation4 + $0xa4] sm:$0xf]  ;;  %v4968_v30 = vld [vmem:[#allocation4 + $0xb0] sm:$0xf0] }
 0x2a7   :  { %v1987_v39 = vpop.f32.mrf.mxu2  ;;  %v2036_v46 = vpop.f32.mrf.mxu3  ;;  %v4971_v4 = vor.u32 %v5672_v7, %v4968_v30 }
 0x2a8   :  { %v1988_v18 = vadd.f32 %v1987_v39, %v1939_v61  ;;  %v5704_v39 = vld [vmem:[#allocation4 + $0x1a4] sm:$0xf]  ;;  %v5096_v61 = vld [vmem:[#allocation4 + $0x1b0] sm:$0xf0] }
 0x2a9   :  { %3148 = vmatpush.bf16.msra.mxu0 %v4971_v4 }
 0x2aa   :  { %v1894_v62 = vpop.f32.mrf.mxu0  ;;  %v1943_v1 = vpop.f32.mrf.mxu1  ;;  %v2037_v42 = vadd.f32 %v2036_v46, %v1988_v18 }
 0x2ab   :  { %v1895_v0 = vadd.f32 %v1894_v62, %v6471_v23 }
 0x2ac   :  { %v2079_v59 = vmax.f32 %v2037_v42, 0.0 }
 0x2ad   :  { %2963 = vmatmul.bf16.gmra.mxu0 %v6287_v47  ;;  %3012 = vmatmul.bf16.gmra.mxu1 %v6354_v44  ;;  %v1944_v22 = vadd.f32 %v1943_v1, %v1895_v0  ;;  %v5099_v1 = vor.u32 %v5704_v39, %v5096_v61  ;;  %v4952_v0 = vld [vmem:[#allocation4 + $0x90] sm:$0xf0] }
 0x2af   :  { %v1989_v54 = vpop.f32.mrf.mxu2  ;;  %v2038_v33 = vpop.f32.mrf.mxu3  ;;  %3197 = vmatpush.bf16.msra.mxu1 %v5099_v1 }
 0x2b0   :  { %v1990_v60 = vadd.f32 %v1989_v54, %v1941_v26  ;;  %v5208_v54 = vld [vmem:[#allocation4 + $0x290] sm:$0xf0] }
 0x2b1   :  { %v5211_v42 = vor.u32 %v5732_v13, %v5208_v54  ;;  %v4936_v13 = vld [vmem:[#allocation4 + $0x70] sm:$0xf0]  ;;  %v6886_v54 = vld [vmem:[#allocation9_spill] sm:$0xff] }
 0x2b2   :  { %v2039_v51 = vadd.f32 %v2038_v33, %v1990_v60  ;;  %v1896_v10 = vpop.f32.mrf.mxu0  ;;  %v1945_v48 = vpop.f32.mrf.mxu1 }
 0x2b3   :  { %v1897_v25 = vadd.f32 %v1896_v10, %v6471_v23  ;;  %3247 = vmatpush.bf16.msra.mxu2 %v5211_v42  ;;  %v5320_v42 = vld [vmem:[#allocation4 + $0x370] sm:$0xf0] }
 0x2b4   :  { %v2083_v63 = vmax.f32 %v2039_v51, 0.0  ;;  %3061 = vmatmul.bf16.gmra.mxu2 %v6426_v40 }
 0x2b5   :  { %v1946_v46 = vadd.f32 %v1945_v48, %v1897_v25  ;;  %v5080_v25 = vld [vmem:[#allocation4 + $0x190] sm:$0xf0] }
 0x2b6   :  { %v6482_v29 = vpack.c.bf16 %v2083_v63, %v2079_v59  ;;  %v5668_v63 = vld [vmem:[#allocation4 + $0x84] sm:$0xf] }
 0x2b7   :  { %v1992_v45 = vpop.f32.mrf.mxu2  ;;  %v2041_v9 = vpop.f32.mrf.mxu3  ;;  %v4955_v12 = vor.u32 %v5668_v63, %v4952_v0 }
 0x2b8   :  { %3105 = vmatmul.bf16.vlgmr.msrb.gmra.mxu3 %v6482_v29  ;;  %v1993_v6 = vadd.f32 %v1992_v45, %v1944_v22  ;;  %v5336_v45 = vld [vmem:[#allocation4 + $0x390] sm:$0xf0] }
 0x2b9   :  { %v5339_v22 = vor.u32 %v5764_v11, %v5336_v45  ;;  %3149 = vmatpush.bf16.msra.mxu0 %v4955_v12 }
 0x2ba   :  { %v1899_v57 = vpop.f32.mrf.mxu0  ;;  %v1948_v35 = vpop.f32.mrf.mxu1  ;;  %v2042_v18 = vadd.f32 %v2041_v9, %v1993_v6  ;;  %v5700_v9 = vld [vmem:[#allocation4 + $0x184] sm:$0xf] }
 0x2bb   :  { %v1900_v26 = vadd.f32 %v1899_v57, %v6471_v23  ;;  %v5083_v6 = vor.u32 %v5700_v9, %v5080_v25  ;;  %3296 = vmatpush.bf16.msra.mxu3 %v5339_v22 }
 0x2bc   :  { %v2087_v21 = vmax.f32 %v2042_v18, 0.0 }
 0x2bd   :  { %2968 = vmatmul.bf16.gmra.mxu0 %v6295_v56  ;;  %3017 = vmatmul.bf16.gmra.mxu1 %v6362_v32  ;;  %v1949_v60 = vadd.f32 %v1948_v35, %v1900_v26  ;;  %v5664_v26 = vld [vmem:[#allocation4 + $0x64] sm:$0xf] }
 0x2be   :  { %3198 = vmatpush.bf16.msra.mxu1 %v5083_v6  ;;  %v5724_v6 = vld [vmem:[#allocation4 + $0x244] sm:$0xf] }
 0x2bf   :  { %v1994_v16 = vpop.f32.mrf.mxu2  ;;  %v2043_v62 = vpop.f32.mrf.mxu3 }
 0x2c0   :  { %v1995_v49 = vadd.f32 %v1994_v16, %v1946_v46  ;;  %v5728_v16 = vld [vmem:[#allocation4 + $0x264] sm:$0xf] }
 0x2c2   :  { %v2044_v24 = vadd.f32 %v2043_v62, %v1995_v49  ;;  %v1901_v50 = vpop.f32.mrf.mxu0  ;;  %v1950_v20 = vpop.f32.mrf.mxu1  ;;  %v5192_v62 = vld [vmem:[#allocation4 + $0x270] sm:$0xf0] }
 0x2c3   :  { %v1902_v51 = vadd.f32 %v1901_v50, %v6471_v23  ;;  %v5195_v49 = vor.u32 %v5728_v16, %v5192_v62  ;;  %v5660_v62 = vld [vmem:[#allocation4 + $0x44] sm:$0xf] }
 0x2c4   :  { %v2091_v28 = vmax.f32 %v2044_v24, 0.0  ;;  %3066 = vmatmul.bf16.gmra.mxu2 %v6434_v14 }
 0x2c5   :  { %v1951_v19 = vadd.f32 %v1950_v20, %v1902_v51  ;;  %3248 = vmatpush.bf16.msra.mxu2 %v5195_v49 }
 0x2c6   :  { %v6490_v37 = vpack.c.bf16 %v2091_v28, %v2087_v21 }
 0x2c7   :  { %v1997_v33 = vpop.f32.mrf.mxu2  ;;  %v2046_v8 = vpop.f32.mrf.mxu3 }
 0x2c8   :  { %3110 = vmatmul.bf16.gmra.mxu3 %v6490_v37  ;;  %v1998_v59 = vadd.f32 %v1997_v33, %v1949_v60  ;;  %v4939_v33 = vor.u32 %v5664_v26, %v4936_v13  ;;  %v5696_v60 = vld [vmem:[#allocation4 + $0x164] sm:$0xf]  ;;  %v5048_v13 = vld [vmem:[#allocation4 + $0x150] sm:$0xf0] }
 0x2ca   :  { %v1904_v10 = vpop.f32.mrf.mxu0  ;;  %v1953_v48 = vpop.f32.mrf.mxu1  ;;  %v2047_v7 = vadd.f32 %v2046_v8, %v1998_v59  ;;  %v5760_v8 = vld [vmem:[#allocation4 + $0x364] sm:$0xf]  ;;  %v5064_v59 = vld [vmem:[#allocation4 + $0x170] sm:$0xf0]  ;;  %3150 = vmatpush.bf16.msra.mxu0 %v4939_v33 }
 0x2cb   :  { %v1905_v53 = vadd.f32 %v1904_v10, %v6471_v23  ;;  %v5323_v10 = vor.u32 %v5760_v8, %v5320_v42  ;;  %v5067_v0 = vor.u32 %v5696_v60, %v5064_v59 }
 0x2cc   :  { %v2095_v39 = vmax.f32 %v2047_v7, 0.0  ;;  %v5176_v7 = vld [vmem:[#allocation4 + $0x250] sm:$0xf0] }
 0x2cd   :  { %2973 = vmatmul.bf16.gmra.mxu0 %v6303_v2  ;;  %3022 = vmatmul.bf16.gmra.mxu1 %v6370_v41  ;;  %v1954_v24 = vadd.f32 %v1953_v48, %v1905_v53 }
 0x2ce   :  { %3297 = vmatpush.bf16.msra.mxu3 %v5323_v10  ;;  %3199 = vmatpush.bf16.msra.mxu1 %v5067_v0  ;;  %v5656_v0 = vld [vmem:[#allocation4 + $0x24] sm:$0xf] }
 0x2cf   :  { %v1999_v57 = vpop.f32.mrf.mxu2  ;;  %v2048_v35 = vpop.f32.mrf.mxu3 }
 0x2d0   :  { %v2000_v30 = vadd.f32 %v1999_v57, %v1951_v19 }
 0x2d2   :  { %v2049_v4 = vadd.f32 %v2048_v35, %v2000_v30  ;;  %v1906_v52 = vpop.f32.mrf.mxu0  ;;  %v1955_v55 = vpop.f32.mrf.mxu1 }
 0x2d3   :  { %v1907_v50 = vadd.f32 %v1906_v52, %v6471_v23  ;;  %v5179_v52 = vor.u32 %v5724_v6, %v5176_v7 }
 0x2d4   :  { %v2099_v46 = vmax.f32 %v2049_v4, 0.0  ;;  %3071 = vmatmul.bf16.gmra.mxu2 %v6442_v38 }
 0x2d5   :  { %v1956_v51 = vadd.f32 %v1955_v55, %v1907_v50  ;;  %3249 = vmatpush.bf16.msra.mxu2 %v5179_v52  ;;  %v5304_v50 = vld [vmem:[#allocation4 + $0x350] sm:$0xf0]  ;;  %v5652_v52 = vld [vmem:[#allocation4 + $0x4] sm:$0xf] }
 0x2d6   :  { %v6498_v61 = vpack.c.bf16 %v2099_v46, %v2095_v39 }
 0x2d7   :  { %v2002_v1 = vpop.f32.mrf.mxu2  ;;  %v2051_v18 = vpop.f32.mrf.mxu3 }
 0x2d8   :  { %3115 = vmatmul.bf16.gmra.mxu3 %v6498_v61  ;;  %v2003_v28 = vadd.f32 %v2002_v1, %v1954_v24  ;;  %v4920_v1 = vld [vmem:[#allocation4 + $0x50] sm:$0xf0]  ;;  %v5756_v24 = vld [vmem:[#allocation4 + $0x344] sm:$0xf] }
 0x2d9   :  { %v4923_v49 = vor.u32 %v5660_v62, %v4920_v1  ;;  %v5307_v26 = vor.u32 %v5756_v24, %v5304_v50  ;;  %v5016_v62 = vld [vmem:[#allocation4 + $0x110] sm:$0xf0] }
 0x2da   :  { %v1909_v20 = vpop.f32.mrf.mxu0  ;;  %v1958_v21 = vpop.f32.mrf.mxu1  ;;  %v2052_v12 = vadd.f32 %v2051_v18, %v2003_v28  ;;  %v6887_v18 = vld [vmem:[#allocation10_spill] sm:$0xff] }
 0x2db   :  { %v1910_v57 = vadd.f32 %v1909_v20, %v6471_v23  ;;  %v5692_v20 = vld [vmem:[#allocation4 + $0x144] sm:$0xf]  ;;  %3151 = vmatpush.bf16.msra.mxu0 %v4923_v49  ;;  %3298 = vmatpush.bf16.msra.mxu3 %v5307_v26  ;;  %v5288_v26 = vld [vmem:[#allocation4 + $0x330] sm:$0xf0] }
 0x2dc   :  { %v2103_v22 = vmax.f32 %v2052_v12, 0.0  ;;  %v5051_v8 = vor.u32 %v5692_v20, %v5048_v13  ;;  %v4904_v12 = vld [vmem:[#allocation4 + $0x30] sm:$0xf0] }
 0x2dd   :  { %2978 = vmatmul.bf16.gmra.mxu0 %v6886_v54  ;;  %3027 = vmatmul.bf16.gmra.mxu1 %v6378_v43  ;;  %v1959_v55 = vadd.f32 %v1958_v21, %v1910_v57  ;;  %v5160_v57 = vld [vmem:[#allocation4 + $0x230] sm:$0xf0] }
 0x2de   :  { %3200 = vmatpush.bf16.msra.mxu1 %v5051_v8  ;;  %v6888_v13 = vld [vmem:[#allocation11_spill] sm:$0xff] }
 0x2df   :  { %v2004_v63 = vpop.f32.mrf.mxu2  ;;  %v2053_v48 = vpop.f32.mrf.mxu3 }
 0x2e0   :  { %v2005_v11 = vadd.f32 %v2004_v63, %v1956_v51 }
 0x2e2   :  { %v2054_v45 = vadd.f32 %v2053_v48, %v2005_v11  ;;  %v1911_v9 = vpop.f32.mrf.mxu0  ;;  %v1960_v19 = vpop.f32.mrf.mxu1  ;;  %v4907_v11 = vor.u32 %v5656_v0, %v4904_v12 }
 0x2e3   :  { %v1912_v39 = vadd.f32 %v1911_v9, %v6471_v23  ;;  %v5032_v9 = vld [vmem:[#allocation4 + $0x130] sm:$0xf0] }
 0x2e4   :  { %v2107_v25 = vmax.f32 %v2054_v45, 0.0  ;;  %3076 = vmatmul.bf16.gmra.mxu2 %v6450_v31  ;;  %v5688_v45 = vld [vmem:[#allocation4 + $0x124] sm:$0xf]  ;;  %3152 = vmatpush.bf16.msra.mxu0 %v4907_v11 }
 0x2e5   :  { %v1961_v28 = vadd.f32 %v1960_v19, %v1912_v39  ;;  %v5035_v6 = vor.u32 %v5688_v45, %v5032_v9  ;;  %v5684_v39 = vld [vmem:[#allocation4 + $0x104] sm:$0xf] }
 0x2e6   :  { %v6506_v35 = vpack.c.bf16 %v2107_v25, %v2103_v22  ;;  %v5720_v25 = vld [vmem:[#allocation4 + $0x224] sm:$0xf]  ;;  %v5019_v50 = vor.u32 %v5684_v39, %v5016_v62  ;;  %v6890_v62 = vld [vmem:[#allocation12_spill] sm:$0xff] }
 0x2e7   :  { %v2007_v30 = vpop.f32.mrf.mxu2  ;;  %v2056_v4 = vpop.f32.mrf.mxu3  ;;  %3201 = vmatpush.bf16.msra.mxu1 %v5035_v6  ;;  %v5748_v6 = vld [vmem:[#allocation4 + $0x304] sm:$0xf] }
 0x2e8   :  { %3120 = vmatmul.bf16.gmra.mxu3 %v6506_v35  ;;  %v2008_v16 = vadd.f32 %v2007_v30, %v1959_v55  ;;  %v4888_v55 = vld [vmem:[#allocation4 + $0x10] sm:$0xf0] }
 0x2ea   :  { %v1914_v46 = vpop.f32.mrf.mxu0  ;;  %v1963_v53 = vpop.f32.mrf.mxu1  ;;  %v2057_v42 = vadd.f32 %v2056_v4, %v2008_v16  ;;  %v5163_v4 = vor.u32 %v5720_v25, %v5160_v57  ;;  %v4891_v16 = vor.u32 %v5652_v52, %v4888_v55 }
 0x2eb   :  { %v1915_v19 = vadd.f32 %v1914_v46, %v6471_v23  ;;  %3202 = vmatpush.bf16.msra.mxu1 %v5019_v50 }
 0x2ec   :  { %v2111_v63 = vmax.f32 %v2057_v42, 0.0  ;;  %3250 = vmatpush.bf16.msra.mxu2 %v5163_v4  ;;  %3153 = vmatpush.bf16.msra.mxu0 %v4891_v16  ;;  %v5716_v42 = vld [vmem:[#allocation4 + $0x204] sm:$0xf] }
 0x2ed   :  { %2983 = vmatmul.bf16.gmra.mxu0 %v6887_v18  ;;  %3032 = vmatmul.bf16.gmra.mxu1 %v6386_v15  ;;  %v1964_v1 = vadd.f32 %v1963_v53, %v1915_v19 }
 0x2ef   :  { %v2009_v33 = vpop.f32.mrf.mxu2  ;;  %v2058_v21 = vpop.f32.mrf.mxu3 }
 0x2f0   :  { %v2010_v60 = vadd.f32 %v2009_v33, %v1961_v28  ;;  %v5752_v28 = vld [vmem:[#allocation4 + $0x324] sm:$0xf] }
 0x2f1   :  { %v6889_v33 = vld [vmem:[#allocation13_spill] sm:$0xff] }
 0x2f2   :  { %v2059_v51 = vadd.f32 %v2058_v21, %v2010_v60  ;;  %v1916_v10 = vpop.f32.mrf.mxu0  ;;  %v1965_v59 = vpop.f32.mrf.mxu1  ;;  %v5291_v21 = vor.u32 %v5752_v28, %v5288_v26  ;;  %v5144_v60 = vld [vmem:[#allocation4 + $0x210] sm:$0xf0] }
 0x2f3   :  { %v1917_v46 = vadd.f32 %v1916_v10, %v6471_v23  ;;  %v5147_v10 = vor.u32 %v5716_v42, %v5144_v60  ;;  %v6532_v42 = vld [vmem:[%s6872_s6] sm:$0xf]  ;;  %v5262_v60 = vld [vmem:[#allocation4 + $0x2e8] sm:$0xf] }
 0x2f4   :  { %v2115_v48 = vmax.f32 %v2059_v51, 0.0  ;;  %3081 = vmatmul.bf16.gmra.mxu2 %v6458_v36  ;;  %3299 = vmatpush.bf16.msra.mxu3 %v5291_v21 }
 0x2f5   :  { %v1966_v8 = vadd.f32 %v1965_v59, %v1917_v46  ;;  %3251 = vmatpush.bf16.msra.mxu2 %v5147_v10 }
 0x2f6   :  { %v6514_v22 = vpack.c.bf16 %v2115_v48, %v2111_v63 }
 0x2f7   :  { %v2012_v7 = vpop.f32.mrf.mxu2  ;;  %v2061_v30 = vpop.f32.mrf.mxu3 }
 0x2f8   :  { %3125 = vmatmul.bf16.gmra.mxu3 %v6514_v22  ;;  %v2013_v20 = vadd.f32 %v2012_v7, %v1964_v1  ;;  %v5272_v7 = vld [vmem:[#allocation4 + $0x310] sm:$0xf0] }
 0x2fa   :  { %v1919_v49 = vpop.f32.mrf.mxu0  ;;  %v1968_v24 = vpop.f32.mrf.mxu1  ;;  %v2062_v63 = vadd.f32 %v2061_v30, %v2013_v20  ;;  %v5275_v30 = vor.u32 %v5748_v6, %v5272_v7  ;;  %v5715_v6 = vld [vmem:[#allocation4 + $0x1f4] sm:$0xf0] }
 0x2fb   :  { %v1920_v19 = vadd.f32 %v1919_v49, %v6471_v23 }
 0x2fc   :  { %v2119_v45 = vmax.f32 %v2062_v63, 0.0  ;;  %3300 = vmatpush.bf16.msra.mxu3 %v5275_v30 }
 0x2fd   :  { %2988 = vmatmul.bf16.gmra.mxu0 %v6888_v13  ;;  %3037 = vmatmul.bf16.gmra.mxu1 %v6889_v33  ;;  %v1969_v4 = vadd.f32 %v1968_v24, %v1920_v19 }
 0x2ff   :  { %v2014_v51 = vpop.f32.mrf.mxu2  ;;  %v2063_v53 = vpop.f32.mrf.mxu3 }
 0x300   :  { %v2015_v48 = vadd.f32 %v2014_v51, %v1966_v8  ;;  %v5747_v51 = vld [vmem:[#allocation4 + $0x2f4] sm:$0xf0] }
 0x301   :  { %v5263_v63 = vor.u32 %v5747_v51, %v5262_v60 }
 0x302   :  { %v2064_v0 = vadd.f32 %v2063_v53, %v2015_v48  ;;  %v1921_v12 = vpop.f32.mrf.mxu0  ;;  %v1970_v11 = vpop.f32.mrf.mxu1 }
 0x303   :  { %v1922_v52 = vadd.f32 %v1921_v12, %v6471_v23  ;;  %v6538_v12 = vperm.slane %v6532_v42, 0  ;;  %3440 = vmatpush.bf16.msrb.mxu2 %v5263_v63 }
 0x304   :  { %v2123_v9 = vmax.f32 %v2064_v0, 0.0  ;;  %3086 = vmatmul.bf16.gmra.mxu2 %v6466_v34 }
 0x305   :  { %v1971_v1 = vadd.f32 %v1970_v11, %v1922_v52  ;;  %v5006_v11 = vld [vmem:[#allocation4 + $0xe8] sm:$0xf] }
 0x306   :  { %v6522_v25 = vpack.c.bf16 %v2123_v9, %v2119_v45  ;;  %v5683_v45 = vld [vmem:[#allocation4 + $0xf4] sm:$0xf0]  ;;  %v5390_v9 = vld [vmem:[#allocation4 + $0x3e8] sm:$0xf] }
 0x307   :  { %v2017_v59 = vpop.f32.mrf.mxu2  ;;  %v2066_v57 = vpop.f32.mrf.mxu3  ;;  %v5007_v19 = vor.u32 %v5683_v45, %v5006_v11 }
 0x308   :  { %3130 = vmatmul.bf16.gmra.mxu3 %v6522_v25  ;;  %v2018_v16 = vadd.f32 %v2017_v59, %v1969_v4  ;;  %v5779_v59 = vld [vmem:[#allocation4 + $0x3f4] sm:$0xf0] }
 0x309   :  { %3342 = vmatpush.bf16.msrb.mxu0 %v5007_v19 }
 0x30a   :  { %v1924_v55 = vpop.f32.mrf.mxu0  ;;  %v1973_v39 = vpop.f32.mrf.mxu1  ;;  %v2067_v50 = vadd.f32 %v2066_v57, %v2018_v16  ;;  %v5134_v57 = vld [vmem:[#allocation4 + $0x1e8] sm:$0xf] }
 0x30b   :  { %v1925_v53 = vadd.f32 %v1924_v55, %v6471_v23  ;;  %v5391_v55 = vor.u32 %v5779_v59, %v5390_v9  ;;  %v5135_v16 = vor.u32 %v5715_v6, %v5134_v57  ;;  %v4990_v9 = vld [vmem:[#allocation4 + $0xc8] sm:$0xf]  ;;  %v5679_v59 = vld [vmem:[#allocation4 + $0xd4] sm:$0xf0] }
 0x30c   :  { %v2127_v8 = vmax.f32 %v2067_v50, 0.0  ;;  %v5374_v57 = vld [vmem:[#allocation4 + $0x3c8] sm:$0xf]  ;;  %v5775_v6 = vld [vmem:[#allocation4 + $0x3d4] sm:$0xf0] }
 0x30d   :  { %2993 = vmatmul.bf16.gmra.mxu0 %v6890_v62  ;;  %3042 = vmatmul.bf16.gmra.mxu1 %v6410_v27  ;;  %v1974_v7 = vadd.f32 %v1973_v39, %v1925_v53 }
 0x30e   :  { %3489 = vmatpush.bf16.msrb.mxu3 %v5391_v55  ;;  %3391 = vmatpush.bf16.msrb.mxu1 %v5135_v16  ;;  %v5118_v55 = vld [vmem:[#allocation4 + $0x1c8] sm:$0xf]  ;;  %v5711_v16 = vld [vmem:[#allocation4 + $0x1d4] sm:$0xf0] }
 0x30f   :  { %v2019_v46 = vpop.f32.mrf.mxu2  ;;  %v2068_v49 = vpop.f32.mrf.mxu3 }
 0x310   :  { %v2020_v20 = vadd.f32 %v2019_v46, %v1971_v1 }
 0x312   :  { %v2069_v28 = vadd.f32 %v2068_v49, %v2020_v20  ;;  %v1926_v26 = vpop.f32.mrf.mxu0  ;;  %v1975_v21 = vpop.f32.mrf.mxu1 }
 0x313   :  { %v1927_v30 = vadd.f32 %v1926_v26, %v6471_v23 }
 0x314   :  { %v2131_v24 = vmax.f32 %v2069_v28, 0.0  ;;  %3091 = vmatmul.bf16.gmra.mxu2 %v6475_v5 }
 0x315   :  { %v1976_v50 = vadd.f32 %v1975_v21, %v1927_v30  ;;  %v5246_v21 = vld [vmem:[#allocation4 + $0x2c8] sm:$0xf] }
 0x316   :  { %v6535_v10 = vpack.c.bf16 %v2131_v24, %v2127_v8 }
 0x317   :  { %v2022_v48 = vpop.f32.mrf.mxu2  ;;  %v2071_v0 = vpop.f32.mrf.mxu3 }
 0x318   :  { %3135 = vmatmul.bf16.gmra.mxu3 %v6535_v10  ;;  %v2023_v46 = vadd.f32 %v2022_v48, %v1974_v7 }
 0x31a   :  { %v2959_v4 = vpop.f32.mrf.mxu0  ;;  %v3008_v52 = vpop.f32.mrf.mxu1  ;;  %v2072_v39 = vadd.f32 %v2071_v0, %v2023_v46  ;;  %v5743_v0 = vld [vmem:[#allocation4 + $0x2d4] sm:$0xf0]  ;;  %v5119_v46 = vor.u32 %v5711_v16, %v5118_v55 }
 0x31b   :  { %v2960_v1 = vadd.f32 %v2959_v4, %v6538_v12  ;;  %v5247_v19 = vor.u32 %v5743_v0, %v5246_v21  ;;  %v4991_v4 = vor.u32 %v5679_v59, %v4990_v9  ;;  %v5675_v21 = vld [vmem:[#allocation4 + $0xb4] sm:$0xf0]  ;;  %v5358_v0 = vld [vmem:[#allocation4 + $0x3a8] sm:$0xf] }
 0x31c   :  { %v2135_v51 = vmax.f32 %v2072_v39, 0.0  ;;  %3392 = vmatpush.bf16.msrb.mxu1 %v5119_v46  ;;  %v5707_v59 = vld [vmem:[#allocation4 + $0x1b4] sm:$0xf0] }
 0x31d   :  { %v3009_v49 = vadd.f32 %v3008_v52, %v2960_v1  ;;  %3154 = vmatmul.bf16.vlgmr.msra.gmra.mxu0 %v6279_v3  ;;  %3203 = vmatmul.bf16.vlgmr.msra.gmra.mxu1 %v6346_v17  ;;  %v5375_v52 = vor.u32 %v5775_v6, %v5374_v57 }
 0x31e   :  { %3441 = vmatpush.bf16.msrb.mxu2 %v5247_v19  ;;  %3343 = vmatpush.bf16.msrb.mxu0 %v4991_v4  ;;  %v5102_v19 = vld [vmem:[#allocation4 + $0x1a8] sm:$0xf] }
 0x31f   :  { %v2024_v20 = vpop.f32.mrf.mxu2  ;;  %v2073_v23 = vpop.f32.mrf.mxu3  ;;  %3490 = vmatpush.bf16.msrb.mxu3 %v5375_v52 }
 0x320   :  { %v2025_v28 = vadd.f32 %v2024_v20, %v1976_v50 }
 0x322   :  { %v2074_v26 = vadd.f32 %v2073_v23, %v2025_v28  ;;  %v2961_v8 = vpop.f32.mrf.mxu0  ;;  %v3010_v24 = vpop.f32.mrf.mxu1 }
 0x323   :  { %v2962_v60 = vadd.f32 %v2961_v8, %v6538_v12  ;;  %v5230_v8 = vld [vmem:[#allocation4 + $0x2a8] sm:$0xf] }
 0x324   :  { %v2139_v53 = vmax.f32 %v2074_v26, 0.0  ;;  %3252 = vmatmul.bf16.vlgmr.msra.gmra.mxu2 %v6418_v58 }
 0x325   :  { %v3011_v63 = vadd.f32 %v3010_v24, %v2962_v60  ;;  %v5739_v24 = vld [vmem:[#allocation4 + $0x2b4] sm:$0xf0] }
 0x326   :  { %v6547_v48 = vpack.c.bf16 %v2139_v53, %v2135_v51  ;;  %v5231_v51 = vor.u32 %v5739_v24, %v5230_v8 }
 0x327   :  { %v3057_v11 = vpop.f32.mrf.mxu2 }
 0x328   :  { %v3058_v45 = vadd.f32 %v3057_v11, %v3009_v49  ;;  %3140 = vmatmul.bf16.gmra.mxu3 %v6547_v48  ;;  %v4974_v11 = vld [vmem:[#allocation4 + $0xa8] sm:$0xf]  ;;  %3442 = vmatpush.bf16.msrb.mxu2 %v5231_v51  ;;  %v5735_v51 = vld [vmem:[#allocation4 + $0x294] sm:$0xf0] }
 0x329   :  { %v4975_v9 = vor.u32 %v5675_v21, %v4974_v11 }
 0x32a   :  { %v2964_v7 = vpop.f32.mrf.mxu0  ;;  %v3013_v30 = vpop.f32.mrf.mxu1 }
 0x32b   :  { %v2965_v1 = vadd.f32 %v2964_v7, %v6538_v12  ;;  %3344 = vmatpush.bf16.msrb.mxu0 %v4975_v9 }
 0x32d   :  { %v3014_v49 = vadd.f32 %v3013_v30, %v2965_v1  ;;  %3159 = vmatmul.bf16.gmra.mxu0 %v6287_v47  ;;  %3208 = vmatmul.bf16.gmra.mxu1 %v6354_v44  ;;  %v5103_v30 = vor.u32 %v5707_v59, %v5102_v19  ;;  %v5342_v19 = vld [vmem:[#allocation4 + $0x388] sm:$0xf] }
 0x32f   :  { %v3059_v50 = vpop.f32.mrf.mxu2  ;;  %3393 = vmatpush.bf16.msrb.mxu1 %v5103_v30 }
 0x330   :  { %v3060_v20 = vadd.f32 %v3059_v50, %v3011_v63  ;;  %v5771_v63 = vld [vmem:[#allocation4 + $0x3b4] sm:$0xf0] }
 0x331   :  { %v5359_v7 = vor.u32 %v5771_v63, %v5358_v0  ;;  %v5671_v63 = vld [vmem:[#allocation4 + $0x94] sm:$0xf0] }
 0x332   :  { %v2966_v39 = vpop.f32.mrf.mxu0  ;;  %v3015_v28 = vpop.f32.mrf.mxu1 }
 0x333   :  { %v2967_v23 = vadd.f32 %v2966_v39, %v6538_v12  ;;  %3491 = vmatpush.bf16.msrb.mxu3 %v5359_v7 }
 0x334   :  { %3257 = vmatmul.bf16.gmra.mxu2 %v6426_v40 }
 0x335   :  { %v3016_v26 = vadd.f32 %v3015_v28, %v2967_v23 }
 0x337   :  { %v3062_v60 = vpop.f32.mrf.mxu2 }
 0x338   :  { %v3063_v53 = vadd.f32 %v3062_v60, %v3014_v49  ;;  %3301 = vmatmul.bf16.vlgmr.msra.gmra.mxu3 %v6482_v29  ;;  %v5214_v60 = vld [vmem:[#allocation4 + $0x288] sm:$0xf] }
 0x339   :  { %v5215_v21 = vor.u32 %v5735_v51, %v5214_v60 }
 0x33a   :  { %v2969_v57 = vpop.f32.mrf.mxu0  ;;  %v3018_v6 = vpop.f32.mrf.mxu1 }
 0x33b   :  { %v2970_v4 = vadd.f32 %v2969_v57, %v6538_v12  ;;  %v3106_v52 = vpop.f32.mrf.mxu3  ;;  %3443 = vmatpush.bf16.msrb.mxu2 %v5215_v21  ;;  %v5086_v57 = vld [vmem:[#allocation4 + $0x188] sm:$0xf] }
 0x33c   :  { %v3107_v55 = vadd.f32 %v3106_v52, %v3058_v45  ;;  %v5198_v21 = vld [vmem:[#allocation4 + $0x268] sm:$0xf] }
 0x33d   :  { %v3019_v16 = vadd.f32 %v3018_v6, %v2970_v4  ;;  %3164 = vmatmul.bf16.gmra.mxu0 %v6295_v56  ;;  %3213 = vmatmul.bf16.gmra.mxu1 %v6362_v32  ;;  %v5703_v6 = vld [vmem:[#allocation4 + $0x194] sm:$0xf0] }
 0x33e   :  { %v3734_v24 = vmax.f32 %v3107_v55, 0.0  ;;  %v5087_v52 = vor.u32 %v5703_v6, %v5086_v57  ;;  %v5326_v57 = vld [vmem:[#allocation4 + $0x368] sm:$0xf] }
 0x33f   :  { %v3064_v1 = vpop.f32.mrf.mxu2 }
 0x340   :  { %v3065_v46 = vadd.f32 %v3064_v1, %v3016_v26  ;;  %v4958_v26 = vld [vmem:[#allocation4 + $0x88] sm:$0xf]  ;;  %3394 = vmatpush.bf16.msrb.mxu1 %v5087_v52 }
 0x341   :  { %v4959_v59 = vor.u32 %v5671_v63, %v4958_v26  ;;  %v5731_v26 = vld [vmem:[#allocation4 + $0x274] sm:$0xf0] }
 0x342   :  { %v2971_v49 = vpop.f32.mrf.mxu0  ;;  %v3020_v50 = vpop.f32.mrf.mxu1 }
 0x343   :  { %v2972_v39 = vadd.f32 %v2971_v49, %v6538_v12  ;;  %v3108_v28 = vpop.f32.mrf.mxu3  ;;  %3345 = vmatpush.bf16.msrb.mxu0 %v4959_v59 }
 0x344   :  { %v3109_v23 = vadd.f32 %v3108_v28, %v3060_v20  ;;  %3262 = vmatmul.bf16.gmra.mxu2 %v6434_v14  ;;  %v5767_v20 = vld [vmem:[#allocation4 + $0x394] sm:$0xf0] }
 0x345   :  { %v3021_v8 = vadd.f32 %v3020_v50, %v2972_v39  ;;  %v5343_v4 = vor.u32 %v5767_v20, %v5342_v19  ;;  %v5199_v19 = vor.u32 %v5731_v26, %v5198_v21  ;;  %v4942_v20 = vld [vmem:[#allocation4 + $0x68] sm:$0xf] }
 0x346   :  { %v3738_v45 = vmax.f32 %v3109_v23, 0.0 }
 0x347   :  { %v3067_v11 = vpop.f32.mrf.mxu2  ;;  %3492 = vmatpush.bf16.msrb.mxu3 %v5343_v4  ;;  %3444 = vmatpush.bf16.msrb.mxu2 %v5199_v19  ;;  %v5699_v4 = vld [vmem:[#allocation4 + $0x174] sm:$0xf0] }
 0x348   :  { %v6561_v0 = vpack.c.bf16 %v3738_v45, %v3734_v24  ;;  %v3068_v9 = vadd.f32 %v3067_v11, %v3019_v16  ;;  %3306 = vmatmul.bf16.gmra.mxu3 %v6490_v37 }
 0x34a   :  { %v2974_v7 = vpop.f32.mrf.mxu0  ;;  %v3023_v30 = vpop.f32.mrf.mxu1 }
 0x34b   :  { %v2975_v55 = vadd.f32 %v2974_v7, %v6538_v12  ;;  %v3111_v1 = vpop.f32.mrf.mxu3 }
 0x34c   :  { %v3112_v49 = vadd.f32 %v3111_v1, %v3063_v53 }
 0x34d   :  { %v3024_v16 = vadd.f32 %v3023_v30, %v2975_v55  ;;  %3169 = vmatmul.bf16.gmra.mxu0 %v6303_v2  ;;  %3218 = vmatmul.bf16.gmra.mxu1 %v6370_v41  ;;  %v5070_v30 = vld [vmem:[#allocation4 + $0x168] sm:$0xf] }
 0x34e   :  { %v3742_v11 = vmax.f32 %v3112_v49, 0.0  ;;  %v5071_v49 = vor.u32 %v5699_v4, %v5070_v30  ;;  %v5663_v30 = vld [vmem:[#allocation4 + $0x54] sm:$0xf0]  ;;  %v5310_v4 = vld [vmem:[#allocation4 + $0x348] sm:$0xf] }
 0x34f   :  { %v3069_v50 = vpop.f32.mrf.mxu2 }
 0x350   :  { %v3070_v39 = vadd.f32 %v3069_v50, %v3021_v8  ;;  %v5667_v8 = vld [vmem:[#allocation4 + $0x74] sm:$0xf0]  ;;  %3395 = vmatpush.bf16.msrb.mxu1 %v5071_v49 }
 0x351   :  { %v4943_v7 = vor.u32 %v5667_v8, %v4942_v20  ;;  %v5182_v20 = vld [vmem:[#allocation4 + $0x248] sm:$0xf]  ;;  %v5727_v8 = vld [vmem:[#allocation4 + $0x254] sm:$0xf0] }
 0x352   :  { %v2976_v28 = vpop.f32.mrf.mxu0  ;;  %v3025_v23 = vpop.f32.mrf.mxu1  ;;  %v5695_v49 = vld [vmem:[#allocation4 + $0x154] sm:$0xf0] }
 0x353   :  { %v2977_v24 = vadd.f32 %v2976_v28, %v6538_v12  ;;  %v3113_v45 = vpop.f32.mrf.mxu3  ;;  %3346 = vmatpush.bf16.msrb.mxu0 %v4943_v7  ;;  %v5183_v7 = vor.u32 %v5727_v8, %v5182_v20 }
 0x354   :  { %v3114_v60 = vadd.f32 %v3113_v45, %v3065_v46  ;;  %3267 = vmatmul.bf16.gmra.mxu2 %v6442_v38  ;;  %v5763_v46 = vld [vmem:[#allocation4 + $0x374] sm:$0xf0] }
 0x355   :  { %v3026_v51 = vadd.f32 %v3025_v23, %v2977_v24  ;;  %v5327_v1 = vor.u32 %v5763_v46, %v5326_v57  ;;  %3445 = vmatpush.bf16.msrb.mxu2 %v5183_v7  ;;  %v4910_v7 = vld [vmem:[#allocation4 + $0x28] sm:$0xf] }
 0x356   :  { %v3746_v53 = vmax.f32 %v3114_v60, 0.0 }
 0x357   :  { %v3072_v63 = vpop.f32.mrf.mxu2  ;;  %3493 = vmatpush.bf16.msrb.mxu3 %v5327_v1  ;;  %v5054_v1 = vld [vmem:[#allocation4 + $0x148] sm:$0xf] }
 0x358   :  { %v3073_v59 = vadd.f32 %v3072_v63, %v3024_v16  ;;  %3311 = vmatmul.bf16.gmra.mxu3 %v6498_v61  ;;  %v6570_v6 = vpack.c.bf16 %v3746_v53, %v3742_v11 }
 0x35a   :  { %v2979_v52 = vpop.f32.mrf.mxu0  ;;  %v3028_v55 = vpop.f32.mrf.mxu1 }
 0x35b   :  { %v2980_v50 = vadd.f32 %v2979_v52, %v6538_v12  ;;  %v3116_v28 = vpop.f32.mrf.mxu3 }
 0x35c   :  { %v3117_v16 = vadd.f32 %v3116_v28, %v3068_v9 }
 0x35d   :  { %v3029_v23 = vadd.f32 %v3028_v55, %v2980_v50  ;;  %3174 = vmatmul.bf16.gmra.mxu0 %v6886_v54  ;;  %3223 = vmatmul.bf16.gmra.mxu1 %v6378_v43  ;;  %v5759_v55 = vld [vmem:[#allocation4 + $0x354] sm:$0xf0] }
 0x35e   :  { %v3750_v19 = vmax.f32 %v3117_v16, 0.0  ;;  %v5311_v16 = vor.u32 %v5759_v55, %v5310_v4 }
 0x35f   :  { %v3074_v24 = vpop.f32.mrf.mxu2 }
 0x360   :  { %v3075_v45 = vadd.f32 %v3074_v24, %v3026_v51  ;;  %v4926_v51 = vld [vmem:[#allocation4 + $0x48] sm:$0xf]  ;;  %v5055_v24 = vor.u32 %v5695_v49, %v5054_v1  ;;  %3494 = vmatpush.bf16.msrb.mxu3 %v5311_v16 }
 0x361   :  { %v5166_v49 = vld [vmem:[#allocation4 + $0x228] sm:$0xf] }
 0x362   :  { %v2981_v60 = vpop.f32.mrf.mxu0  ;;  %v3030_v11 = vpop.f32.mrf.mxu1  ;;  %3396 = vmatpush.bf16.msrb.mxu1 %v5055_v24 }
 0x363   :  { %v2982_v53 = vadd.f32 %v2981_v60, %v6538_v12  ;;  %v3118_v21 = vpop.f32.mrf.mxu3 }
 0x364   :  { %v3119_v26 = vadd.f32 %v3118_v21, %v3070_v39  ;;  %3272 = vmatmul.bf16.gmra.mxu2 %v6450_v31  ;;  %v4927_v39 = vor.u32 %v5663_v30, %v4926_v51  ;;  %v5659_v51 = vld [vmem:[#allocation4 + $0x34] sm:$0xf0] }
 0x365   :  { %v3031_v63 = vadd.f32 %v3030_v11, %v2982_v53  ;;  %v4911_v4 = vor.u32 %v5659_v51, %v4910_v7 }
 0x366   :  { %v3754_v9 = vmax.f32 %v3119_v26, 0.0  ;;  %3347 = vmatpush.bf16.msrb.mxu0 %v4927_v39  ;;  %v5691_v39 = vld [vmem:[#allocation4 + $0x134] sm:$0xf0] }
 0x367   :  { %v3077_v57 = vpop.f32.mrf.mxu2 }
 0x368   :  { %v6577_v46 = vadd.f32 %v3077_v57, %v3029_v23  ;;  %3316 = vmatmul.bf16.gmra.mxu3 %v6506_v35  ;;  %v6580_v52 = vpack.c.bf16 %v3754_v9, %v3750_v19 }
 0x36a   :  { %v2984_v50 = vpop.f32.mrf.mxu0  ;;  %v3033_v28 = vpop.f32.mrf.mxu1  ;;  %3348 = vmatpush.bf16.msrb.mxu0 %v4911_v4 }
 0x36b   :  { %v2985_v60 = vadd.f32 %v2984_v50, %v6538_v12  ;;  %v3121_v23 = vpop.f32.mrf.mxu3  ;;  %v5723_v50 = vld [vmem:[#allocation4 + $0x234] sm:$0xf0] }
 0x36c   :  { %v3122_v11 = vadd.f32 %v3121_v23, %v3073_v59  ;;  %v5038_v59 = vld [vmem:[#allocation4 + $0x128] sm:$0xf]  ;;  %v5167_v16 = vor.u32 %v5723_v50, %v5166_v49 }
 0x36d   :  { %v3034_v53 = vadd.f32 %v3033_v28, %v2985_v60  ;;  %3179 = vmatmul.bf16.gmra.mxu0 %v6887_v18  ;;  %3228 = vmatmul.bf16.gmra.mxu1 %v6386_v15  ;;  %v5039_v28 = vor.u32 %v5691_v39, %v5038_v59  ;;  %v5755_v60 = vld [vmem:[#allocation4 + $0x334] sm:$0xf0]  ;;  %v4894_v23 = vld [vmem:[#allocation4 + $0x8] sm:$0xf] }
 0x36e   :  { %v3758_v55 = vmax.f32 %v3122_v11, 0.0  ;;  %3446 = vmatpush.bf16.msrb.mxu2 %v5167_v16  ;;  %v5022_v11 = vld [vmem:[#allocation4 + $0x108] sm:$0xf] }
 0x36f   :  { %v3079_v21 = vpop.f32.mrf.mxu2  ;;  %3397 = vmatpush.bf16.msrb.mxu1 %v5039_v28 }
 0x370   :  { %v3080_v26 = vadd.f32 %v3079_v21, %v3031_v63 }
 0x372   :  { %v2986_v19 = vpop.f32.mrf.mxu0  ;;  %v3035_v9 = vpop.f32.mrf.mxu1 }
 0x373   :  { %v2987_v20 = vadd.f32 %v2986_v19, %v6538_v12  ;;  %v3123_v8 = vpop.f32.mrf.mxu3 }
 0x374   :  { %v3124_v57 = vadd.f32 %v3123_v8, %v3075_v45  ;;  %3277 = vmatmul.bf16.gmra.mxu2 %v6458_v36  ;;  %v5294_v45 = vld [vmem:[#allocation4 + $0x328] sm:$0xf] }
 0x375   :  { %v3036_v30 = vadd.f32 %v3035_v9, %v2987_v20  ;;  %v5295_v19 = vor.u32 %v5755_v60, %v5294_v45  ;;  %v5655_v9 = vld [vmem:[#allocation4 + $0x14] sm:$0xf0] }
 0x376   :  { %v3762_v1 = vmax.f32 %v3124_v57, 0.0  ;;  %v5687_v20 = vld [vmem:[#allocation4 + $0x114] sm:$0xf0]  ;;  %v4895_v7 = vor.u32 %v5655_v9, %v4894_v23 }
 0x377   :  { %v3082_v63 = vpop.f32.mrf.mxu2  ;;  %v5023_v51 = vor.u32 %v5687_v20, %v5022_v11  ;;  %3495 = vmatpush.bf16.msrb.mxu3 %v5295_v19 }
 0x378   :  { %v3083_v24 = vadd.f32 %v3082_v63, %v3034_v53  ;;  %3321 = vmatmul.bf16.gmra.mxu3 %v6514_v22  ;;  %v6588_v21 = vpack.c.bf16 %v3762_v1, %v3758_v55  ;;  %3349 = vmatpush.bf16.msrb.mxu0 %v4895_v7  ;;  %v5150_v55 = vld [vmem:[#allocation4 + $0x208] sm:$0xf]  ;;  %v5719_v1 = vld [vmem:[#allocation4 + $0x214] sm:$0xf0] }
 0x379   :  { %3398 = vmatpush.bf16.msrb.mxu1 %v5023_v51  ;;  %v5151_v50 = vor.u32 %v5719_v1, %v5150_v55 }
 0x37a   :  { %6891 = vst [vmem:[#allocation9_spill] sm:$0xff] %v6588_v21  ;;  %v2989_v8 = vpop.f32.mrf.mxu0  ;;  %v3038_v57 = vpop.f32.mrf.mxu1 }
 0x37b   :  { %v2990_v59 = vadd.f32 %v2989_v8, %v6538_v12  ;;  %v3126_v53 = vpop.f32.mrf.mxu3  ;;  %3447 = vmatpush.bf16.msrb.mxu2 %v5151_v50  ;;  %v5278_v8 = vld [vmem:[#allocation4 + $0x308] sm:$0xf] }
 0x37c   :  { %v3127_v4 = vadd.f32 %v3126_v53, %v6577_v46 }
 0x37d   :  { %v3039_v39 = vadd.f32 %v3038_v57, %v2990_v59  ;;  %3184 = vmatmul.bf16.gmra.mxu0 %v6888_v13  ;;  %3233 = vmatmul.bf16.gmra.mxu1 %v6889_v33  ;;  %v5751_v57 = vld [vmem:[#allocation4 + $0x314] sm:$0xf0] }
 0x37e   :  { %v3766_v19 = vmax.f32 %v3127_v4, 0.0 }
 0x37f   :  { %v3084_v49 = vpop.f32.mrf.mxu2 }
 0x380   :  { %v3085_v28 = vadd.f32 %v3084_v49, %v3036_v30  ;;  %v5279_v30 = vor.u32 %v5751_v57, %v5278_v8  ;;  %v6605_v8 = vperm.slane %v6532_v42, 1 }
 0x382   :  { %v2991_v63 = vpop.f32.mrf.mxu0  ;;  %v3040_v16 = vpop.f32.mrf.mxu1  ;;  %3496 = vmatpush.bf16.msrb.mxu3 %v5279_v30 }
 0x383   :  { %v2992_v45 = vadd.f32 %v2991_v63, %v6538_v12  ;;  %v3128_v60 = vpop.f32.mrf.mxu3 }
 0x384   :  { %v3129_v23 = vadd.f32 %v3128_v60, %v3080_v26  ;;  %3282 = vmatmul.bf16.gmra.mxu2 %v6466_v34 }
 0x385   :  { %v3041_v46 = vadd.f32 %v3040_v16, %v2992_v45 }
 0x386   :  { %v3770_v9 = vmax.f32 %v3129_v23, 0.0 }
 0x387   :  { %v3087_v11 = vpop.f32.mrf.mxu2 }
 0x388   :  { %v3088_v20 = vadd.f32 %v3087_v11, %v3039_v39  ;;  %3326 = vmatmul.bf16.gmra.mxu3 %v6522_v25  ;;  %v6597_v7 = vpack.c.bf16 %v3770_v9, %v3766_v19  ;;  %v5745_v9 = vld [vmem:[#allocation4 + $0x2ec] sm:$0xf] }
 0x38a   :  { %6892 = vst [vmem:[#allocation10_spill] sm:$0xff] %v6597_v7  ;;  %v2994_v51 = vpop.f32.mrf.mxu0  ;;  %v3043_v59 = vpop.f32.mrf.mxu1 }
 0x38b   :  { %v2995_v53 = vadd.f32 %v2994_v51, %v6538_v12  ;;  %v3131_v55 = vpop.f32.mrf.mxu3  ;;  %v5008_v51 = vld [vmem:[#allocation4 + $0xf8] sm:$0xf0] }
 0x38c   :  { %v3132_v26 = vadd.f32 %v3131_v55, %v3083_v24  ;;  %v5264_v24 = vld [vmem:[#allocation4 + $0x2f8] sm:$0xf0]  ;;  %v5713_v55 = vld [vmem:[#allocation4 + $0x1ec] sm:$0xf] }
 0x38d   :  { %v3044_v1 = vadd.f32 %v3043_v59, %v2995_v53  ;;  %3189 = vmatmul.bf16.gmra.mxu0 %v6890_v62  ;;  %3238 = vmatmul.bf16.gmra.mxu1 %v6410_v27  ;;  %v5267_v57 = vor.u32 %v5745_v9, %v5264_v24  ;;  %v5392_v53 = vld [vmem:[#allocation4 + $0x3f8] sm:$0xf0] }
 0x38e   :  { %v3774_v23 = vmax.f32 %v3132_v26, 0.0  ;;  %v5136_v26 = vld [vmem:[#allocation4 + $0x1f8] sm:$0xf0] }
 0x38f   :  { %v3089_v4 = vpop.f32.mrf.mxu2  ;;  %3636 = vmatpush.bf16.msra.mxu2 %v5267_v57 }
 0x390   :  { %v3090_v39 = vadd.f32 %v3089_v4, %v3041_v46  ;;  %v5681_v46 = vld [vmem:[#allocation4 + $0xec] sm:$0xf] }
 0x392   :  { %v2996_v49 = vpop.f32.mrf.mxu0  ;;  %v3045_v50 = vpop.f32.mrf.mxu1 }
 0x393   :  { %v2997_v63 = vadd.f32 %v2996_v49, %v6538_v12  ;;  %v3133_v16 = vpop.f32.mrf.mxu3  ;;  %v5777_v12 = vld [vmem:[#allocation4 + $0x3ec] sm:$0xf] }
 0x394   :  { %v3134_v45 = vadd.f32 %v3133_v16, %v3085_v28  ;;  %3287 = vmatmul.bf16.gmra.mxu2 %v6475_v5  ;;  %v5011_v28 = vor.u32 %v5681_v46, %v5008_v51 }
 0x395   :  { %v3046_v60 = vadd.f32 %v3045_v50, %v2997_v63  ;;  %v5395_v50 = vor.u32 %v5777_v12, %v5392_v53  ;;  %v5139_v63 = vor.u32 %v5713_v55, %v5136_v26  ;;  %v5741_v55 = vld [vmem:[#allocation4 + $0x2cc] sm:$0xf]  ;;  %v5248_v26 = vld [vmem:[#allocation4 + $0x2d8] sm:$0xf0] }
 0x396   :  { %v3778_v19 = vmax.f32 %v3134_v45, 0.0  ;;  %3538 = vmatpush.bf16.msra.mxu0 %v5011_v28 }
 0x397   :  { %v3092_v11 = vpop.f32.mrf.mxu2  ;;  %3685 = vmatpush.bf16.msra.mxu3 %v5395_v50  ;;  %3587 = vmatpush.bf16.msra.mxu1 %v5139_v63  ;;  %v4992_v50 = vld [vmem:[#allocation4 + $0xd8] sm:$0xf0]  ;;  %v5773_v63 = vld [vmem:[#allocation4 + $0x3cc] sm:$0xf] }
 0x398   :  { %v3093_v30 = vadd.f32 %v3092_v11, %v3044_v1  ;;  %3331 = vmatmul.bf16.gmra.mxu3 %v6535_v10  ;;  %v6608_v59 = vpack.c.bf16 %v3778_v19, %v3774_v23 }
 0x39a   :  { %6893 = vst [vmem:[#allocation11_spill] sm:$0xff] %v6608_v59  ;;  %v3155_v4 = vpop.f32.mrf.mxu0  ;;  %v3204_v49 = vpop.f32.mrf.mxu1 }
 0x39b   :  { %v3136_v42 = vpop.f32.mrf.mxu3  ;;  %v3156_v16 = vadd.f32 %v3155_v4, %v6605_v8  ;;  %v5677_v4 = vld [vmem:[#allocation4 + $0xcc] sm:$0xf] }
 0x39c   :  { %v3137_v1 = vadd.f32 %v3136_v42, %v3088_v20  ;;  %v5376_v42 = vld [vmem:[#allocation4 + $0x3d8] sm:$0xf0] }
 0x39d   :  { %v3205_v45 = vadd.f32 %v3204_v49, %v3156_v16  ;;  %3350 = vmatmul.bf16.vlgmr.msrb.gmra.mxu0 %v6279_v3  ;;  %3399 = vmatmul.bf16.vlgmr.msrb.gmra.mxu1 %v6346_v17 }
 0x39e   :  { %v3782_v12 = vmax.f32 %v3137_v1, 0.0  ;;  %v5120_v1 = vld [vmem:[#allocation4 + $0x1d8] sm:$0xf0] }
 0x39f   :  { %v3094_v23 = vpop.f32.mrf.mxu2 }
 0x3a0   :  { %v3095_v19 = vadd.f32 %v3094_v23, %v3046_v60  ;;  %v5251_v60 = vor.u32 %v5741_v55, %v5248_v26  ;;  %v4995_v23 = vor.u32 %v5677_v4, %v4992_v50 }
 0x3a2   :  { %v3157_v9 = vpop.f32.mrf.mxu0  ;;  %v3206_v24 = vpop.f32.mrf.mxu1  ;;  %3637 = vmatpush.bf16.msra.mxu2 %v5251_v60  ;;  %3539 = vmatpush.bf16.msra.mxu0 %v4995_v23 }
 0x3a3   :  { %v3138_v11 = vpop.f32.mrf.mxu3  ;;  %v3158_v57 = vadd.f32 %v3157_v9, %v6605_v8  ;;  %v5379_v9 = vor.u32 %v5773_v63, %v5376_v42 }
 0x3a4   :  { %v3139_v46 = vadd.f32 %v3138_v11, %v3090_v39  ;;  %3448 = vmatmul.bf16.vlgmr.msrb.gmra.mxu2 %v6418_v58 }
 0x3a5   :  { %v3207_v51 = vadd.f32 %v3206_v24, %v3158_v57  ;;  %v5709_v24 = vld [vmem:[#allocation4 + $0x1cc] sm:$0xf]  ;;  %3686 = vmatpush.bf16.msra.mxu3 %v5379_v9 }
 0x3a6   :  { %v3786_v20 = vmax.f32 %v3139_v46, 0.0  ;;  %v5123_v57 = vor.u32 %v5709_v24, %v5120_v1  ;;  %v5673_v1 = vld [vmem:[#allocation4 + $0xac] sm:$0xf] }
 0x3a7   :  { %v3253_v28 = vpop.f32.mrf.mxu2 }
 0x3a8   :  { %v3254_v53 = vadd.f32 %v3253_v28, %v3205_v45  ;;  %3336 = vmatmul.bf16.gmra.mxu3 %v6547_v48  ;;  %v6616_v49 = vpack.c.bf16 %v3786_v20, %v3782_v12  ;;  %3588 = vmatpush.bf16.msra.mxu1 %v5123_v57 }
 0x3aa   :  { %6894 = vst [vmem:[#allocation13_spill] sm:$0xff] %v6616_v49  ;;  %v3160_v16 = vpop.f32.mrf.mxu0  ;;  %v3209_v39 = vpop.f32.mrf.mxu1 }
 0x3ab   :  { %v3141_v11 = vpop.f32.mrf.mxu3  ;;  %v3161_v45 = vadd.f32 %v3160_v16, %v6605_v8  ;;  %v5737_v16 = vld [vmem:[#allocation4 + $0x2ac] sm:$0xf] }
 0x3ac   :  { %v3142_v46 = vadd.f32 %v3141_v11, %v3093_v30  ;;  %v5769_v11 = vld [vmem:[#allocation4 + $0x3ac] sm:$0xf] }
 0x3ad   :  { %v3210_v12 = vadd.f32 %v3209_v39, %v3161_v45  ;;  %3355 = vmatmul.bf16.gmra.mxu0 %v6287_v47  ;;  %3404 = vmatmul.bf16.gmra.mxu1 %v6354_v44  ;;  %v5232_v39 = vld [vmem:[#allocation4 + $0x2b8] sm:$0xf0] }
 0x3ae   :  { %v3790_v30 = vmax.f32 %v3142_v46, 0.0  ;;  %v5235_v9 = vor.u32 %v5737_v16, %v5232_v39 }
 0x3af   :  { %v3255_v20 = vpop.f32.mrf.mxu2 }
 0x3b0   :  { %v3256_v28 = vadd.f32 %v3255_v20, %v3207_v51  ;;  %v4976_v51 = vld [vmem:[#allocation4 + $0xb8] sm:$0xf0]  ;;  %3638 = vmatpush.bf16.msra.mxu2 %v5235_v9  ;;  %v5705_v20 = vld [vmem:[#allocation4 + $0x1ac] sm:$0xf] }
 0x3b1   :  { %v4979_v57 = vor.u32 %v5673_v1, %v4976_v51 }
 0x3b2   :  { %v3162_v55 = vpop.f32.mrf.mxu0  ;;  %v3211_v26 = vpop.f32.mrf.mxu1 }
 0x3b3   :  { %v3143_v4 = vpop.f32.mrf.mxu3  ;;  %v3163_v50 = vadd.f32 %v3162_v55, %v6605_v8  ;;  %v5104_v55 = vld [vmem:[#allocation4 + $0x1b8] sm:$0xf0]  ;;  %3540 = vmatpush.bf16.msra.mxu0 %v4979_v57 }
 0x3b4   :  { %v3144_v63 = vadd.f32 %v3143_v4, %v3095_v19  ;;  %3453 = vmatmul.bf16.gmra.mxu2 %v6426_v40  ;;  %v5360_v19 = vld [vmem:[#allocation4 + $0x3b8] sm:$0xf0] }
 0x3b5   :  { %v3212_v60 = vadd.f32 %v3211_v26, %v3163_v50  ;;  %v5363_v4 = vor.u32 %v5769_v11, %v5360_v19  ;;  %v5107_v50 = vor.u32 %v5705_v20, %v5104_v55  ;;  %v5733_v20 = vld [vmem:[#allocation4 + $0x28c] sm:$0xf]  ;;  %v5216_v55 = vld [vmem:[#allocation4 + $0x298] sm:$0xf0] }
 0x3b6   :  { %v3794_v42 = vmax.f32 %v3144_v63, 0.0 }
 0x3b7   :  { %v3258_v23 = vpop.f32.mrf.mxu2  ;;  %3687 = vmatpush.bf16.msra.mxu3 %v5363_v4  ;;  %3589 = vmatpush.bf16.msra.mxu1 %v5107_v50 }
 0x3b8   :  { %v3259_v24 = vadd.f32 %v3258_v23, %v3210_v12  ;;  %3497 = vmatmul.bf16.vlgmr.msrb.gmra.mxu3 %v6482_v29  ;;  %v6624_v45 = vpack.c.bf16 %v3794_v42, %v3790_v30 }
 0x3ba   :  { %6895 = vst [vmem:[#allocation12_spill] sm:$0xff] %v6624_v45  ;;  %v3165_v26 = vpop.f32.mrf.mxu0  ;;  %v3214_v46 = vpop.f32.mrf.mxu1 }
 0x3bb   :  { %v3166_v63 = vadd.f32 %v3165_v26, %v6605_v8  ;;  %v3302_v16 = vpop.f32.mrf.mxu3 }
 0x3bc   :  { %v3303_v12 = vadd.f32 %v3302_v16, %v3254_v53  ;;  %v5765_v16 = vld [vmem:[#allocation4 + $0x38c] sm:$0xf] }
 0x3bd   :  { %v3215_v39 = vadd.f32 %v3214_v46, %v3166_v63  ;;  %3360 = vmatmul.bf16.gmra.mxu0 %v6295_v56  ;;  %3409 = vmatmul.bf16.gmra.mxu1 %v6362_v32  ;;  %v5219_v46 = vor.u32 %v5733_v20, %v5216_v55  ;;  %v4960_v63 = vld [vmem:[#allocation4 + $0x98] sm:$0xf0] }
 0x3be   :  { %v3735_v57 = vmax.f32 %v3303_v12, 0.0 }
 0x3bf   :  { %v3260_v30 = vpop.f32.mrf.mxu2  ;;  %3639 = vmatpush.bf16.msra.mxu2 %v5219_v46 }
 0x3c0   :  { %v3261_v42 = vadd.f32 %v3260_v30, %v3212_v60  ;;  %v5669_v60 = vld [vmem:[#allocation4 + $0x8c] sm:$0xf] }
 0x3c1   :  { %v4963_v30 = vor.u32 %v5669_v60, %v4960_v63 }
 0x3c2   :  { %v3167_v23 = vpop.f32.mrf.mxu0  ;;  %v3216_v9 = vpop.f32.mrf.mxu1 }
 0x3c3   :  { %v3168_v1 = vadd.f32 %v3167_v23, %v6605_v8  ;;  %v3304_v51 = vpop.f32.mrf.mxu3  ;;  %v5701_v23 = vld [vmem:[#allocation4 + $0x18c] sm:$0xf]  ;;  %3541 = vmatpush.bf16.msra.mxu0 %v4963_v30 }
 0x3c4   :  { %v3305_v11 = vadd.f32 %v3304_v51, %v3256_v28  ;;  %3458 = vmatmul.bf16.gmra.mxu2 %v6434_v14  ;;  %v5344_v28 = vld [vmem:[#allocation4 + $0x398] sm:$0xf0] }
 0x3c5   :  { %v3217_v19 = vadd.f32 %v3216_v9, %v3168_v1  ;;  %v5088_v51 = vld [vmem:[#allocation4 + $0x198] sm:$0xf0]  ;;  %v5347_v1 = vor.u32 %v5765_v16, %v5344_v28 }
 0x3c6   :  { %v3739_v53 = vmax.f32 %v3305_v11, 0.0  ;;  %v5091_v11 = vor.u32 %v5701_v23, %v5088_v51  ;;  %v5729_v23 = vld [vmem:[#allocation4 + $0x26c] sm:$0xf]  ;;  %v5200_v51 = vld [vmem:[#allocation4 + $0x278] sm:$0xf0] }
 0x3c7   :  { %v3263_v26 = vpop.f32.mrf.mxu2  ;;  %3688 = vmatpush.bf16.msra.mxu3 %v5347_v1  ;;  %v5665_v1 = vld [vmem:[#allocation4 + $0x6c] sm:$0xf] }
 0x3c8   :  { %v6631_v4 = vpack.c.bf16 %v3739_v53, %v3735_v57  ;;  %v3264_v50 = vadd.f32 %v3263_v26, %v3215_v39  ;;  %3502 = vmatmul.bf16.gmra.mxu3 %v6490_v37  ;;  %3590 = vmatpush.bf16.msra.mxu1 %v5091_v11  ;;  %v5761_v11 = vld [vmem:[#allocation4 + $0x36c] sm:$0xf] }
 0x3ca   :  { %v3170_v9 = vpop.f32.mrf.mxu0  ;;  %v3219_v12 = vpop.f32.mrf.mxu1 }
 0x3cb   :  { %v3171_v45 = vadd.f32 %v3170_v9, %v6605_v8  ;;  %v3307_v20 = vpop.f32.mrf.mxu3  ;;  %v5203_v9 = vor.u32 %v5729_v23, %v5200_v51 }
 0x3cc   :  { %v3308_v57 = vadd.f32 %v3307_v20, %v3259_v24 }
 0x3cd   :  { %v3220_v39 = vadd.f32 %v3219_v12, %v3171_v45  ;;  %3365 = vmatmul.bf16.gmra.mxu0 %v6303_v2  ;;  %3414 = vmatmul.bf16.gmra.mxu1 %v6370_v41 }
 0x3ce   :  { %v3743_v30 = vmax.f32 %v3308_v57, 0.0  ;;  %3640 = vmatpush.bf16.msra.mxu2 %v5203_v9 }
 0x3cf   :  { %v3265_v53 = vpop.f32.mrf.mxu2 }
 0x3d0   :  { %v3266_v55 = vadd.f32 %v3265_v53, %v3217_v19  ;;  %v4944_v19 = vld [vmem:[#allocation4 + $0x78] sm:$0xf0] }
 0x3d1   :  { %v4947_v53 = vor.u32 %v5665_v1, %v4944_v19 }
 0x3d2   :  { %v3172_v26 = vpop.f32.mrf.mxu0  ;;  %v3221_v46 = vpop.f32.mrf.mxu1 }
 0x3d3   :  { %v3173_v60 = vadd.f32 %v3172_v26, %v6605_v8  ;;  %v3309_v63 = vpop.f32.mrf.mxu3  ;;  %v5697_v26 = vld [vmem:[#allocation4 + $0x16c] sm:$0xf]  ;;  %3542 = vmatpush.bf16.msra.mxu0 %v4947_v53 }
 0x3d4   :  { %v3310_v16 = vadd.f32 %v3309_v63, %v3261_v42  ;;  %3463 = vmatmul.bf16.gmra.mxu2 %v6442_v38  ;;  %v5328_v42 = vld [vmem:[#allocation4 + $0x378] sm:$0xf0] }
 0x3d5   :  { %v3222_v28 = vadd.f32 %v3221_v46, %v3173_v60  ;;  %v5072_v63 = vld [vmem:[#allocation4 + $0x178] sm:$0xf0]  ;;  %v5331_v60 = vor.u32 %v5761_v11, %v5328_v42 }
 0x3d6   :  { %v3747_v24 = vmax.f32 %v3310_v16, 0.0  ;;  %v5075_v16 = vor.u32 %v5697_v26, %v5072_v63  ;;  %v5725_v26 = vld [vmem:[#allocation4 + $0x24c] sm:$0xf]  ;;  %v5184_v63 = vld [vmem:[#allocation4 + $0x258] sm:$0xf0] }
 0x3d7   :  { %v3268_v45 = vpop.f32.mrf.mxu2  ;;  %3689 = vmatpush.bf16.msra.mxu3 %v5331_v60  ;;  %v4928_v60 = vld [vmem:[#allocation4 + $0x58] sm:$0xf0] }
 0x3d8   :  { %v3269_v12 = vadd.f32 %v3268_v45, %v3220_v39  ;;  %3507 = vmatmul.bf16.gmra.mxu3 %v6498_v61  ;;  %v6640_v20 = vpack.c.bf16 %v3747_v24, %v3743_v30  ;;  %3591 = vmatpush.bf16.msra.mxu1 %v5075_v16  ;;  %v5757_v16 = vld [vmem:[#allocation4 + $0x34c] sm:$0xf] }
 0x3da   :  { %v3175_v46 = vpop.f32.mrf.mxu0  ;;  %v3224_v57 = vpop.f32.mrf.mxu1 }
 0x3db   :  { %v3176_v49 = vadd.f32 %v3175_v46, %v6605_v8  ;;  %v3312_v23 = vpop.f32.mrf.mxu3  ;;  %v5187_v46 = vor.u32 %v5725_v26, %v5184_v63 }
 0x3dc   :  { %v3313_v39 = vadd.f32 %v3312_v23, %v3264_v50 }
 0x3dd   :  { %v3225_v51 = vadd.f32 %v3224_v57, %v3176_v49  ;;  %3370 = vmatmul.bf16.gmra.mxu0 %v6886_v54  ;;  %3419 = vmatmul.bf16.gmra.mxu1 %v6378_v43 }
 0x3de   :  { %v3751_v53 = vmax.f32 %v3313_v39, 0.0  ;;  %3641 = vmatpush.bf16.msra.mxu2 %v5187_v46 }
 0x3df   :  { %v3270_v30 = vpop.f32.mrf.mxu2 }
 0x3e0   :  { %v3271_v24 = vadd.f32 %v3270_v30, %v3222_v28  ;;  %v5661_v28 = vld [vmem:[#allocation4 + $0x4c] sm:$0xf]  ;;  %v5312_v30 = vld [vmem:[#allocation4 + $0x358] sm:$0xf0] }
 0x3e2   :  { %v3177_v45 = vpop.f32.mrf.mxu0  ;;  %v3226_v9 = vpop.f32.mrf.mxu1 }
 0x3e3   :  { %v3178_v1 = vadd.f32 %v3177_v45, %v6605_v8  ;;  %v3314_v19 = vpop.f32.mrf.mxu3  ;;  %v5693_v45 = vld [vmem:[#allocation4 + $0x14c] sm:$0xf] }
 0x3e4   :  { %v3315_v11 = vadd.f32 %v3314_v19, %v3266_v55  ;;  %3468 = vmatmul.bf16.gmra.mxu2 %v6450_v31  ;;  %v4931_v55 = vor.u32 %v5661_v28, %v4928_v60  ;;  %v5315_v19 = vor.u32 %v5757_v16, %v5312_v30 }
 0x3e5   :  { %v3227_v42 = vadd.f32 %v3226_v9, %v3178_v1  ;;  %v5056_v9 = vld [vmem:[#allocation4 + $0x158] sm:$0xf0] }
 0x3e6   :  { %v3755_v50 = vmax.f32 %v3315_v11, 0.0  ;;  %v5059_v11 = vor.u32 %v5693_v45, %v5056_v9  ;;  %3543 = vmatpush.bf16.msra.mxu0 %v4931_v55  ;;  %3690 = vmatpush.bf16.msra.mxu3 %v5315_v19  ;;  %v5657_v45 = vld [vmem:[#allocation4 + $0x2c] sm:$0xf]  ;;  %v4912_v55 = vld [vmem:[#allocation4 + $0x38] sm:$0xf0] }
 0x3e7   :  { %v3273_v49 = vpop.f32.mrf.mxu2 }
 0x3e8   :  { %v6647_v57 = vadd.f32 %v3273_v49, %v3225_v51  ;;  %3512 = vmatmul.bf16.gmra.mxu3 %v6506_v35  ;;  %v6650_v23 = vpack.c.bf16 %v3755_v50, %v3751_v53  ;;  %3592 = vmatpush.bf16.msra.mxu1 %v5059_v11 }
 0x3ea   :  { %v3180_v39 = vpop.f32.mrf.mxu0  ;;  %v3229_v1 = vpop.f32.mrf.mxu1 }
 0x3eb   :  { %v3181_v26 = vadd.f32 %v3180_v39, %v6605_v8  ;;  %v3317_v51 = vpop.f32.mrf.mxu3  ;;  %v4915_v39 = vor.u32 %v5657_v45, %v4912_v55 }
 0x3ec   :  { %v3318_v63 = vadd.f32 %v3317_v51, %v3269_v12  ;;  %v5689_v12 = vld [vmem:[#allocation4 + $0x12c] sm:$0xf]  ;;  %v5168_v51 = vld [vmem:[#allocation4 + $0x238] sm:$0xf0] }
 0x3ed   :  { %v3230_v49 = vadd.f32 %v3229_v1, %v3181_v26  ;;  %3375 = vmatmul.bf16.gmra.mxu0 %v6887_v18  ;;  %3424 = vmatmul.bf16.gmra.mxu1 %v6386_v15  ;;  %v5040_v1 = vld [vmem:[#allocation4 + $0x138] sm:$0xf0]  ;;  %v5721_v26 = vld [vmem:[#allocation4 + $0x22c] sm:$0xf] }
 0x3ee   :  { %v3759_v19 = vmax.f32 %v3318_v63, 0.0  ;;  %v5043_v59 = vor.u32 %v5689_v12, %v5040_v1  ;;  %3544 = vmatpush.bf16.msra.mxu0 %v4915_v39  ;;  %v5685_v63 = vld [vmem:[#allocation4 + $0x10c] sm:$0xf] }
 0x3ef   :  { %v3275_v53 = vpop.f32.mrf.mxu2 }
 0x3f0   :  { %v3276_v50 = vadd.f32 %v3275_v53, %v3227_v42  ;;  %v5171_v53 = vor.u32 %v5721_v26, %v5168_v51  ;;  %3593 = vmatpush.bf16.msra.mxu1 %v5043_v59 }
 0x3f2   :  { %v3182_v46 = vpop.f32.mrf.mxu0  ;;  %v3231_v28 = vpop.f32.mrf.mxu1  ;;  %3642 = vmatpush.bf16.msra.mxu2 %v5171_v53 }
 0x3f3   :  { %v3183_v60 = vadd.f32 %v3182_v46, %v6605_v8  ;;  %v3319_v16 = vpop.f32.mrf.mxu3  ;;  %v5296_v46 = vld [vmem:[#allocation4 + $0x338] sm:$0xf0] }
 0x3f4   :  { %v3320_v30 = vadd.f32 %v3319_v16, %v3271_v24  ;;  %3473 = vmatmul.bf16.gmra.mxu2 %v6458_v36  ;;  %v5753_v24 = vld [vmem:[#allocation4 + $0x32c] sm:$0xf] }
 0x3f5   :  { %v3232_v9 = vadd.f32 %v3231_v28, %v3183_v60  ;;  %v5653_v16 = vld [vmem:[#allocation4 + $0xc] sm:$0xf]  ;;  %v5299_v28 = vor.u32 %v5753_v24, %v5296_v46  ;;  %v4896_v60 = vld [vmem:[#allocation4 + $0x18] sm:$0xf0] }
 0x3f6   :  { %v3763_v11 = vmax.f32 %v3320_v30, 0.0  ;;  %v5024_v30 = vld [vmem:[#allocation4 + $0x118] sm:$0xf0]  ;;  %v4899_v12 = vor.u32 %v5653_v16, %v4896_v60 }
 0x3f7   :  { %v3278_v42 = vpop.f32.mrf.mxu2  ;;  %v5027_v1 = vor.u32 %v5685_v63, %v5024_v30  ;;  %3691 = vmatpush.bf16.msra.mxu3 %v5299_v28 }
 0x3f8   :  { %v3279_v7 = vadd.f32 %v3278_v42, %v3230_v49  ;;  %3517 = vmatmul.bf16.gmra.mxu3 %v6514_v22  ;;  %v6658_v21 = vpack.c.bf16 %v3763_v11, %v3759_v19  ;;  %3545 = vmatpush.bf16.msra.mxu0 %v4899_v12  ;;  %v5717_v19 = vld [vmem:[#allocation4 + $0x20c] sm:$0xf]  ;;  %v5152_v11 = vld [vmem:[#allocation4 + $0x218] sm:$0xf0] }
 0x3f9   :  { %3594 = vmatpush.bf16.msra.mxu1 %v5027_v1  ;;  %v5155_v42 = vor.u32 %v5717_v19, %v5152_v11  ;;  %v5749_v12 = vld [vmem:[#allocation4 + $0x30c] sm:$0xf]  ;;  %v5280_v1 = vld [vmem:[#allocation4 + $0x318] sm:$0xf0] }
 0x3fa   :  { %v3185_v45 = vpop.f32.mrf.mxu0  ;;  %v3234_v55 = vpop.f32.mrf.mxu1 }
 0x3fb   :  { %v3186_v39 = vadd.f32 %v3185_v45, %v6605_v8  ;;  %v3322_v49 = vpop.f32.mrf.mxu3  ;;  %3643 = vmatpush.bf16.msra.mxu2 %v5155_v42 }
 0x3fc   :  { %v3323_v59 = vadd.f32 %v3322_v49, %v6647_v57 }
 0x3fd   :  { %v3235_v26 = vadd.f32 %v3234_v55, %v3186_v39  ;;  %3380 = vmatmul.bf16.gmra.mxu0 %v6888_v13  ;;  %3429 = vmatmul.bf16.gmra.mxu1 %v6889_v33 }
 0x3fe   :  { %v3767_v63 = vmax.f32 %v3323_v59, 0.0 }
 0x3ff   :  { %v3280_v51 = vpop.f32.mrf.mxu2 }
 0x400   :  { %v3281_v53 = vadd.f32 %v3280_v51, %v3232_v9  ;;  %v5283_v9 = vor.u32 %v5749_v12, %v5280_v1 }
 0x402   :  { %v3187_v24 = vpop.f32.mrf.mxu0  ;;  %v3236_v46 = vpop.f32.mrf.mxu1  ;;  %3692 = vmatpush.bf16.msra.mxu3 %v5283_v9 }
 0x403   :  { %v3188_v16 = vadd.f32 %v3187_v24, %v6605_v8  ;;  %v3324_v28 = vpop.f32.mrf.mxu3 }
 0x404   :  { %v3325_v60 = vadd.f32 %v3324_v28, %v3276_v50  ;;  %3478 = vmatmul.bf16.gmra.mxu2 %v6466_v34 }
 0x405   :  { %v3237_v57 = vadd.f32 %v3236_v46, %v3188_v16 }
 0x406   :  { %v3771_v30 = vmax.f32 %v3325_v60, 0.0 }
 0x407   :  { %v3283_v45 = vpop.f32.mrf.mxu2 }
 0x408   :  { %v3284_v55 = vadd.f32 %v3283_v45, %v3235_v26  ;;  %3522 = vmatmul.bf16.gmra.mxu3 %v6522_v25  ;;  %v6667_v39 = vpack.c.bf16 %v3771_v30, %v3767_v63 }
 0x40a   :  { %v3190_v49 = vpop.f32.mrf.mxu0  ;;  %v3239_v19 = vpop.f32.mrf.mxu1 }
 0x40b   :  { %v3191_v11 = vadd.f32 %v3190_v49, %v6605_v8  ;;  %v3327_v51 = vpop.f32.mrf.mxu3 }
 0x40c   :  { %v3328_v50 = vadd.f32 %v3327_v51, %v3279_v7  ;;  %v6677_v7 = vld [vmem:[%s6872_s6] sm:$0xf] }
 0x40d   :  { %v3240_v42 = vadd.f32 %v3239_v19, %v3191_v11  ;;  %3385 = vmatmul.bf16.gmra.mxu0 %v6890_v62  ;;  %3434 = vmatmul.bf16.gmra.mxu1 %v6410_v27  ;;  %v6680_v1 = vperm.slane %v6677_v7, 2 }
 0x40e   :  { %v3775_v30 = vmax.f32 %v3328_v50, 0.0 }
 0x40f   :  { %v3285_v59 = vpop.f32.mrf.mxu2 }
 0x410   :  { %v3286_v26 = vadd.f32 %v3285_v59, %v3237_v57 }
 0x412   :  { %v3192_v24 = vpop.f32.mrf.mxu0  ;;  %v3241_v46 = vpop.f32.mrf.mxu1 }
 0x413   :  { %v3193_v16 = vadd.f32 %v3192_v24, %v6605_v8  ;;  %v3329_v28 = vpop.f32.mrf.mxu3 }
 0x414   :  { %v3330_v60 = vadd.f32 %v3329_v28, %v3281_v53  ;;  %3483 = vmatmul.bf16.gmra.mxu2 %v6475_v5 }
 0x415   :  { %v3242_v63 = vadd.f32 %v3241_v46, %v3193_v16 }
 0x416   :  { %v3779_v45 = vmax.f32 %v3330_v60, 0.0 }
 0x417   :  { %v3288_v12 = vpop.f32.mrf.mxu2 }
 0x418   :  { %v3289_v57 = vadd.f32 %v3288_v12, %v3240_v42  ;;  %3527 = vmatmul.bf16.gmra.mxu3 %v6535_v10  ;;  %v6683_v8 = vpack.c.bf16 %v3779_v45, %v3775_v30 }
 0x41a   :  { %v3351_v53 = vpop.f32.mrf.mxu0  ;;  %v3400_v9 = vpop.f32.mrf.mxu1 }
 0x41b   :  { %v3332_v49 = vpop.f32.mrf.mxu3  ;;  %v3352_v19 = vadd.f32 %v3351_v53, %v6680_v1  ;;  %v5787_v53 = vld [vmem:[#allocation6 + $0x38] sm:$0xff] }
 0x41c   :  { %v3333_v11 = vadd.f32 %v3332_v49, %v3284_v55  ;;  %4090 = vmatpush.bf16.msrb.mxu0 %v5787_v53 }
 0x41d   :  { %v3401_v51 = vadd.f32 %v3400_v9, %v3352_v19  ;;  %3546 = vmatmul.bf16.vlgmr.msra.gmra.mxu0 %v6279_v3  ;;  %3595 = vmatmul.bf16.vlgmr.msra.gmra.mxu1 %v6346_v17  ;;  %v5803_v3 = vld [vmem:[#allocation6 + $0xb8] sm:$0xff] }
 0x41e   :  { %v3783_v30 = vmax.f32 %v3333_v11, 0.0  ;;  %v5811_v17 = vld [vmem:[#allocation6 + $0xf8] sm:$0xff]  ;;  %4188 = vmatpush.bf16.msrb.mxu2 %v5803_v3 }
 0x41f   :  { %v3290_v50 = vpop.f32.mrf.mxu2  ;;  %4237 = vmatpush.bf16.msrb.mxu3 %v5811_v17  ;;  %v5810_v17 = vld [vmem:[#allocation6 + $0xf0] sm:$0xff] }
 0x420   :  { %v3291_v59 = vadd.f32 %v3290_v50, %v3242_v63 }
 0x422   :  { %v3353_v24 = vpop.f32.mrf.mxu0  ;;  %v3402_v46 = vpop.f32.mrf.mxu1 }
 0x423   :  { %v3334_v42 = vpop.f32.mrf.mxu3  ;;  %v3354_v16 = vadd.f32 %v3353_v24, %v6680_v1  ;;  %4238 = vmatpush.bf16.msrb.mxu3 %v5810_v17 }
 0x424   :  { %v3335_v28 = vadd.f32 %v3334_v42, %v3286_v26  ;;  %3644 = vmatmul.bf16.vlgmr.msra.gmra.mxu2 %v6418_v58 }
 0x425   :  { %v3403_v60 = vadd.f32 %v3402_v46, %v3354_v16 }
 0x426   :  { %v3787_v45 = vmax.f32 %v3335_v28, 0.0 }
 0x427   :  { %v3449_v12 = vpop.f32.mrf.mxu2 }
 0x428   :  { %v3450_v55 = vadd.f32 %v3449_v12, %v3401_v51  ;;  %3532 = vmatmul.bf16.gmra.mxu3 %v6547_v48  ;;  %v6691_v9 = vpack.c.bf16 %v3787_v45, %v3783_v30  ;;  %v5795_v51 = vld [vmem:[#allocation6 + $0x78] sm:$0xff] }
 0x429   :  { %4139 = vmatpush.bf16.msrb.mxu1 %v5795_v51 }
 0x42a   :  { %v3356_v63 = vpop.f32.mrf.mxu0  ;;  %v3405_v49 = vpop.f32.mrf.mxu1 }
 0x42b   :  { %v3337_v19 = vpop.f32.mrf.mxu3  ;;  %v3357_v26 = vadd.f32 %v3356_v63, %v6680_v1 }
 0x42c   :  { %v3338_v58 = vadd.f32 %v3337_v19, %v3289_v57 }
 0x42d   :  { %v3406_v11 = vadd.f32 %v3405_v49, %v3357_v26  ;;  %3551 = vmatmul.bf16.gmra.mxu0 %v6287_v47  ;;  %3600 = vmatmul.bf16.gmra.mxu1 %v6354_v44  ;;  %v5802_v47 = vld [vmem:[#allocation6 + $0xb0] sm:$0xff] }
 0x42e   :  { %v3791_v12 = vmax.f32 %v3338_v58, 0.0  ;;  %v5786_v44 = vld [vmem:[#allocation6 + $0x30] sm:$0xff]  ;;  %4189 = vmatpush.bf16.msrb.mxu2 %v5802_v47 }
 0x42f   :  { %v3451_v50 = vpop.f32.mrf.mxu2  ;;  %4091 = vmatpush.bf16.msrb.mxu0 %v5786_v44 }
 0x430   :  { %v3452_v24 = vadd.f32 %v3451_v50, %v3403_v60 }
 0x432   :  { %v3358_v46 = vpop.f32.mrf.mxu0  ;;  %v3407_v42 = vpop.f32.mrf.mxu1 }
 0x433   :  { %v3339_v16 = vpop.f32.mrf.mxu3  ;;  %v3359_v28 = vadd.f32 %v3358_v46, %v6680_v1 }
 0x434   :  { %v3340_v30 = vadd.f32 %v3339_v16, %v3291_v59  ;;  %3649 = vmatmul.bf16.gmra.mxu2 %v6426_v40 }
 0x435   :  { %v3408_v45 = vadd.f32 %v3407_v42, %v3359_v28 }
 0x436   :  { %v3795_v57 = vmax.f32 %v3340_v30, 0.0 }
 0x437   :  { %v3454_v3 = vpop.f32.mrf.mxu2 }
 0x438   :  { %v3455_v53 = vadd.f32 %v3454_v3, %v3406_v11  ;;  %3693 = vmatmul.bf16.vlgmr.msra.gmra.mxu3 %v6482_v29  ;;  %v6699_v60 = vpack.c.bf16 %v3795_v57, %v3791_v12  ;;  %v5794_v29 = vld [vmem:[#allocation6 + $0x70] sm:$0xff]  ;;  %v5809_v3 = vld [vmem:[#allocation6 + $0xe8] sm:$0xff] }
 0x439   :  { %4140 = vmatpush.bf16.msrb.mxu1 %v5794_v29  ;;  %4239 = vmatpush.bf16.msrb.mxu3 %v5809_v3 }
 0x43a   :  { %v3361_v63 = vpop.f32.mrf.mxu0  ;;  %v3410_v49 = vpop.f32.mrf.mxu1 }
 0x43b   :  { %v3362_v59 = vadd.f32 %v3361_v63, %v6680_v1  ;;  %v3498_v19 = vpop.f32.mrf.mxu3 }
 0x43c   :  { %v3499_v40 = vadd.f32 %v3498_v19, %v3450_v55 }
 0x43d   :  { %v3411_v26 = vadd.f32 %v3410_v49, %v3362_v59  ;;  %3556 = vmatmul.bf16.gmra.mxu0 %v6295_v56  ;;  %3605 = vmatmul.bf16.gmra.mxu1 %v6362_v32  ;;  %v5801_v32 = vld [vmem:[#allocation6 + $0xa8] sm:$0xff] }
 0x43e   :  { %v3736_v30 = vmax.f32 %v3499_v40, 0.0  ;;  %4190 = vmatpush.bf16.msrb.mxu2 %v5801_v32  ;;  %v5793_v49 = vld [vmem:[#allocation6 + $0x68] sm:$0xff] }
 0x43f   :  { %v3456_v58 = vpop.f32.mrf.mxu2  ;;  %4141 = vmatpush.bf16.msrb.mxu1 %v5793_v49 }
 0x440   :  { %v3457_v11 = vadd.f32 %v3456_v58, %v3408_v45  ;;  %v5785_v45 = vld [vmem:[#allocation6 + $0x28] sm:$0xff] }
 0x441   :  { %4092 = vmatpush.bf16.msrb.mxu0 %v5785_v45 }
 0x442   :  { %v3363_v51 = vpop.f32.mrf.mxu0  ;;  %v3412_v50 = vpop.f32.mrf.mxu1 }
 0x443   :  { %v3364_v46 = vadd.f32 %v3363_v51, %v6680_v1  ;;  %v3500_v42 = vpop.f32.mrf.mxu3 }
 0x444   :  { %v3501_v16 = vadd.f32 %v3500_v42, %v3452_v24  ;;  %3654 = vmatmul.bf16.gmra.mxu2 %v6434_v14 }
 0x445   :  { %v3413_v28 = vadd.f32 %v3412_v50, %v3364_v46 }
 0x446   :  { %v3740_v55 = vmax.f32 %v3501_v16, 0.0  ;;  %v5808_v16 = vld [vmem:[#allocation6 + $0xe0] sm:$0xff] }
 0x447   :  { %v3459_v12 = vpop.f32.mrf.mxu2  ;;  %4240 = vmatpush.bf16.msrb.mxu3 %v5808_v16 }
 0x448   :  { %v6706_v57 = vpack.c.bf16 %v3740_v55, %v3736_v30  ;;  %v3460_v56 = vadd.f32 %v3459_v12, %v3411_v26  ;;  %3698 = vmatmul.bf16.gmra.mxu3 %v6490_v37 }
 0x44a   :  { %v3366_v47 = vpop.f32.mrf.mxu0  ;;  %v3415_v44 = vpop.f32.mrf.mxu1 }
 0x44b   :  { %v3367_v24 = vadd.f32 %v3366_v47, %v6680_v1  ;;  %v3503_v17 = vpop.f32.mrf.mxu3 }
 0x44c   :  { %v3504_v14 = vadd.f32 %v3503_v17, %v3455_v53 }
 0x44d   :  { %v3416_v63 = vadd.f32 %v3415_v44, %v3367_v24  ;;  %3561 = vmatmul.bf16.gmra.mxu0 %v6303_v2  ;;  %3610 = vmatmul.bf16.gmra.mxu1 %v6370_v41  ;;  %v5800_v2 = vld [vmem:[#allocation6 + $0xa0] sm:$0xff] }
 0x44e   :  { %v3744_v50 = vmax.f32 %v3504_v14, 0.0  ;;  %v5784_v41 = vld [vmem:[#allocation6 + $0x20] sm:$0xff]  ;;  %4191 = vmatpush.bf16.msrb.mxu2 %v5800_v2  ;;  %v5782_v2 = vld [vmem:[#allocation6 + $0x10] sm:$0xff] }
 0x44f   :  { %v3461_v59 = vpop.f32.mrf.mxu2  ;;  %4093 = vmatpush.bf16.msrb.mxu0 %v5784_v41  ;;  %v5790_v41 = vld [vmem:[#allocation6 + $0x50] sm:$0xff] }
 0x450   :  { %v3462_v37 = vadd.f32 %v3461_v59, %v3413_v28 }
 0x452   :  { %v3368_v19 = vpop.f32.mrf.mxu0  ;;  %v3417_v40 = vpop.f32.mrf.mxu1 }
 0x453   :  { %v3369_v26 = vadd.f32 %v3368_v19, %v6680_v1  ;;  %v3505_v29 = vpop.f32.mrf.mxu3 }
 0x454   :  { %v3506_v58 = vadd.f32 %v3505_v29, %v3457_v11  ;;  %3659 = vmatmul.bf16.gmra.mxu2 %v6442_v38 }
 0x455   :  { %v3418_v51 = vadd.f32 %v3417_v40, %v3369_v26  ;;  %v5807_v40 = vld [vmem:[#allocation6 + $0xd8] sm:$0xff] }
 0x456   :  { %v3748_v53 = vmax.f32 %v3506_v58, 0.0  ;;  %4241 = vmatpush.bf16.msrb.mxu3 %v5807_v40 }
 0x457   :  { %v3464_v46 = vpop.f32.mrf.mxu2 }
 0x458   :  { %v3465_v42 = vadd.f32 %v3464_v46, %v3416_v63  ;;  %3703 = vmatmul.bf16.gmra.mxu3 %v6498_v61  ;;  %v6715_v28 = vpack.c.bf16 %v3748_v53, %v3744_v50  ;;  %v5792_v61 = vld [vmem:[#allocation6 + $0x60] sm:$0xff] }
 0x459   :  { %4142 = vmatpush.bf16.msrb.mxu1 %v5792_v61 }
 0x45a   :  { %v3371_v30 = vpop.f32.mrf.mxu0  ;;  %v3420_v55 = vpop.f32.mrf.mxu1 }
 0x45b   :  { %v3372_v11 = vadd.f32 %v3371_v30, %v6680_v1  ;;  %v3508_v12 = vpop.f32.mrf.mxu3 }
 0x45c   :  { %v3509_v38 = vadd.f32 %v3508_v12, %v3460_v56 }
 0x45d   :  { %v3421_v32 = vadd.f32 %v3420_v55, %v3372_v11  ;;  %3566 = vmatmul.bf16.gmra.mxu0 %v6886_v54  ;;  %3615 = vmatmul.bf16.gmra.mxu1 %v6378_v43  ;;  %v5799_v43 = vld [vmem:[#allocation6 + $0x98] sm:$0xff] }
 0x45e   :  { %v3752_v49 = vmax.f32 %v3509_v38, 0.0  ;;  %v5783_v54 = vld [vmem:[#allocation6 + $0x18] sm:$0xff]  ;;  %4192 = vmatpush.bf16.msrb.mxu2 %v5799_v43  ;;  %v5789_v38 = vld [vmem:[#allocation6 + $0x48] sm:$0xff] }
 0x45f   :  { %v3466_v45 = vpop.f32.mrf.mxu2  ;;  %4094 = vmatpush.bf16.msrb.mxu0 %v5783_v54  ;;  %v5796_v54 = vld [vmem:[#allocation6 + $0x80] sm:$0xff] }
 0x460   :  { %v3467_v3 = vadd.f32 %v3466_v45, %v3418_v51  ;;  %v5798_v45 = vld [vmem:[#allocation6 + $0x90] sm:$0xff] }
 0x462   :  { %v3373_v47 = vpop.f32.mrf.mxu0  ;;  %v3422_v44 = vpop.f32.mrf.mxu1  ;;  %4193 = vmatpush.bf16.msrb.mxu2 %v5798_v45 }
 0x463   :  { %v3374_v24 = vadd.f32 %v3373_v47, %v6680_v1  ;;  %v3510_v17 = vpop.f32.mrf.mxu3  ;;  %4095 = vmatpush.bf16.msrb.mxu0 %v5782_v2 }
 0x464   :  { %v3511_v14 = vadd.f32 %v3510_v17, %v3462_v37  ;;  %3664 = vmatmul.bf16.gmra.mxu2 %v6450_v31  ;;  %v5780_v17 = vld [vmem:[#allocation6] sm:$0xff] }
 0x465   :  { %v3423_v63 = vadd.f32 %v3422_v44, %v3374_v24  ;;  %v5806_v44 = vld [vmem:[#allocation6 + $0xd0] sm:$0xff] }
 0x466   :  { %v3756_v56 = vmax.f32 %v3511_v14, 0.0  ;;  %4242 = vmatpush.bf16.msrb.mxu3 %v5806_v44 }
 0x467   :  { %v3469_v59 = vpop.f32.mrf.mxu2 }
 0x468   :  { %v3470_v19 = vadd.f32 %v3469_v59, %v3421_v32  ;;  %3708 = vmatmul.bf16.gmra.mxu3 %v6506_v35  ;;  %v6723_v26 = vpack.c.bf16 %v3756_v56, %v3752_v49  ;;  %v5791_v35 = vld [vmem:[#allocation6 + $0x58] sm:$0xff]  ;;  %v5797_v56 = vld [vmem:[#allocation6 + $0x88] sm:$0xff] }
 0x469   :  { %4143 = vmatpush.bf16.msrb.mxu1 %v5791_v35  ;;  %4194 = vmatpush.bf16.msrb.mxu2 %v5797_v56 }
 0x46a   :  { %v3376_v29 = vpop.f32.mrf.mxu0  ;;  %v3425_v58 = vpop.f32.mrf.mxu1 }
 0x46b   :  { %v3377_v37 = vadd.f32 %v3376_v29, %v6680_v1  ;;  %v3513_v51 = vpop.f32.mrf.mxu3 }
 0x46c   :  { %v3514_v31 = vadd.f32 %v3513_v51, %v3465_v42 }
 0x46d   :  { %v3426_v50 = vadd.f32 %v3425_v58, %v3377_v37  ;;  %3571 = vmatmul.bf16.gmra.mxu0 %v6887_v18  ;;  %3620 = vmatmul.bf16.gmra.mxu1 %v6386_v15  ;;  %v5781_v18 = vld [vmem:[#allocation6 + $0x8] sm:$0xff] }
 0x46e   :  { %4144 = vmatpush.bf16.msrb.mxu1 %v5790_v41  ;;  %v3760_v15 = vmax.f32 %v3514_v31, 0.0  ;;  %4096 = vmatpush.bf16.msrb.mxu0 %v5781_v18 }
 0x46f   :  { %v3471_v53 = vpop.f32.mrf.mxu2  ;;  %4195 = vmatpush.bf16.msrb.mxu2 %v5796_v54 }
 0x470   :  { %v3472_v46 = vadd.f32 %v3471_v53, %v3423_v63 }
 0x472   :  { %v3378_v16 = vpop.f32.mrf.mxu0  ;;  %v3427_v30 = vpop.f32.mrf.mxu1  ;;  %4145 = vmatpush.bf16.msrb.mxu1 %v5789_v38  ;;  %4097 = vmatpush.bf16.msrb.mxu0 %v5780_v17 }
 0x473   :  { %v3379_v55 = vadd.f32 %v3378_v16, %v6680_v1  ;;  %v3515_v11 = vpop.f32.mrf.mxu3 }
 0x474   :  { %v3516_v12 = vadd.f32 %v3515_v11, %v3467_v3  ;;  %3669 = vmatmul.bf16.gmra.mxu2 %v6458_v36  ;;  %v5788_v3 = vld [vmem:[#allocation6 + $0x40] sm:$0xff] }
 0x475   :  { %v3428_v42 = vadd.f32 %v3427_v30, %v3379_v55 }
 0x476   :  { %v3764_v32 = vmax.f32 %v3516_v12, 0.0  ;;  %4146 = vmatpush.bf16.msrb.mxu1 %v5788_v3 }
 0x477   :  { %v3474_v61 = vpop.f32.mrf.mxu2 }
 0x478   :  { %v3475_v47 = vadd.f32 %v3474_v61, %v3426_v50  ;;  %3713 = vmatmul.bf16.gmra.mxu3 %v6514_v22  ;;  %v6731_v24 = vpack.c.bf16 %v3764_v32, %v3760_v15 }
 0x47a   :  { %v3381_v14 = vpop.f32.mrf.mxu0  ;;  %v3430_v36 = vpop.f32.mrf.mxu1 }
 0x47b   :  { %v3382_v63 = vadd.f32 %v3381_v14, %v6680_v1  ;;  %v3518_v49 = vpop.f32.mrf.mxu3 }
 0x47c   :  { %v3519_v59 = vadd.f32 %v3518_v49, %v3470_v19 }
 0x47d   :  { %v3431_v43 = vadd.f32 %v3430_v36, %v3382_v63  ;;  %3576 = vmatmul.bf16.gmra.mxu0 %v6888_v13  ;;  %3625 = vmatmul.bf16.gmra.mxu1 %v6889_v33  ;;  %v5805_v33 = vld [vmem:[#allocation6 + $0xc8] sm:$0xff] }
 0x47e   :  { %v3768_v19 = vmax.f32 %v3519_v59, 0.0  ;;  %4243 = vmatpush.bf16.msrb.mxu3 %v5805_v33 }
 0x47f   :  { %v3476_v22 = vpop.f32.mrf.mxu2 }
 0x480   :  { %v3477_v40 = vadd.f32 %v3476_v22, %v3428_v42 }
 0x482   :  { %v3383_v29 = vpop.f32.mrf.mxu0  ;;  %v3432_v58 = vpop.f32.mrf.mxu1 }
 0x483   :  { %v3384_v37 = vadd.f32 %v3383_v29, %v6680_v1  ;;  %v3520_v51 = vpop.f32.mrf.mxu3 }
 0x484   :  { %v3521_v31 = vadd.f32 %v3520_v51, %v3472_v46  ;;  %3674 = vmatmul.bf16.gmra.mxu2 %v6466_v34 }
 0x485   :  { %v3433_v50 = vadd.f32 %v3432_v58, %v3384_v37 }
 0x486   :  { %v3772_v35 = vmax.f32 %v3521_v31, 0.0 }
 0x487   :  { %v3479_v53 = vpop.f32.mrf.mxu2 }
 0x488   :  { %v3480_v13 = vadd.f32 %v3479_v53, %v3431_v43  ;;  %3718 = vmatmul.bf16.gmra.mxu3 %v6522_v25  ;;  %v6739_v2 = vpack.c.bf16 %v3772_v35, %v3768_v19 }
 0x48a   :  { %v3386_v41 = vpop.f32.mrf.mxu0  ;;  %v3435_v16 = vpop.f32.mrf.mxu1 }
 0x48b   :  { %v3387_v30 = vadd.f32 %v3386_v41, %v6680_v1  ;;  %v3523_v55 = vpop.f32.mrf.mxu3 }
 0x48c   :  { %v3524_v11 = vadd.f32 %v3523_v55, %v3475_v47 }
 0x48d   :  { %v3436_v46 = vadd.f32 %v3435_v16, %v3387_v30  ;;  %3581 = vmatmul.bf16.gmra.mxu0 %v6890_v62  ;;  %3630 = vmatmul.bf16.gmra.mxu1 %v6410_v27  ;;  %v5804_v62 = vld [vmem:[#allocation6 + $0xc0] sm:$0xff] }
 0x48e   :  { %v3776_v61 = vmax.f32 %v3524_v11, 0.0  ;;  %4244 = vmatpush.bf16.msrb.mxu3 %v5804_v62 }
 0x48f   :  { %v3481_v34 = vpop.f32.mrf.mxu2 }
 0x490   :  { %v3482_v12 = vadd.f32 %v3481_v34, %v3433_v50  ;;  %v6759_v50 = vperm.slane %v6677_v7, 3 }
 0x492   :  { %v3388_v42 = vpop.f32.mrf.mxu0  ;;  %v3437_v18 = vpop.f32.mrf.mxu1 }
 0x493   :  { %v3389_v25 = vadd.f32 %v3388_v42, %v6680_v1  ;;  %v3525_v38 = vpop.f32.mrf.mxu3 }
 0x494   :  { %v3526_v15 = vadd.f32 %v3525_v38, %v3477_v40  ;;  %3679 = vmatmul.bf16.gmra.mxu2 %v6475_v5 }
 0x495   :  { %v3438_v32 = vadd.f32 %v3437_v18, %v3389_v25 }
 0x496   :  { %v3780_v45 = vmax.f32 %v3526_v15, 0.0 }
 0x497   :  { %v3484_v44 = vpop.f32.mrf.mxu2 }
 0x498   :  { %v3485_v47 = vadd.f32 %v3484_v44, %v3436_v46  ;;  %3723 = vmatmul.bf16.gmra.mxu3 %v6535_v10  ;;  %v6747_v17 = vpack.c.bf16 %v3780_v45, %v3776_v61  ;;  %v6896_v44 = vld [vmem:[#allocation9_spill] sm:$0xff] }
 0x49a   :  { %v3547_v27 = vpop.f32.mrf.mxu0  ;;  %v3596_v3 = vpop.f32.mrf.mxu1 }
 0x49b   :  { %v3528_v14 = vpop.f32.mrf.mxu3 }
 0x49c   :  { %v3529_v36 = vadd.f32 %v3528_v14, %v3480_v13  ;;  %v3548_v13 = vadd.f32 %v3547_v27, %v6759_v50 }
 0x49d   :  { %4098 = vmatmul.bf16.vlgmr.msrb.gmra.mxu0 %v6561_v0  ;;  %4147 = vmatmul.bf16.vlgmr.msrb.gmra.mxu1 %v6631_v4 }
 0x49e   :  { %v3784_v10 = vmax.f32 %v3529_v36, 0.0 }
 0x49f   :  { %v3486_v5 = vpop.f32.mrf.mxu2 }
 0x4a0   :  { %v3487_v1 = vadd.f32 %v3486_v5, %v3438_v32 }
 0x4a2   :  { %v3549_v63 = vpop.f32.mrf.mxu0  ;;  %v3598_v49 = vpop.f32.mrf.mxu1 }
 0x4a3   :  { %v3530_v56 = vpop.f32.mrf.mxu3  ;;  %v3550_v41 = vadd.f32 %v3549_v63, %v6759_v50 }
 0x4a4   :  { %v3531_v59 = vadd.f32 %v3530_v56, %v3482_v12  ;;  %4196 = vmatmul.bf16.vlgmr.msrb.gmra.mxu2 %v6706_v57 }
 0x4a5   :  { %v3599_v7 = vadd.f32 %v3598_v49, %v3550_v41 }
 0x4a6   :  { %v3788_v43 = vmax.f32 %v3531_v59, 0.0 }
 0x4a7   :  { %v3645_v22 = vpop.f32.mrf.mxu2 }
 0x4a8   :  { %3728 = vmatmul.bf16.gmra.mxu3 %v6547_v48  ;;  %v6753_v54 = vpack.c.bf16 %v3788_v43, %v3784_v10 }
 0x4aa   :  { %v3552_v40 = vpop.f32.mrf.mxu0  ;;  %v3601_v29 = vpop.f32.mrf.mxu1 }
 0x4ab   :  { %v3533_v0 = vpop.f32.mrf.mxu3 }
 0x4ac   :  { %v3534_v58 = vadd.f32 %v3533_v0, %v3485_v47  ;;  %v6897_v0 = vld [vmem:[#allocation10_spill] sm:$0xff] }
 0x4ad   :  { %4103 = vmatmul.bf16.gmra.mxu0 %v6570_v6  ;;  %4152 = vmatmul.bf16.gmra.mxu1 %v6640_v20 }
 0x4ae   :  { %v3792_v48 = vmax.f32 %v3534_v58, 0.0 }
 0x4af   :  { %v3647_v4 = vpop.f32.mrf.mxu2 }
 0x4b0   :  { %v3648_v55 = vadd.f32 %v3647_v4, %v3599_v7  ;;  %v6898_v7 = vld [vmem:[#allocation11_spill] sm:$0xff] }
 0x4b2   :  { %v3554_v37 = vpop.f32.mrf.mxu0  ;;  %v3603_v51 = vpop.f32.mrf.mxu1 }
 0x4b3   :  { %v3535_v31 = vpop.f32.mrf.mxu3  ;;  %v3555_v45 = vadd.f32 %v3554_v37, %v6759_v50 }
 0x4b4   :  { %v3536_v57 = vadd.f32 %v3535_v31, %v3487_v1  ;;  %4201 = vmatmul.bf16.gmra.mxu2 %v6715_v28  ;;  %v3597_v28 = vadd.f32 %v3596_v3, %v3548_v13 }
 0x4b5   :  { %v3604_v27 = vadd.f32 %v3603_v51, %v3555_v45 }
 0x4b6   :  { %v3796_v19 = vmax.f32 %v3536_v57, 0.0  ;;  %v3646_v30 = vadd.f32 %v3645_v22, %v3597_v28 }
 0x4b7   :  { %v3650_v35 = vpop.f32.mrf.mxu2 }
 0x4b8   :  { %v6761_v53 = vpack.c.bf16 %v3796_v19, %v3792_v48 }
 0x4ba   :  { %v3557_v6 = vpop.f32.mrf.mxu0  ;;  %v3606_v33 = vpop.f32.mrf.mxu1 }
 0x4bb   :  { %v3694_v20 = vpop.f32.mrf.mxu3  ;;  %v3558_v43 = vadd.f32 %v3557_v6, %v6759_v50 }
 0x4bc   :  { %v3695_v11 = vadd.f32 %v3694_v20, %v3646_v30 }
 0x4bd   :  { %4108 = vmatmul.bf16.gmra.mxu0 %v6580_v52  ;;  %4157 = vmatmul.bf16.gmra.mxu1 %v6650_v23  ;;  %v3553_v52 = vadd.f32 %v3552_v40, %v6759_v50  ;;  %v3607_v58 = vadd.f32 %v3606_v33, %v3558_v43 }
 0x4be   :  { %v3737_v18 = vmax.f32 %v3695_v11, 0.0 }
 0x4bf   :  { %v3652_v16 = vpop.f32.mrf.mxu2  ;;  %v3602_v47 = vadd.f32 %v3601_v29, %v3553_v52 }
 0x4c0   :  { %v3653_v3 = vadd.f32 %v3652_v16, %v3604_v27 }
 0x4c2   :  { %v3559_v46 = vpop.f32.mrf.mxu0  ;;  %v3608_v34 = vpop.f32.mrf.mxu1 }
 0x4c3   :  { %v3696_v12 = vpop.f32.mrf.mxu3  ;;  %v3560_v29 = vadd.f32 %v3559_v46, %v6759_v50 }
 0x4c4   :  { %v3697_v42 = vadd.f32 %v3696_v12, %v3648_v55  ;;  %4206 = vmatmul.bf16.gmra.mxu2 %v6723_v26  ;;  %v3651_v26 = vadd.f32 %v3650_v35, %v3602_v47  ;;  %v6899_v47 = vld [vmem:[#allocation13_spill] sm:$0xff] }
 0x4c5   :  { %v3609_v37 = vadd.f32 %v3608_v34, %v3560_v29 }
 0x4c6   :  { %v3741_v25 = vmax.f32 %v3697_v42, 0.0 }
 0x4c7   :  { %v3655_v38 = vpop.f32.mrf.mxu2 }
 0x4c8   :  { %v3801_v15 = vpack.c.bf16 %v3741_v25, %v3737_v18 }
 0x4ca   :  { %4245 = vmatmul.bf16.vlgmr.msrb.gmra.mxu3 %v3801_v15  ;;  %v3562_v23 = vpop.f32.mrf.mxu0  ;;  %v3611_v32 = vpop.f32.mrf.mxu1 }
 0x4cb   :  { %v3699_v61 = vpop.f32.mrf.mxu3  ;;  %v3563_v28 = vadd.f32 %v3562_v23, %v6759_v50 }
 0x4cc   :  { %v3700_v14 = vadd.f32 %v3699_v61, %v3651_v26 }
 0x4cd   :  { %4113 = vmatmul.bf16.gmra.mxu0 %v6896_v44  ;;  %4162 = vmatmul.bf16.gmra.mxu1 %v6658_v21  ;;  %v3612_v30 = vadd.f32 %v3611_v32, %v3563_v28 }
 0x4ce   :  { %v3745_v49 = vmax.f32 %v3700_v14, 0.0 }
 0x4cf   :  { %v3657_v62 = vpop.f32.mrf.mxu2 }
 0x4d0   :  { %v3658_v51 = vadd.f32 %v3657_v62, %v3609_v37 }
 0x4d2   :  { %v3564_v36 = vpop.f32.mrf.mxu0  ;;  %v3613_v5 = vpop.f32.mrf.mxu1 }
 0x4d3   :  { %v3701_v1 = vpop.f32.mrf.mxu3  ;;  %v3565_v16 = vadd.f32 %v3564_v36, %v6759_v50 }
 0x4d4   :  { %v3702_v63 = vadd.f32 %v3701_v1, %v3653_v3  ;;  %4211 = vmatmul.bf16.gmra.mxu2 %v6731_v24  ;;  %v3656_v24 = vadd.f32 %v3655_v38, %v3607_v58 }
 0x4d5   :  { %v3614_v46 = vadd.f32 %v3613_v5, %v3565_v16 }
 0x4d6   :  { %v3749_v56 = vmax.f32 %v3702_v63, 0.0 }
 0x4d7   :  { %v3660_v59 = vpop.f32.mrf.mxu2 }
 0x4d8   :  { %v3805_v10 = vpack.c.bf16 %v3749_v56, %v3745_v49 }
 0x4da   :  { %4250 = vmatmul.bf16.gmra.mxu3 %v3805_v10  ;;  %v3567_v21 = vpop.f32.mrf.mxu0  ;;  %v3616_v22 = vpop.f32.mrf.mxu1 }
 0x4db   :  { %v3704_v40 = vpop.f32.mrf.mxu3  ;;  %v3568_v45 = vadd.f32 %v3567_v21, %v6759_v50 }
 0x4dc   :  { %v3705_v31 = vadd.f32 %v3704_v40, %v3656_v24  ;;  %v6900_v40 = vld [vmem:[#allocation12_spill] sm:$0xff] }
 0x4dd   :  { %4118 = vmatmul.bf16.gmra.mxu0 %v6897_v0  ;;  %4167 = vmatmul.bf16.gmra.mxu1 %v6667_v39  ;;  %v3617_v62 = vadd.f32 %v3616_v22, %v3568_v45 }
 0x4de   :  { %v3753_v13 = vmax.f32 %v3705_v31, 0.0 }
 0x4df   :  { %v3662_v4 = vpop.f32.mrf.mxu2 }
 0x4e0   :  { %v3663_v34 = vadd.f32 %v3662_v4, %v3614_v46 }
 0x4e2   :  { %v3569_v57 = vpop.f32.mrf.mxu0  ;;  %v3618_v19 = vpop.f32.mrf.mxu1 }
 0x4e3   :  { %v3706_v48 = vpop.f32.mrf.mxu3  ;;  %v3570_v32 = vadd.f32 %v3569_v57, %v6759_v50 }
 0x4e4   :  { %v3707_v35 = vadd.f32 %v3706_v48, %v3658_v51  ;;  %4216 = vmatmul.bf16.gmra.mxu2 %v6739_v2  ;;  %v3661_v2 = vadd.f32 %v3660_v59, %v3612_v30 }
 0x4e5   :  { %v3619_v26 = vadd.f32 %v3618_v19, %v3570_v32 }
 0x4e6   :  { %v3757_v6 = vmax.f32 %v3707_v35, 0.0 }
 0x4e7   :  { %v3665_v20 = vpop.f32.mrf.mxu2 }
 0x4e8   :  { %v3809_v41 = vpack.c.bf16 %v3757_v6, %v3753_v13 }
 0x4ea   :  { %4255 = vmatmul.bf16.gmra.mxu3 %v3809_v41  ;;  %v3572_v39 = vpop.f32.mrf.mxu0  ;;  %v3621_v55 = vpop.f32.mrf.mxu1 }
 0x4eb   :  { %v3709_v33 = vpop.f32.mrf.mxu3  ;;  %v3573_v43 = vadd.f32 %v3572_v39, %v6759_v50 }
 0x4ec   :  { %v3710_v12 = vadd.f32 %v3709_v33, %v3661_v2 }
 0x4ed   :  { %4123 = vmatmul.bf16.gmra.mxu0 %v6898_v7  ;;  %4172 = vmatmul.bf16.gmra.mxu1 %v6683_v8  ;;  %v3622_v29 = vadd.f32 %v3621_v55, %v3573_v43 }
 0x4ee   :  { %v3761_v38 = vmax.f32 %v3710_v12, 0.0 }
 0x4ef   :  { %v3667_v11 = vpop.f32.mrf.mxu2 }
 0x4f0   :  { %v3668_v3 = vadd.f32 %v3667_v11, %v3619_v26 }
 0x4f2   :  { %v3574_v42 = vpop.f32.mrf.mxu0  ;;  %v3623_v23 = vpop.f32.mrf.mxu1 }
 0x4f3   :  { %v3711_v18 = vpop.f32.mrf.mxu3  ;;  %v3575_v21 = vadd.f32 %v3574_v42, %v6759_v50 }
 0x4f4   :  { %v3712_v25 = vadd.f32 %v3711_v18, %v3663_v34  ;;  %4221 = vmatmul.bf16.gmra.mxu2 %v6747_v17  ;;  %v3666_v17 = vadd.f32 %v3665_v20, %v3617_v62 }
 0x4f5   :  { %v3624_v58 = vadd.f32 %v3623_v23, %v3575_v21 }
 0x4f6   :  { %v3765_v15 = vmax.f32 %v3712_v25, 0.0 }
 0x4f7   :  { %v3670_v52 = vpop.f32.mrf.mxu2 }
 0x4f8   :  { %v3813_v61 = vpack.c.bf16 %v3765_v15, %v3761_v38 }
 0x4fa   :  { %4260 = vmatmul.bf16.gmra.mxu3 %v3813_v61  ;;  %v3577_v44 = vpop.f32.mrf.mxu0  ;;  %v3626_v14 = vpop.f32.mrf.mxu1 }
 0x4fb   :  { %v3714_v8 = vpop.f32.mrf.mxu3  ;;  %v3578_v6 = vadd.f32 %v3577_v44, %v6759_v50 }
 0x4fc   :  { %v3715_v36 = vadd.f32 %v3714_v8, %v3666_v17 }
 0x4fd   :  { %4128 = vmatmul.bf16.gmra.mxu0 %v6899_v47  ;;  %4177 = vmatmul.bf16.gmra.mxu1 %v6691_v9  ;;  %v3627_v28 = vadd.f32 %v3626_v14, %v3578_v6 }
 0x4fe   :  { %v3769_v63 = vmax.f32 %v3715_v36, 0.0 }
 0x4ff   :  { %v3672_v27 = vpop.f32.mrf.mxu2 }
 0x500   :  { %v3673_v37 = vadd.f32 %v3672_v27, %v3624_v58 }
 0x502   :  { %v3579_v56 = vpop.f32.mrf.mxu0  ;;  %v3628_v22 = vpop.f32.mrf.mxu1 }
 0x503   :  { %v3716_v5 = vpop.f32.mrf.mxu3  ;;  %v3580_v41 = vadd.f32 %v3579_v56, %v6759_v50 }
 0x504   :  { %v3717_v1 = vadd.f32 %v3716_v5, %v3668_v3  ;;  %4226 = vmatmul.bf16.gmra.mxu2 %v6753_v54  ;;  %v3671_v54 = vadd.f32 %v3670_v52, %v3622_v29 }
 0x505   :  { %v3629_v39 = vadd.f32 %v3628_v22, %v3580_v41 }
 0x506   :  { %v3773_v49 = vmax.f32 %v3717_v1, 0.0 }
 0x507   :  { %v3675_v59 = vpop.f32.mrf.mxu2 }
 0x508   :  { %v3817_v10 = vpack.c.bf16 %v3773_v49, %v3769_v63  ;;  %v3676_v33 = vadd.f32 %v3675_v59, %v3627_v28 }
 0x50a   :  { %4265 = vmatmul.bf16.gmra.mxu3 %v3817_v10  ;;  %v3582_v4 = vpop.f32.mrf.mxu0  ;;  %v3631_v57 = vpop.f32.mrf.mxu1 }
 0x50b   :  { %v3719_v9 = vpop.f32.mrf.mxu3  ;;  %v3583_v42 = vadd.f32 %v3582_v4, %v6759_v50 }
 0x50c   :  { %v3720_v24 = vadd.f32 %v3719_v9, %v3671_v54 }
 0x50d   :  { %4133 = vmatmul.bf16.gmra.mxu0 %v6900_v40  ;;  %4182 = vmatmul.bf16.gmra.mxu1 %v6699_v60  ;;  %v3632_v52 = vadd.f32 %v3631_v57, %v3583_v42 }
 0x50e   :  { %v3777_v48 = vmax.f32 %v3720_v24, 0.0 }
 0x50f   :  { %v3677_v0 = vpop.f32.mrf.mxu2 }
 0x510   :  { %v3678_v30 = vadd.f32 %v3677_v0, %v3629_v39 }
 0x512   :  { %v3584_v60 = vpop.f32.mrf.mxu0  ;;  %v3633_v16 = vpop.f32.mrf.mxu1 }
 0x513   :  { %v3721_v51 = vpop.f32.mrf.mxu3  ;;  %v3585_v15 = vadd.f32 %v3584_v60, %v6759_v50  ;;  %v6800_v50 = vld [vmem:[%s6874_s8] ss:$0 sm:$0xff] }
 0x514   :  { %v3722_v31 = vadd.f32 %v3721_v51, %v3673_v37  ;;  %4231 = vmatmul.bf16.gmra.mxu2 %v6761_v53 }
 0x515   :  { %v3634_v61 = vadd.f32 %v3633_v16, %v3585_v15 }
 0x516   :  { %v3781_v19 = vmax.f32 %v3722_v31, 0.0 }
 0x517   :  { %v3680_v35 = vpop.f32.mrf.mxu2 }
 0x518   :  { %v3821_v13 = vpack.c.bf16 %v3781_v19, %v3777_v48  ;;  %v3681_v45 = vadd.f32 %v3680_v35, %v3632_v52 }
 0x51a   :  { %4270 = vmatmul.bf16.gmra.mxu3 %v3821_v13  ;;  %v4099_v46 = vpop.f32.mrf.mxu0  ;;  %v4148_v18 = vpop.f32.mrf.mxu1 }
 0x51b   :  { %v3724_v20 = vpop.f32.mrf.mxu3  ;;  %v4100_v63 = vadd.f32 %v6800_v50, %v4099_v46 }
 0x51c   :  { %v3725_v55 = vadd.f32 %v3724_v20, %v3676_v33 }
 0x51d   :  { %v4149_v59 = vadd.f32 %v4148_v18, %v4100_v63 }
 0x51e   :  { %v3785_v2 = vmax.f32 %v3725_v55, 0.0 }
 0x51f   :  { %v3682_v7 = vpop.f32.mrf.mxu2 }
 0x520   :  { %v3683_v8 = vadd.f32 %v3682_v7, %v3634_v61 }
 0x522   :  { %v4101_v23 = vpop.f32.mrf.mxu0  ;;  %v4150_v47 = vpop.f32.mrf.mxu1 }
 0x523   :  { %v3726_v53 = vpop.f32.mrf.mxu3  ;;  %v4102_v21 = vadd.f32 %v6800_v50, %v4101_v23 }
 0x524   :  { %v3727_v11 = vadd.f32 %v3726_v53, %v3678_v30 }
 0x525   :  { %v4151_v40 = vadd.f32 %v4150_v47, %v4102_v21 }
 0x526   :  { %v3789_v34 = vmax.f32 %v3727_v11, 0.0 }
 0x527   :  { %v4197_v25 = vpop.f32.mrf.mxu2 }
 0x528   :  { %v3825_v12 = vpack.c.bf16 %v3789_v34, %v3785_v2  ;;  %v4198_v10 = vadd.f32 %v4197_v25, %v4149_v59 }
 0x52a   :  { %4275 = vmatmul.bf16.gmra.mxu3 %v3825_v12  ;;  %v4104_v14 = vpop.f32.mrf.mxu0  ;;  %v4153_v36 = vpop.f32.mrf.mxu1 }
 0x52b   :  { %v3729_v38 = vpop.f32.mrf.mxu3  ;;  %v4105_v4 = vadd.f32 %v6800_v50, %v4104_v14 }
 0x52c   :  { %v3730_v32 = vadd.f32 %v3729_v38, %v3681_v45 }
 0x52d   :  { %v4154_v51 = vadd.f32 %v4153_v36, %v4105_v4 }
 0x52e   :  { %v3793_v26 = vmax.f32 %v3730_v32, 0.0 }
 0x52f   :  { %v4199_v27 = vpop.f32.mrf.mxu2 }
 0x530   :  { %v4200_v58 = vadd.f32 %v4199_v27, %v4151_v40 }
 0x532   :  { %v4106_v1 = vpop.f32.mrf.mxu0  ;;  %v4155_v49 = vpop.f32.mrf.mxu1 }
 0x533   :  { %v3731_v44 = vpop.f32.mrf.mxu3  ;;  %v4107_v35 = vadd.f32 %v6800_v50, %v4106_v1 }
 0x534   :  { %v3732_v62 = vadd.f32 %v3731_v44, %v3683_v8 }
 0x535   :  { %v4156_v60 = vadd.f32 %v4155_v49, %v4107_v35 }
 0x536   :  { %v3797_v17 = vmax.f32 %v3732_v62, 0.0 }
 0x537   :  { %v4202_v5 = vpop.f32.mrf.mxu2 }
 0x538   :  { %v3829_v3 = vpack.c.bf16 %v3797_v17, %v3793_v26  ;;  %v4203_v31 = vadd.f32 %v4202_v5, %v4154_v51 }
 0x53a   :  { %4280 = vmatmul.bf16.gmra.mxu3 %v3829_v3  ;;  %v4109_v43 = vpop.f32.mrf.mxu0  ;;  %v4158_v29 = vpop.f32.mrf.mxu1 }
 0x53b   :  { %v4110_v28 = vadd.f32 %v6800_v50, %v4109_v43 }
 0x53d   :  { %v4159_v7 = vadd.f32 %v4158_v29, %v4110_v28 }
 0x53f   :  { %v4204_v56 = vpop.f32.mrf.mxu2 }
 0x540   :  { %v4205_v20 = vadd.f32 %v4204_v56, %v4156_v60 }
 0x542   :  { %v4111_v24 = vpop.f32.mrf.mxu0  ;;  %v4160_v57 = vpop.f32.mrf.mxu1 }
 0x543   :  { %v4112_v11 = vadd.f32 %v6800_v50, %v4111_v24 }
 0x545   :  { %v4161_v12 = vadd.f32 %v4160_v57, %v4112_v11 }
 0x547   :  { %v4207_v0 = vpop.f32.mrf.mxu2 }
 0x548   :  { %v4208_v55 = vadd.f32 %v4207_v0, %v4159_v7 }
 0x54a   :  { %v4114_v6 = vpop.f32.mrf.mxu0  ;;  %v4163_v39 = vpop.f32.mrf.mxu1 }
 0x54b   :  { %v4115_v38 = vadd.f32 %v6800_v50, %v4114_v6 }
 0x54d   :  { %v4246_v9 = vpop.f32.mrf.mxu3  ;;  %v4164_v52 = vadd.f32 %v4163_v39, %v4115_v38 }
 0x54e   :  { %v4247_v22 = vadd.f32 %v4246_v9, %v4198_v10 }
 0x54f   :  { %v4209_v48 = vpop.f32.mrf.mxu2 }
 0x550   :  { %4286 = vst [vmem:[%s6875_s9] sm:$0xff] %v4247_v22  ;;  %v4210_v42 = vadd.f32 %v4209_v48, %v4161_v12 }
 0x552   :  { %v4116_v30 = vpop.f32.mrf.mxu0  ;;  %v4165_v2 = vpop.f32.mrf.mxu1 }
 0x553   :  { %v4117_v32 = vadd.f32 %v6800_v50, %v4116_v30 }
 0x555   :  { %v4248_v54 = vpop.f32.mrf.mxu3  ;;  %v4166_v62 = vadd.f32 %v4165_v2, %v4117_v32 }
 0x556   :  { %v4249_v37 = vadd.f32 %v4248_v54, %v4200_v58 }
 0x557   :  { %v4212_v16 = vpop.f32.mrf.mxu2 }
 0x558   :  { %4287 = vst [vmem:[%s6875_s9 + $0x8] sm:$0xff] %v4249_v37  ;;  %v4213_v45 = vadd.f32 %v4212_v16, %v4164_v52 }
 0x55a   :  { %v4119_v18 = vpop.f32.mrf.mxu0  ;;  %v4168_v23 = vpop.f32.mrf.mxu1 }
 0x55b   :  { %v4120_v14 = vadd.f32 %v6800_v50, %v4119_v18 }
 0x55d   :  { %v4251_v19 = vpop.f32.mrf.mxu3  ;;  %v4169_v1 = vadd.f32 %v4168_v23, %v4120_v14 }
 0x55e   :  { %v4252_v13 = vadd.f32 %v4251_v19, %v4203_v31 }
 0x55f   :  { %v4214_v34 = vpop.f32.mrf.mxu2 }
 0x560   :  { %4288 = vst [vmem:[%s6875_s9 + $0x10] sm:$0xff] %v4252_v13  ;;  %v4215_v27 = vadd.f32 %v4214_v34, %v4166_v62 }
 0x562   :  { %v4121_v47 = vpop.f32.mrf.mxu0  ;;  %v4170_v26 = vpop.f32.mrf.mxu1 }
 0x563   :  { %v4122_v56 = vadd.f32 %v6800_v50, %v4121_v47 }
 0x565   :  { %v4253_v41 = vpop.f32.mrf.mxu3  ;;  %v4171_v9 = vadd.f32 %v4170_v26, %v4122_v56 }
 0x566   :  { %v4254_v33 = vadd.f32 %v4253_v41, %v4205_v20 }
 0x567   :  { %v4217_v61 = vpop.f32.mrf.mxu2 }
 0x568   :  { %4289 = vst [vmem:[%s6875_s9 + $0x18] sm:$0xff] %v4254_v33  ;;  %v4218_v63 = vadd.f32 %v4217_v61, %v4169_v1 }
 0x56a   :  { %v4124_v5 = vpop.f32.mrf.mxu0  ;;  %v4173_v59 = vpop.f32.mrf.mxu1 }
 0x56b   :  { %v4125_v29 = vadd.f32 %v6800_v50, %v4124_v5 }
 0x56d   :  { %v4256_v53 = vpop.f32.mrf.mxu3  ;;  %v4174_v4 = vadd.f32 %v4173_v59, %v4125_v29 }
 0x56e   :  { %v4257_v46 = vadd.f32 %v4256_v53, %v4208_v55 }
 0x56f   :  { %v4219_v17 = vpop.f32.mrf.mxu2 }
 0x570   :  { %4290 = vst [vmem:[%s6875_s9 + $0x20] sm:$0xff] %v4257_v46  ;;  %v4220_v22 = vadd.f32 %v4219_v17, %v4171_v9 }
 0x572   :  { %v4126_v21 = vpop.f32.mrf.mxu0  ;;  %v4175_v58 = vpop.f32.mrf.mxu1 }
 0x573   :  { %v4127_v31 = vadd.f32 %v6800_v50, %v4126_v21 }
 0x575   :  { %v4258_v25 = vpop.f32.mrf.mxu3  ;;  %v4176_v48 = vadd.f32 %v4175_v58, %v4127_v31 }
 0x576   :  { %v4259_v15 = vadd.f32 %v4258_v25, %v4210_v42 }
 0x577   :  { %v4222_v43 = vpop.f32.mrf.mxu2 }
 0x578   :  { %4291 = vst [vmem:[%s6875_s9 + $0x28] sm:$0xff] %v4259_v15  ;;  %v4223_v37 = vadd.f32 %v4222_v43, %v4174_v4 }
 0x57a   :  { %v4129_v24 = vpop.f32.mrf.mxu0  ;;  %v4178_v19 = vpop.f32.mrf.mxu1 }
 0x57b   :  { %v4130_v60 = vadd.f32 %v6800_v50, %v4129_v24 }
 0x57d   :  { %v4261_v8 = vpop.f32.mrf.mxu3  ;;  %v4179_v28 = vadd.f32 %v4178_v19, %v4130_v60 }
 0x57e   :  { %v4262_v44 = vadd.f32 %v4261_v8, %v4213_v45 }
 0x57f   :  { %v4224_v54 = vpop.f32.mrf.mxu2 }
 0x580   :  { %4292 = vst [vmem:[%s6875_s9 + $0x30] sm:$0xff] %v4262_v44  ;;  %v4225_v13 = vadd.f32 %v4224_v54, %v4176_v48 }
 0x582   :  { %v4131_v41 = vpop.f32.mrf.mxu0  ;;  %v4180_v39 = vpop.f32.mrf.mxu1 }
 0x583   :  { %v4132_v30 = vadd.f32 %v6800_v50, %v4131_v41 }
 0x585   :  { %v4263_v3 = vpop.f32.mrf.mxu3  ;;  %v4181_v11 = vadd.f32 %v4180_v39, %v4132_v30 }
 0x586   :  { %v4264_v36 = vadd.f32 %v4263_v3, %v4215_v27 }
 0x587   :  { %v4227_v35 = vpop.f32.mrf.mxu2 }
 0x588   :  { %4293 = vst [vmem:[%s6875_s9 + $0x38] sm:$0xff] %v4264_v36  ;;  %v4228_v33 = vadd.f32 %v4227_v35, %v4179_v28 }
 0x58a   :  { %v4134_v53 = vpop.f32.mrf.mxu0  ;;  %v4183_v42 = vpop.f32.mrf.mxu1 }
 0x58b   :  { %v4135_v34 = vadd.f32 %v6800_v50, %v4134_v53 }
 0x58d   :  { %v4266_v49 = vpop.f32.mrf.mxu3  ;;  %v4184_v25 = vadd.f32 %v4183_v42, %v4135_v34 }
 0x58e   :  { %v4267_v10 = vadd.f32 %v4266_v49, %v4218_v63 }
 0x58f   :  { %v4229_v16 = vpop.f32.mrf.mxu2 }
 0x590   :  { %4294 = vst [vmem:[%s6875_s9 + $0x40] sm:$0xff] %v4267_v10  ;;  %v4230_v46 = vadd.f32 %v4229_v16, %v4181_v11 }
 0x592   :  { %v4136_v38 = vpop.f32.mrf.mxu0  ;;  %v4185_v45 = vpop.f32.mrf.mxu1 }
 0x593   :  { %v4137_v23 = vadd.f32 %v6800_v50, %v4136_v38 }
 0x595   :  { %v4268_v40 = vpop.f32.mrf.mxu3  ;;  %v4186_v32 = vadd.f32 %v4185_v45, %v4137_v23 }
 0x596   :  { %v4269_v0 = vadd.f32 %v4268_v40, %v4220_v22 }
 0x597   :  { %v4232_v18 = vpop.f32.mrf.mxu2 }
 0x598   :  { %4295 = vst [vmem:[%s6875_s9 + $0x48] sm:$0xff] %v4269_v0  ;;  %v4233_v15 = vadd.f32 %v4232_v18, %v4184_v25 }
 0x59d   :  { %v4271_v51 = vpop.f32.mrf.mxu3 }
 0x59e   :  { %v4272_v57 = vadd.f32 %v4271_v51, %v4223_v37 }
 0x59f   :  { %v4234_v8 = vpop.f32.mrf.mxu2 }
 0x5a0   :  { %4296 = vst [vmem:[%s6875_s9 + $0x50] sm:$0xff] %v4272_v57  ;;  %v4235_v44 = vadd.f32 %v4234_v8, %v4186_v32 }
 0x5a5   :  { %v4273_v6 = vpop.f32.mrf.mxu3 }
 0x5a6   :  { %v4274_v20 = vadd.f32 %v4273_v6, %v4225_v13 }
 0x5a8   :  { %4297 = vst [vmem:[%s6875_s9 + $0x58] sm:$0xff] %v4274_v20 }
 0x5ad   :  { %v4276_v7 = vpop.f32.mrf.mxu3 }
 0x5ae   :  { %v4277_v55 = vadd.f32 %v4276_v7, %v4228_v33 }
 0x5b0   :  { %4298 = vst [vmem:[%s6875_s9 + $0x60] sm:$0xff] %v4277_v55 }
 0x5b5   :  { %v4278_v2 = vpop.f32.mrf.mxu3 }
 0x5b6   :  { %v4279_v12 = vadd.f32 %v4278_v2, %v4230_v46 }
 0x5b8   :  { %4299 = vst [vmem:[%s6875_s9 + $0x68] sm:$0xff] %v4279_v12 }
 0x5bd   :  { %v4281_v52 = vpop.f32.mrf.mxu3 }
 0x5be   :  { %v4282_v61 = vadd.f32 %v4281_v52, %v4233_v15 }
 0x5c0   :  { %4300 = vst [vmem:[%s6875_s9 + $0x70] sm:$0xff] %v4282_v61 }
 0x5c5   :  { %v4283_v47 = vpop.f32.mrf.mxu3 }
 0x5c6   :  { %v4284_v62 = vadd.f32 %v4283_v47, %v4235_v44 }
 0x5c8   :  { %4301 = vst [vmem:[%s6875_s9 + $0x78] sm:$0xff] %v4284_v62 }
 0x5c9   :  { %4306 = vsyncpa [#allocation3], 1 }
 0x5ca   :  { %4307 = vsyncpa [#allocation5], 1 }

</bundles_post_ra>
